<compile_context>
chip_gen: v6e
topology: v6e:2x2x1
jax: 0.10.0
libtpu: 0.0.40
codegen_flags: <defaults>
</compile_context>

<pallas_src>
import functools

import numpy as np
import jax
import jax.numpy as jnp
from jax.experimental import pallas as pl
from jax.experimental.pallas import tpu as pltpu


def _silu(v):
    return v * jax.nn.sigmoid(v)


def _round_up(x, m):
    return -(-x // m) * m


# -----------------------------------------------------------------------------
# Backend probing helpers
# -----------------------------------------------------------------------------
def _device_kind():
    try:
        return jax.devices()[0].device_kind.lower()
    except Exception:
        return ""


@functools.lru_cache(maxsize=None)
def _roll_mode():
    """Check that pltpu.roll lowers here and matches jnp.roll semantics.

    Returns "xlu" (matches jnp.roll), "xlu_rev" (opposite direction) or
    "concat" (fall back to jnp.roll slice+concat).  Runs one tiny probe kernel.
    """
    try:
        def k(x_ref, o_ref):
            o_ref[...] = pltpu.roll(x_ref[...], 1, axis=1)

        x = (jnp.arange(16 * 256, dtype=jnp.int32) % 251).reshape(16, 256)
        x = x.astype(jnp.bfloat16)
        y = pl.pallas_call(
            k, out_shape=jax.ShapeDtypeStruct((16, 256), jnp.bfloat16))(x)
        y = np.asarray(jax.block_until_ready(y).astype(jnp.float32))
        fwd = np.asarray(jnp.roll(x, 1, axis=1).astype(jnp.float32))
        rev = np.asarray(jnp.roll(x, -1, axis=1).astype(jnp.float32))
        if np.array_equal(y, fwd):
            return "xlu"
        if np.array_equal(y, rev):
            return "xlu_rev"
    except Exception:
        pass
    return "concat"


# -----------------------------------------------------------------------------
# VMEM footprint model + batch-fold selection
# -----------------------------------------------------------------------------
def _vmem_bytes_estimate(*, E, C, N, K, W, Bt):
    Btp = _round_up(max(Bt, 1), 128)
    b2, b4 = 2, 4
    weights = ((C * E + N * 2 * C * K * C + N * 2 * C * C + C * C + E * C) * b2
               + (C + 4 * N * C + C + E) * b4)
    # double-buffered input / output / conditioning / one-hot blocks
    io = 2 * (E * W * (b2 + b4) + N * C * Btp * b2 + Btp * W * b2)
    # peak live activations: h, skips, lam, acc(2C), rs(2C) in f32; K+2 C-rows bf16
    acts = W * C * (8 * b4 + (K + 2) * b2)
    return weights + io + acts


def _vmem_limit_bytes(**kw):
    return int(max(24 * 2 ** 20, round(1.5 * _vmem_bytes_estimate(**kw))))


def _pick_bt(B, L, *, E, C, N, K, n_cores, vmem_budget, max_lanes=8192):
    """Largest batch fold Bt (lanes per grid step = Bt*L) fitting the budget,
    preferring grid counts that are a multiple of the TensorCore count."""
    def structural(bt):
        return bt == B or (bt * L) % 128 == 0

    def fits(bt):
        return (bt * L <= max_lanes and
                _vmem_limit_bytes(E=E, C=C, N=N, K=K, W=bt * L, Bt=bt)
                <= vmem_budget)

    divs = [d for d in range(1, B + 1) if B % d == 0 and structural(d)]
    assert divs, "no structurally valid batch fold"
    good = [d for d in divs if fits(d)] or [min(divs)]
    pref = [d for d in good if (B // d) % n_cores == 0] or good
    return max(pref)


# -----------------------------------------------------------------------------
# Pallas kernel: input conv + N residual layers + output convs.
# One grid step processes Bt batch elements folded along lanes: (C, Bt*L).
# -----------------------------------------------------------------------------
def diffeeg_kernel(x_ref, lam_ref, oneh_ref,
                   w_in_ref, b_in_ref,
                   w_dil_ref, b_dil_ref, w_rs_ref, b_rs_ref,
                   w_out1_ref, b_out1_ref, w_out2_ref, b_out2_ref,
                   o_ref, *, dilations, K, C, L, Bt, eup_dtype, roll_mode):
    W = Bt * L
    f32 = jnp.float32

    # input conv: kernel spans the full E height -> per-position linear E->C, SiLU
    h = jnp.dot(w_in_ref[...], x_ref[...], preferred_element_type=f32) + b_in_ref[...]
    h = _silu(h)                                                      # (C, W) f32

    # hoisted conv-boundary masks: one (1, W) mask per distinct lane offset
    lane_mod = jax.lax.broadcasted_iota(jnp.int32, (1, W), 1) % L
    offsets = sorted({k * d - d * (K - 1) // 2
                      for d in dilations for k in range(K)} - {0})
    keep = {off: (lane_mod < L - off) if off > 0 else (lane_mod >= -off)
            for off in offsets}

    def rotate(v, shift):        # jnp.roll convention: out[l] = v[(l - shift) % W]
        if roll_mode == "xlu":
            return pltpu.roll(v, shift, axis=1)
        if roll_mode == "xlu_rev":
            return pltpu.roll(v, (W - shift) % W, axis=1)
        return jnp.roll(v, shift, axis=1)

    def tap(v, off):             # out[:, l] = v[:, l + off] within each L-segment
        if off == 0:
            return v
        return jnp.where(keep[off], rotate(v, (-off) % W), 0)

    oneh = oneh_ref[...]                                              # (Btp, W) bf16

    # Residual stack, statically unrolled (dilations are Python ints).
    # TODO(synk): for very large N*C, move the layer index onto an "arbitrary"
    # grid axis and stream per-layer weight blocks (h/skips in VMEM scratch).
    skips = None
    for i, d in enumerate(dilations):
        # per-batch-segment conditioning bias: one tiny lane-aligned MXU matmul
        lam = jnp.dot(lam_ref[0, i], oneh, preferred_element_type=f32)    # (C, W)
        xt = (h + lam).astype(jnp.bfloat16)

        # dilated 'same' conv: K lane-shifted copies stacked -> ONE matmul (K*C)
        p = d * (K - 1) // 2
        stacked = jnp.concatenate([tap(xt, k * d - p) for k in range(K)], axis=0)
        acc = jnp.dot(w_dil_ref[i], stacked,
                      preferred_element_type=f32) + b_dil_ref[i]          # (2C, W)

        # gated activation on the EUP (bf16 on v6e/v7x, f32 on v5e)
        gate = (jnp.tanh(acc[:C].astype(eup_dtype))
                * jax.nn.sigmoid(acc[C:].astype(eup_dtype))).astype(jnp.bfloat16)

        # fused residual + skip 1x1 convs: one (2C, C) matmul, split rows after
        rs = jnp.dot(w_rs_ref[i], gate, preferred_element_type=f32) + b_rs_ref[i]
        h = rs[:C]
        skips = rs[C:] if skips is None else skips + rs[C:]

    # output convs (1x1): C -> C (SiLU) -> E   (one-off SiLUs stay f32)
    o1 = _silu(jnp.dot(w_out1_ref[...], skips.astype(jnp.bfloat16),
                       preferred_element_type=f32) + b_out1_ref[...])
    out = jnp.dot(w_out2_ref[...], o1.astype(jnp.bfloat16),
                  preferred_element_type=f32) + b_out2_ref[...]
    o_ref[...] = out                                                  # (E, W) f32


# -----------------------------------------------------------------------------
# Glue (plain JAX): diffusion step embedding, conditioning MLP, embeddings
# -----------------------------------------------------------------------------
def compute_conditioning(params, lambd, class_condition, subject_condition):
    idx = 10.0 ** (jnp.arange(64, dtype=jnp.float32) * 4.0 / 63.0)
    tmp = idx[None, :] * lambd[:, None]
    emb = jnp.concatenate([jnp.sin(tmp), jnp.cos(tmp)], axis=-1)      # (B, 128)
    h = _silu(emb @ params["w_l1"].T + params["b_l1"])
    h = _silu(h @ params["w_l2"].T + params["b_l2"])                  # (B, 512)
    enc = h
    if class_condition is not None:
        enc = enc + params["class_emb"][class_condition]
    if subject_condition is not None:
        enc = enc + params["subject_emb"][subject_condition]
    return enc


def diffeeg_forward(params, x, lambd, class_condition, subject_condition,
                    *, N, n, C, E, K):
    B, E_, L = x.shape
    assert E_ == E
    assert K % 2 == 1, ("'same'-padding offset math assumes odd K; PyTorch pads "
                        "asymmetrically for even K")

    dilations = tuple((2 ** i) % n for i in range(N))
    assert all(d >= 1 for d in dilations), \
        "dilation 0 not supported (PyTorch Conv2d would reject it)"

    enc = compute_conditioning(params, lambd, class_condition, subject_condition)
    # per-residual-layer Linear(512, C) projections -> (B, N, C)
    lam_proj = jnp.einsum("bd,icd->bic", enc, params["w_lam"]) + params["b_lam"][None]

    # ---- backend-dependent tuning knobs --------------------------------------
    kind = _device_kind()
    is_v7 = ("v7" in kind) or ("tpu7" in kind.replace(" ", ""))
    eup_dtype = jnp.bfloat16 if (is_v7 or "v6" in kind) else jnp.float32
    n_cores = 2 if is_v7 else 1                       # TensorCores per chip
    # conservative 64 MiB VMEM unless we positively identify a 128 MiB part
    vmem_cap_mib = 128 if any(v in kind for v in ("v4", "v5", "v6")) else 64
    vmem_budget = int(0.7 * vmem_cap_mib * 2 ** 20)

    Bt = _pick_bt(B, L, E=E, C=C, N=N, K=K,
                  n_cores=n_cores, vmem_budget=vmem_budget)
    G, W = B // Bt, Bt * L
    Btp = _round_up(Bt, 128)                          # lane-dense conditioning
    assert G * Bt == B and (G == 1 or W % 128 == 0)

    # ---- data / weight layouts for the kernel ---------------------------------
    # x: (B, E, L) -> (E, B*L); cast to bf16 BEFORE the transpose (less HBM traffic)
    x2 = jnp.transpose(x.astype(jnp.bfloat16), (1, 0, 2)).reshape(E, B * L)
    # conditioning: (B, N, C) -> (G, N, C, Btp) bf16 (zero-padded lanes beyond Bt)
    lam_blk = lam_proj.reshape(G, Bt, N, C).transpose(0, 2, 3, 1)     # (G,N,C,Bt)
    lam2 = jnp.zeros((G, N, C, Btp), jnp.bfloat16).at[..., :Bt].set(
        lam_blk.astype(jnp.bfloat16))
    # segment one-hot: oneh[b, w] = 1 iff lane w belongs to local batch b
    oneh = (jax.lax.broadcasted_iota(jnp.int32, (Btp, W), 0)
            == jax.lax.broadcasted_iota(jnp.int32, (Btp, W), 1) // L
            ).astype(jnp.bfloat16)
    # dilated conv weights (N, K, 2C, C) -> fused contraction (N, 2C, K*C), bf16
    w_dil_f = params["w_dil"].transpose(0, 2, 1, 3).reshape(
        N, 2 * C, K * C).astype(jnp.bfloat16)
    # fused res/skip weights (N, 2C, C) bf16, biases (N, 2C, 1) f32
    w_rs = jnp.concatenate([params["w_res"], params["w_skip"]],
                           axis=1).astype(jnp.bfloat16)
    b_rs = jnp.concatenate([params["b_res"], params["b_skip"]], axis=1)

    kernel = functools.partial(
        diffeeg_kernel, dilations=dilations, K=K, C=C, L=L, Bt=Bt,
        eup_dtype=eup_dtype, roll_mode=_roll_mode())

    def const_spec(shp):
        return pl.BlockSpec(shp, lambda g: (0,) * len(shp))

    weight_bytes = ((C * E + N * 2 * C * K * C + N * 2 * C * C + C * C + E * C) * 2
                    + (C + 4 * N * C + C + E) * 4)
    cost = pl.CostEstimate(
        flops=2 * B * L * (E * C + C * C + C * E
                           + N * (C * Btp + 2 * C * K * C + 2 * C * C)),
        transcendentals=B * L * C * (2 * N + 2),
        bytes_accessed=(x2.size * 2 + B * L * E * 4 + lam2.size * 2
                        + oneh.size * 2 + weight_bytes))

    out2 = pl.pallas_call(
        kernel,
        out_shape=jax.ShapeDtypeStruct((E, B * L), jnp.float32),
        grid=(G,),
        in_specs=[
            pl.BlockSpec((E, W), lambda g: (0, g)),                    # x (bf16)
            pl.BlockSpec((1, N, C, Btp), lambda g: (g, 0, 0, 0)),      # conditioning
            pl.BlockSpec((Btp, W), lambda g: (0, 0)),                  # segment one-hot
            const_spec((C, E)), const_spec((C, 1)),                    # input conv
            const_spec((N, 2 * C, K * C)), const_spec((N, 2 * C, 1)),  # dilated convs
            const_spec((N, 2 * C, C)), const_spec((N, 2 * C, 1)),      # res+skip fused
            const_spec((C, C)), const_spec((C, 1)),                    # out conv 1
            const_spec((E, C)), const_spec((E, 1)),                    # out conv 2
        ],
        out_specs=pl.BlockSpec((E, W), lambda g: (0, g)),
        compiler_params=pltpu.CompilerParams(
            dimension_semantics=("parallel",),
            vmem_limit_bytes=_vmem_limit_bytes(E=E, C=C, N=N, K=K, W=W, Bt=Bt)),
        cost_estimate=cost,
    )(x2, lam2, oneh,
      params["w_in"].astype(jnp.bfloat16), params["b_in"],
      w_dil_f, params["b_dil"],
      w_rs, b_rs,
      params["w_out1"].astype(jnp.bfloat16), params["b_out1"],
      params["w_out2"].astype(jnp.bfloat16), params["b_out2"])

    # keep the final result f32 (it feeds a loss); bf16 output is an option if
    # downstream tolerates it.
    out = out2.reshape(E, B, L).transpose(1, 0, 2)                     # (B, E, L)

    # TODO(synk): calculate_erd_ers(_loss) undefined in reference; 0.0 placeholder.
    erd_ers_loss = jnp.float32(0.0)
    return out, erd_ers_loss


# -----------------------------------------------------------------------------
# Deterministic parameter init (shapes follow the PyTorch module __init__)
# -----------------------------------------------------------------------------
def init_params(key, *, n_class, n_subject, N, C, E, K):
    ks = jax.random.split(key, 20)
    g = lambda k, shape, s=0.1: jax.random.normal(k, shape, jnp.float32) * s
    return dict(
        w_l1=g(ks[0], (512, 128)), b_l1=g(ks[1], (512,)),
        w_l2=g(ks[2], (512, 512), 0.05), b_l2=g(ks[3], (512,)),
        class_emb=g(ks[4], (n_class, 512)),
        subject_emb=g(ks[5], (n_subject, 512)),
        w_lam=g(ks[6], (N, C, 512), 0.05), b_lam=g(ks[7], (N, C)),
        w_in=g(ks[8], (C, E)), b_in=g(ks[9], (C, 1)),
        w_dil=g(ks[10], (N, K, 2 * C, C)), b_dil=g(ks[11], (N, 2 * C, 1)),
        w_res=g(ks[12], (N, C, C)), b_res=g(ks[13], (N, C, 1)),
        w_skip=g(ks[14], (N, C, C)), b_skip=g(ks[15], (N, C, 1)),
        w_out1=g(ks[16], (C, C)), b_out1=g(ks[17], (C, 1)),
        w_out2=g(ks[18], (E, C)), b_out2=g(ks[19], (E, 1)),
    )


# -----------------------------------------------------------------------------
# NumPy float64 reference (same semantics as the PyTorch forward)
# -----------------------------------------------------------------------------
def np_reference(params, x, enc, *, N, n, C, E, K):
    P = {k: np.asarray(v, np.float64) for k, v in params.items()}
    x = np.asarray(x, np.float64)
    enc = np.asarray(enc, np.float64)
    silu = lambda v: v / (1.0 + np.exp(-v))
    sig = lambda v: 1.0 / (1.0 + np.exp(-v))
    B, _, L = x.shape

    hs = silu(np.einsum("ce,bel->bcl", P["w_in"], x) + P["b_in"][None])
    skips = np.zeros_like(hs)
    for i in range(N):
        d = (2 ** i) % n
        lam = enc @ P["w_lam"][i].T + P["b_lam"][i]                   # (B, C)
        xt = hs + lam[:, :, None]
        p = d * (K - 1) // 2
        xt_p = np.pad(xt, ((0, 0), (0, 0), (p, p)))
        acc = np.zeros((B, 2 * C, L))
        for k in range(K):
            acc += np.einsum("oc,bcl->bol", P["w_dil"][i, k],
                             xt_p[:, :, k * d: k * d + L])
        acc += P["b_dil"][i][None]
        gate = np.tanh(acc[:, :C]) * sig(acc[:, C:])
        hs = np.einsum("oc,bcl->bol", P["w_res"][i], gate) + P["b_res"][i][None]
        skips = skips + np.einsum("oc,bcl->bol", P["w_skip"][i], gate) + P["b_skip"][i][None]
    o1 = silu(np.einsum("oc,bcl->bol", P["w_out1"], skips) + P["b_out1"][None])
    return np.einsum("ec,bcl->bel", P["w_out2"], o1) + P["b_out2"][None]


if __name__ == "__main__":
    # Small shapes consistent with the module (B, E, L) input, N residual layers
    B, E, L = 2, 8, 128
    N, n, C, K = 4, 7, 32, 3
    n_class, n_subject = 2, 3

    key = jax.random.PRNGKey(0)
    kx, kl, kp = jax.random.split(key, 3)
    x = jax.random.normal(kx, (B, E, L), jnp.float32)
    lambd = jax.random.normal(kl, (B,), jnp.float32)
    class_condition = jnp.array([0, 1], dtype=jnp.int32)
    subject_condition = jnp.array([1, 2], dtype=jnp.int32)

    params = init_params(kp, n_class=n_class, n_subject=n_subject,
                         N=N, C=C, E=E, K=K)

    out, erd_ers_loss = diffeeg_forward(params, x, lambd, class_condition,
                                        subject_condition, N=N, n=n, C=C, E=E, K=K)
    out = jax.block_until_ready(out)

    # Correctness check against a NumPy float64 reference (bf16 matmul operands
    # in the kernel -> slightly looser tolerance).
    enc = compute_conditioning(params, lambd, class_condition, subject_condition)
    ref = np_reference(params, x, enc, N=N, n=n, C=C, E=E, K=K)
    np.testing.assert_allclose(np.asarray(out), ref, atol=3e-2, rtol=3e-2)

    print("KERNEL_OK")
</pallas_src>

<mosaic_0001>
module attributes {stable_mosaic.version = 11 : i64} {
  func.func @k(%arg0: memref<16x256xbf16, #tpu.memory_space<vmem>>, %arg1: memref<16x256xbf16, #tpu.memory_space<vmem>>) attributes {dimension_semantics = [], scalar_prefetch = 0 : i64, scratch_operands = 0 : i64, tpu.core_type = #tpu.core_type<tc>} {
    %c0 = arith.constant 0 : index
    %c0_0 = arith.constant 0 : index
    %0 = vector.load %arg0[%c0, %c0_0] : memref<16x256xbf16, #tpu.memory_space<vmem>>, vector<16x256xbf16>
    %c1_i32 = arith.constant 1 : i32
    %1 = tpu.dynamic_rotate %0 by %c1_i32 dim 1 : vector<16x256xbf16>, i32 -> vector<16x256xbf16>
    %c0_1 = arith.constant 0 : index
    %c0_2 = arith.constant 0 : index
    %2 = vector.load %arg1[%c0_1, %c0_2] : memref<16x256xbf16, #tpu.memory_space<vmem>>, vector<16x256xbf16>
    tpu.vector_store %arg1[%c0_1, %c0_2], %1 {strides = array<i32>} : memref<16x256xbf16, #tpu.memory_space<vmem>>, vector<16x256xbf16>,
    return
  }
}

module attributes {stable_mosaic.version = 11 : i64} {
  func.func @diffeeg_kernel(%arg0: i32, %arg1: memref<8x256xbf16, #tpu.memory_space<vmem>>, %arg2: memref<1x4x32x128xbf16, #tpu.memory_space<vmem>>, %arg3: memref<128x256xbf16, #tpu.memory_space<vmem>>, %arg4: memref<32x8xbf16, #tpu.memory_space<vmem>>, %arg5: memref<32x1xf32, #tpu.memory_space<vmem>>, %arg6: memref<4x64x96xbf16, #tpu.memory_space<vmem>>, %arg7: memref<4x64x1xf32, #tpu.memory_space<vmem>>, %arg8: memref<4x64x32xbf16, #tpu.memory_space<vmem>>, %arg9: memref<4x64x1xf32, #tpu.memory_space<vmem>>, %arg10: memref<32x32xbf16, #tpu.memory_space<vmem>>, %arg11: memref<32x1xf32, #tpu.memory_space<vmem>>, %arg12: memref<8x32xbf16, #tpu.memory_space<vmem>>, %arg13: memref<8x1xf32, #tpu.memory_space<vmem>>, %arg14: memref<8x256xf32, #tpu.memory_space<vmem>>) attributes {dimension_semantics = [#tpu.dimension_semantics<parallel>], iteration_bounds = array<i64: 1>, scalar_prefetch = 0 : i64, scratch_operands = 0 : i64, tpu.core_type = #tpu.core_type<tc>, window_params = [{transform_indices = @transform_0, window_bounds = array<i64: 8, 256>}, {transform_indices = @transform_1, window_bounds = array<i64: 1, 4, 32, 128>}, {pipeline_mode = #tpu.pipeline_mode<synchronous>, transform_indices = @transform_2, window_bounds = array<i64: 128, 256>}, {pipeline_mode = #tpu.pipeline_mode<synchronous>, transform_indices = @transform_3, window_bounds = array<i64: 32, 8>}, {pipeline_mode = #tpu.pipeline_mode<synchronous>, transform_indices = @transform_4, window_bounds = array<i64: 32, 1>}, {pipeline_mode = #tpu.pipeline_mode<synchronous>, transform_indices = @transform_5, window_bounds = array<i64: 4, 64, 96>}, {pipeline_mode = #tpu.pipeline_mode<synchronous>, transform_indices = @transform_6, window_bounds = array<i64: 4, 64, 1>}, {pipeline_mode = #tpu.pipeline_mode<synchronous>, transform_indices = @transform_7, window_bounds = array<i64: 4, 64, 32>}, {pipeline_mode = #tpu.pipeline_mode<synchronous>, transform_indices = @transform_8, window_bounds = array<i64: 4, 64, 1>}, {pipeline_mode = #tpu.pipeline_mode<synchronous>, transform_indices = @transform_9, window_bounds = array<i64: 32, 32>}, {pipeline_mode = #tpu.pipeline_mode<synchronous>, transform_indices = @transform_10, window_bounds = array<i64: 32, 1>}, {pipeline_mode = #tpu.pipeline_mode<synchronous>, transform_indices = @transform_11, window_bounds = array<i64: 8, 32>}, {pipeline_mode = #tpu.pipeline_mode<synchronous>, transform_indices = @transform_12, window_bounds = array<i64: 8, 1>}, {transform_indices = @transform_13, window_bounds = array<i64: 8, 256>}]} {
    %c0 = arith.constant 0 : index
    %c0_0 = arith.constant 0 : index
    %0 = vector.load %arg4[%c0, %c0_0] : memref<32x8xbf16, #tpu.memory_space<vmem>>, vector<32x8xbf16>
    %c0_1 = arith.constant 0 : index
    %c0_2 = arith.constant 0 : index
    %1 = vector.load %arg1[%c0_1, %c0_2] : memref<8x256xbf16, #tpu.memory_space<vmem>>, vector<8x256xbf16>
    %cst = arith.constant dense<0.000000e+00> : vector<32x256xf32>
    %2 = tpu.matmul %0, %1, %cst {dimension_numbers = #tpu.dot_dimension_numbers<[1], [0], [0], [1], [0, 0, 1, 1], [], []>} : vector<32x8xbf16>, vector<8x256xbf16>, vector<32x256xf32> -> vector<32x256xf32>
    %c0_3 = arith.constant 0 : index
    %c0_4 = arith.constant 0 : index
    %3 = vector.load %arg5[%c0_3, %c0_4] : memref<32x1xf32, #tpu.memory_space<vmem>>, vector<32x1xf32>
    %4 = vector.broadcast %3 : vector<32x1xf32> to vector<32x256xf32>
    %5 = arith.addf %2, %4 : vector<32x256xf32>
    %6 = arith.negf %5 : vector<32x256xf32>
    %7 = math.exp %6 : vector<32x256xf32>
    %cst_5 = arith.constant 1.000000e+00 : f32
    %8 = vector.broadcast %cst_5 : f32 to vector<32x256xf32>
    %9 = arith.addf %8, %7 : vector<32x256xf32>
    %10 = arith.divf %8, %9 : vector<32x256xf32>
    %11 = arith.mulf %5, %10 : vector<32x256xf32>
    %12 = tpu.iota {dimensions = array<i32: 1>} : vector<1x256xi32>
    %c128_i32 = arith.constant 128 : i32
    %c0_i32 = arith.constant 0 : i32
    %13 = arith.cmpi eq, %c128_i32, %c0_i32 : i32
    %c1_i32 = arith.constant 1 : i32
    %14 = arith.select %13, %c1_i32, %c128_i32 : i32
    %15 = vector.broadcast %14 : i32 to vector<1x256xi32>
    %16 = arith.remsi %12, %15 : vector<1x256xi32>
    %c0_i32_6 = arith.constant 0 : i32
    %17 = vector.broadcast %c0_i32_6 : i32 to vector<1x256xi32>
    %18 = arith.cmpi ne, %16, %17 : vector<1x256xi32>
    %c0_i32_7 = arith.constant 0 : i32
    %19 = vector.broadcast %c0_i32_7 : i32 to vector<1x256xi32>
    %20 = arith.cmpi slt, %16, %19 : vector<1x256xi32>
    %c0_i32_8 = arith.constant 0 : i32
    %21 = arith.cmpi slt, %14, %c0_i32_8 : i32
    %22 = vector.broadcast %21 : i1 to vector<1x256xi1>
    %23 = vector.broadcast %22 : vector<1x256xi1> to vector<1x256xi1>
    %24 = arith.xori %20, %23 : vector<1x256xi1>
    %25 = arith.andi %24, %18 : vector<1x256xi1>
    %26 = vector.broadcast %14 : i32 to vector<1x256xi32>
    %27 = arith.addi %16, %26 : vector<1x256xi32>
    %28 = arith.select %25, %27, %16 : vector<1x256xi1>, vector<1x256xi32>
    %c4_i32 = arith.constant 4 : i32
    %29 = vector.broadcast %c4_i32 : i32 to vector<1x256xi32>
    %30 = arith.cmpi sge, %28, %29 : vector<1x256xi32>
    %c2_i32 = arith.constant 2 : i32
    %31 = vector.broadcast %c2_i32 : i32 to vector<1x256xi32>
    %32 = arith.cmpi sge, %28, %31 : vector<1x256xi32>
    %c1_i32_9 = arith.constant 1 : i32
    %33 = vector.broadcast %c1_i32_9 : i32 to vector<1x256xi32>
    %34 = arith.cmpi sge, %28, %33 : vector<1x256xi32>
    %c127_i32 = arith.constant 127 : i32
    %35 = vector.broadcast %c127_i32 : i32 to vector<1x256xi32>
    %36 = arith.cmpi slt, %28, %35 : vector<1x256xi32>
    %c126_i32 = arith.constant 126 : i32
    %37 = vector.broadcast %c126_i32 : i32 to vector<1x256xi32>
    %38 = arith.cmpi slt, %28, %37 : vector<1x256xi32>
    %c124_i32 = arith.constant 124 : i32
    %39 = vector.broadcast %c124_i32 : i32 to vector<1x256xi32>
    %40 = arith.cmpi slt, %28, %39 : vector<1x256xi32>
    %c0_10 = arith.constant 0 : index
    %c0_11 = arith.constant 0 : index
    %41 = vector.load %arg3[%c0_10, %c0_11] : memref<128x256xbf16, #tpu.memory_space<vmem>>, vector<128x256xbf16>
    %c0_12 = arith.constant 0 : index
    %c0_13 = arith.constant 0 : index
    %c0_14 = arith.constant 0 : index
    %c0_15 = arith.constant 0 : index
    %42 = vector.load %arg2[%c0_12, %c0_13, %c0_14, %c0_15] : memref<1x4x32x128xbf16, #tpu.memory_space<vmem>>, vector<1x1x32x128xbf16>
    %43 = vector.shape_cast %42 : vector<1x1x32x128xbf16> to vector<32x128xbf16>
    %cst_16 = arith.constant dense<0.000000e+00> : vector<32x256xf32>
    %44 = tpu.matmul %43, %41, %cst_16 {dimension_numbers = #tpu.dot_dimension_numbers<[1], [0], [0], [1], [0, 0, 1, 1], [], []>} : vector<32x128xbf16>, vector<128x256xbf16>, vector<32x256xf32> -> vector<32x256xf32>
    %45 = arith.addf %11, %44 : vector<32x256xf32>
    %46 = arith.truncf %45 : vector<32x256xf32> to vector<32x256xbf16>
    %47 = vector.extract_strided_slice %46 {offsets = [0, 255], sizes = [32, 1], strides = [1, 1]} : vector<32x256xbf16> to vector<32x1xbf16>
    %48 = vector.extract_strided_slice %46 {offsets = [0, 0], sizes = [32, 255], strides = [1, 1]} : vector<32x256xbf16> to vector<32x255xbf16>
    %49 = tpu.concatenate %47, %48 in 1 : vector<32x1xbf16>, vector<32x255xbf16> -> vector<32x256xbf16>
    %c0_i32_17 = arith.constant 0 : i32
    %50 = arith.sitofp %c0_i32_17 : i32 to bf16
    %51 = vector.shape_cast %34 : vector<1x256xi1> to vector<1x256xi1>
    %52 = vector.broadcast %51 : vector<1x256xi1> to vector<32x256xi1>
    %53 = vector.broadcast %50 : bf16 to vector<32x256xbf16>
    %54 = arith.select %52, %49, %53 : vector<32x256xi1>, vector<32x256xbf16>
    %55 = vector.extract_strided_slice %46 {offsets = [0, 1], sizes = [32, 255], strides = [1, 1]} : vector<32x256xbf16> to vector<32x255xbf16>
    %56 = vector.extract_strided_slice %46 {offsets = [0, 0], sizes = [32, 1], strides = [1, 1]} : vector<32x256xbf16> to vector<32x1xbf16>
    %57 = tpu.concatenate %55, %56 in 1 : vector<32x255xbf16>, vector<32x1xbf16> -> vector<32x256xbf16>
    %c0_i32_18 = arith.constant 0 : i32
    %58 = arith.sitofp %c0_i32_18 : i32 to bf16
    %59 = vector.shape_cast %36 : vector<1x256xi1> to vector<1x256xi1>
    %60 = vector.broadcast %59 : vector<1x256xi1> to vector<32x256xi1>
    %61 = vector.broadcast %58 : bf16 to vector<32x256xbf16>
    %62 = arith.select %60, %57, %61 : vector<32x256xi1>, vector<32x256xbf16>
    %63 = tpu.concatenate %54, %46, %62 in 0 : vector<32x256xbf16>, vector<32x256xbf16>, vector<32x256xbf16> -> vector<96x256xbf16>
    %c0_19 = arith.constant 0 : index
    %c0_20 = arith.constant 0 : index
    %c0_21 = arith.constant 0 : index
    %64 = vector.load %arg6[%c0_19, %c0_20, %c0_21] : memref<4x64x96xbf16, #tpu.memory_space<vmem>>, vector<1x64x96xbf16>
    %65 = vector.shape_cast %64 : vector<1x64x96xbf16> to vector<64x96xbf16>
    %cst_22 = arith.constant dense<0.000000e+00> : vector<64x256xf32>
    %66 = tpu.matmul %65, %63, %cst_22 {dimension_numbers = #tpu.dot_dimension_numbers<[1], [0], [0], [1], [0, 0, 1, 1], [], []>} : vector<64x96xbf16>, vector<96x256xbf16>, vector<64x256xf32> -> vector<64x256xf32>
    %c0_23 = arith.constant 0 : index
    %c0_24 = arith.constant 0 : index
    %c0_25 = arith.constant 0 : index
    %67 = vector.load %arg7[%c0_23, %c0_24, %c0_25] : memref<4x64x1xf32, #tpu.memory_space<vmem>>, vector<1x64x1xf32>
    %68 = vector.shape_cast %67 : vector<1x64x1xf32> to vector<64x1xf32>
    %69 = vector.broadcast %68 : vector<64x1xf32> to vector<64x256xf32>
    %70 = arith.addf %66, %69 : vector<64x256xf32>
    %71 = vector.extract_strided_slice %70 {offsets = [0, 0], sizes = [32, 256], strides = [1, 1]} : vector<64x256xf32> to vector<32x256xf32>
    %72 = math.tanh %71 : vector<32x256xf32>
    %73 = vector.extract_strided_slice %70 {offsets = [32, 0], sizes = [32, 256], strides = [1, 1]} : vector<64x256xf32> to vector<32x256xf32>
    %74 = arith.negf %73 : vector<32x256xf32>
    %75 = math.exp %74 : vector<32x256xf32>
    %cst_26 = arith.constant 1.000000e+00 : f32
    %76 = vector.broadcast %cst_26 : f32 to vector<32x256xf32>
    %77 = arith.addf %76, %75 : vector<32x256xf32>
    %78 = arith.divf %76, %77 : vector<32x256xf32>
    %79 = arith.mulf %72, %78 : vector<32x256xf32>
    %80 = arith.truncf %79 : vector<32x256xf32> to vector<32x256xbf16>
    %c0_27 = arith.constant 0 : index
    %c0_28 = arith.constant 0 : index
    %c0_29 = arith.constant 0 : index
    %81 = vector.load %arg8[%c0_27, %c0_28, %c0_29] : memref<4x64x32xbf16, #tpu.memory_space<vmem>>, vector<1x64x32xbf16>
    %82 = vector.shape_cast %81 : vector<1x64x32xbf16> to vector<64x32xbf16>
    %cst_30 = arith.constant dense<0.000000e+00> : vector<64x256xf32>
    %83 = tpu.matmul %82, %80, %cst_30 {dimension_numbers = #tpu.dot_dimension_numbers<[1], [0], [0], [1], [0, 0, 1, 1], [], []>} : vector<64x32xbf16>, vector<32x256xbf16>, vector<64x256xf32> -> vector<64x256xf32>
    %c0_31 = arith.constant 0 : index
    %c0_32 = arith.constant 0 : index
    %c0_33 = arith.constant 0 : index
    %84 = vector.load %arg9[%c0_31, %c0_32, %c0_33] : memref<4x64x1xf32, #tpu.memory_space<vmem>>, vector<1x64x1xf32>
    %85 = vector.shape_cast %84 : vector<1x64x1xf32> to vector<64x1xf32>
    %86 = vector.broadcast %85 : vector<64x1xf32> to vector<64x256xf32>
    %87 = arith.addf %83, %86 : vector<64x256xf32>
    %88 = vector.extract_strided_slice %87 {offsets = [0, 0], sizes = [32, 256], strides = [1, 1]} : vector<64x256xf32> to vector<32x256xf32>
    %89 = vector.extract_strided_slice %87 {offsets = [32, 0], sizes = [32, 256], strides = [1, 1]} : vector<64x256xf32> to vector<32x256xf32>
    %c0_34 = arith.constant 0 : index
    %c1 = arith.constant 1 : index
    %c0_35 = arith.constant 0 : index
    %c0_36 = arith.constant 0 : index
    %90 = vector.load %arg2[%c0_34, %c1, %c0_35, %c0_36] : memref<1x4x32x128xbf16, #tpu.memory_space<vmem>>, vector<1x1x32x128xbf16>
    %91 = vector.shape_cast %90 : vector<1x1x32x128xbf16> to vector<32x128xbf16>
    %cst_37 = arith.constant dense<0.000000e+00> : vector<32x256xf32>
    %92 = tpu.matmul %91, %41, %cst_37 {dimension_numbers = #tpu.dot_dimension_numbers<[1], [0], [0], [1], [0, 0, 1, 1], [], []>} : vector<32x128xbf16>, vector<128x256xbf16>, vector<32x256xf32> -> vector<32x256xf32>
    %93 = arith.addf %88, %92 : vector<32x256xf32>
    %94 = arith.truncf %93 : vector<32x256xf32> to vector<32x256xbf16>
    %95 = vector.extract_strided_slice %94 {offsets = [0, 254], sizes = [32, 2], strides = [1, 1]} : vector<32x256xbf16> to vector<32x2xbf16>
    %96 = vector.extract_strided_slice %94 {offsets = [0, 0], sizes = [32, 254], strides = [1, 1]} : vector<32x256xbf16> to vector<32x254xbf16>
    %97 = tpu.concatenate %95, %96 in 1 : vector<32x2xbf16>, vector<32x254xbf16> -> vector<32x256xbf16>
    %c0_i32_38 = arith.constant 0 : i32
    %98 = arith.sitofp %c0_i32_38 : i32 to bf16
    %99 = vector.shape_cast %32 : vector<1x256xi1> to vector<1x256xi1>
    %100 = vector.broadcast %99 : vector<1x256xi1> to vector<32x256xi1>
    %101 = vector.broadcast %98 : bf16 to vector<32x256xbf16>
    %102 = arith.select %100, %97, %101 : vector<32x256xi1>, vector<32x256xbf16>
    %103 = vector.extract_strided_slice %94 {offsets = [0, 2], sizes = [32, 254], strides = [1, 1]} : vector<32x256xbf16> to vector<32x254xbf16>
    %104 = vector.extract_strided_slice %94 {offsets = [0, 0], sizes = [32, 2], strides = [1, 1]} : vector<32x256xbf16> to vector<32x2xbf16>
    %105 = tpu.concatenate %103, %104 in 1 : vector<32x254xbf16>, vector<32x2xbf16> -> vector<32x256xbf16>
    %c0_i32_39 = arith.constant 0 : i32
    %106 = arith.sitofp %c0_i32_39 : i32 to bf16
    %107 = vector.shape_cast %38 : vector<1x256xi1> to vector<1x256xi1>
    %108 = vector.broadcast %107 : vector<1x256xi1> to vector<32x256xi1>
    %109 = vector.broadcast %106 : bf16 to vector<32x256xbf16>
    %110 = arith.select %108, %105, %109 : vector<32x256xi1>, vector<32x256xbf16>
    %111 = tpu.concatenate %102, %94, %110 in 0 : vector<32x256xbf16>, vector<32x256xbf16>, vector<32x256xbf16> -> vector<96x256xbf16>
    %c1_40 = arith.constant 1 : index
    %c0_41 = arith.constant 0 : index
    %c0_42 = arith.constant 0 : index
    %112 = vector.load %arg6[%c1_40, %c0_41, %c0_42] : memref<4x64x96xbf16, #tpu.memory_space<vmem>>, vector<1x64x96xbf16>
    %113 = vector.shape_cast %112 : vector<1x64x96xbf16> to vector<64x96xbf16>
    %cst_43 = arith.constant dense<0.000000e+00> : vector<64x256xf32>
    %114 = tpu.matmul %113, %111, %cst_43 {dimension_numbers = #tpu.dot_dimension_numbers<[1], [0], [0], [1], [0, 0, 1, 1], [], []>} : vector<64x96xbf16>, vector<96x256xbf16>, vector<64x256xf32> -> vector<64x256xf32>
    %c1_44 = arith.constant 1 : index
    %c0_45 = arith.constant 0 : index
    %c0_46 = arith.constant 0 : index
    %115 = vector.load %arg7[%c1_44, %c0_45, %c0_46] : memref<4x64x1xf32, #tpu.memory_space<vmem>>, vector<1x64x1xf32>
    %116 = vector.shape_cast %115 : vector<1x64x1xf32> to vector<64x1xf32>
    %117 = vector.broadcast %116 : vector<64x1xf32> to vector<64x256xf32>
    %118 = arith.addf %114, %117 : vector<64x256xf32>
    %119 = vector.extract_strided_slice %118 {offsets = [0, 0], sizes = [32, 256], strides = [1, 1]} : vector<64x256xf32> to vector<32x256xf32>
    %120 = math.tanh %119 : vector<32x256xf32>
    %121 = vector.extract_strided_slice %118 {offsets = [32, 0], sizes = [32, 256], strides = [1, 1]} : vector<64x256xf32> to vector<32x256xf32>
    %122 = arith.negf %121 : vector<32x256xf32>
    %123 = math.exp %122 : vector<32x256xf32>
    %cst_47 = arith.constant 1.000000e+00 : f32
    %124 = vector.broadcast %cst_47 : f32 to vector<32x256xf32>
    %125 = arith.addf %124, %123 : vector<32x256xf32>
    %126 = arith.divf %124, %125 : vector<32x256xf32>
    %127 = arith.mulf %120, %126 : vector<32x256xf32>
    %128 = arith.truncf %127 : vector<32x256xf32> to vector<32x256xbf16>
    %c1_48 = arith.constant 1 : index
    %c0_49 = arith.constant 0 : index
    %c0_50 = arith.constant 0 : index
    %129 = vector.load %arg8[%c1_48, %c0_49, %c0_50] : memref<4x64x32xbf16, #tpu.memory_space<vmem>>, vector<1x64x32xbf16>
    %130 = vector.shape_cast %129 : vector<1x64x32xbf16> to vector<64x32xbf16>
    %cst_51 = arith.constant dense<0.000000e+00> : vector<64x256xf32>
    %131 = tpu.matmul %130, %128, %cst_51 {dimension_numbers = #tpu.dot_dimension_numbers<[1], [0], [0], [1], [0, 0, 1, 1], [], []>} : vector<64x32xbf16>, vector<32x256xbf16>, vector<64x256xf32> -> vector<64x256xf32>
    %c1_52 = arith.constant 1 : index
    %c0_53 = arith.constant 0 : index
    %c0_54 = arith.constant 0 : index
    %132 = vector.load %arg9[%c1_52, %c0_53, %c0_54] : memref<4x64x1xf32, #tpu.memory_space<vmem>>, vector<1x64x1xf32>
    %133 = vector.shape_cast %132 : vector<1x64x1xf32> to vector<64x1xf32>
    %134 = vector.broadcast %133 : vector<64x1xf32> to vector<64x256xf32>
    %135 = arith.addf %131, %134 : vector<64x256xf32>
    %136 = vector.extract_strided_slice %135 {offsets = [0, 0], sizes = [32, 256], strides = [1, 1]} : vector<64x256xf32> to vector<32x256xf32>
    %137 = vector.extract_strided_slice %135 {offsets = [32, 0], sizes = [32, 256], strides = [1, 1]} : vector<64x256xf32> to vector<32x256xf32>
    %138 = arith.addf %89, %137 : vector<32x256xf32>
    %c0_55 = arith.constant 0 : index
    %c2 = arith.constant 2 : index
    %c0_56 = arith.constant 0 : index
    %c0_57 = arith.constant 0 : index
    %139 = vector.load %arg2[%c0_55, %c2, %c0_56, %c0_57] : memref<1x4x32x128xbf16, #tpu.memory_space<vmem>>, vector<1x1x32x128xbf16>
    %140 = vector.shape_cast %139 : vector<1x1x32x128xbf16> to vector<32x128xbf16>
    %cst_58 = arith.constant dense<0.000000e+00> : vector<32x256xf32>
    %141 = tpu.matmul %140, %41, %cst_58 {dimension_numbers = #tpu.dot_dimension_numbers<[1], [0], [0], [1], [0, 0, 1, 1], [], []>} : vector<32x128xbf16>, vector<128x256xbf16>, vector<32x256xf32> -> vector<32x256xf32>
    %142 = arith.addf %136, %141 : vector<32x256xf32>
    %143 = arith.truncf %142 : vector<32x256xf32> to vector<32x256xbf16>
    %144 = vector.extract_strided_slice %143 {offsets = [0, 252], sizes = [32, 4], strides = [1, 1]} : vector<32x256xbf16> to vector<32x4xbf16>
    %145 = vector.extract_strided_slice %143 {offsets = [0, 0], sizes = [32, 252], strides = [1, 1]} : vector<32x256xbf16> to vector<32x252xbf16>
    %146 = tpu.concatenate %144, %145 in 1 : vector<32x4xbf16>, vector<32x252xbf16> -> vector<32x256xbf16>
    %c0_i32_59 = arith.constant 0 : i32
    %147 = arith.sitofp %c0_i32_59 : i32 to bf16
    %148 = vector.shape_cast %30 : vector<1x256xi1> to vector<1x256xi1>
    %149 = vector.broadcast %148 : vector<1x256xi1> to vector<32x256xi1>
    %150 = vector.broadcast %147 : bf16 to vector<32x256xbf16>
    %151 = arith.select %149, %146, %150 : vector<32x256xi1>, vector<32x256xbf16>
    %152 = vector.extract_strided_slice %143 {offsets = [0, 4], sizes = [32, 252], strides = [1, 1]} : vector<32x256xbf16> to vector<32x252xbf16>
    %153 = vector.extract_strided_slice %143 {offsets = [0, 0], sizes = [32, 4], strides = [1, 1]} : vector<32x256xbf16> to vector<32x4xbf16>
    %154 = tpu.concatenate %152, %153 in 1 : vector<32x252xbf16>, vector<32x4xbf16> -> vector<32x256xbf16>
    %c0_i32_60 = arith.constant 0 : i32
    %155 = arith.sitofp %c0_i32_60 : i32 to bf16
    %156 = vector.shape_cast %40 : vector<1x256xi1> to vector<1x256xi1>
    %157 = vector.broadcast %156 : vector<1x256xi1> to vector<32x256xi1>
    %158 = vector.broadcast %155 : bf16 to vector<32x256xbf16>
    %159 = arith.select %157, %154, %158 : vector<32x256xi1>, vector<32x256xbf16>
    %160 = tpu.concatenate %151, %143, %159 in 0 : vector<32x256xbf16>, vector<32x256xbf16>, vector<32x256xbf16> -> vector<96x256xbf16>
    %c2_61 = arith.constant 2 : index
    %c0_62 = arith.constant 0 : index
    %c0_63 = arith.constant 0 : index
    %161 = vector.load %arg6[%c2_61, %c0_62, %c0_63] : memref<4x64x96xbf16, #tpu.memory_space<vmem>>, vector<1x64x96xbf16>
    %162 = vector.shape_cast %161 : vector<1x64x96xbf16> to vector<64x96xbf16>
    %cst_64 = arith.constant dense<0.000000e+00> : vector<64x256xf32>
    %163 = tpu.matmul %162, %160, %cst_64 {dimension_numbers = #tpu.dot_dimension_numbers<[1], [0], [0], [1], [0, 0, 1, 1], [], []>} : vector<64x96xbf16>, vector<96x256xbf16>, vector<64x256xf32> -> vector<64x256xf32>
    %c2_65 = arith.constant 2 : index
    %c0_66 = arith.constant 0 : index
    %c0_67 = arith.constant 0 : index
    %164 = vector.load %arg7[%c2_65, %c0_66, %c0_67] : memref<4x64x1xf32, #tpu.memory_space<vmem>>, vector<1x64x1xf32>
    %165 = vector.shape_cast %164 : vector<1x64x1xf32> to vector<64x1xf32>
    %166 = vector.broadcast %165 : vector<64x1xf32> to vector<64x256xf32>
    %167 = arith.addf %163, %166 : vector<64x256xf32>
    %168 = vector.extract_strided_slice %167 {offsets = [0, 0], sizes = [32, 256], strides = [1, 1]} : vector<64x256xf32> to vector<32x256xf32>
    %169 = math.tanh %168 : vector<32x256xf32>
    %170 = vector.extract_strided_slice %167 {offsets = [32, 0], sizes = [32, 256], strides = [1, 1]} : vector<64x256xf32> to vector<32x256xf32>
    %171 = arith.negf %170 : vector<32x256xf32>
    %172 = math.exp %171 : vector<32x256xf32>
    %cst_68 = arith.constant 1.000000e+00 : f32
    %173 = vector.broadcast %cst_68 : f32 to vector<32x256xf32>
    %174 = arith.addf %173, %172 : vector<32x256xf32>
    %175 = arith.divf %173, %174 : vector<32x256xf32>
    %176 = arith.mulf %169, %175 : vector<32x256xf32>
    %177 = arith.truncf %176 : vector<32x256xf32> to vector<32x256xbf16>
    %c2_69 = arith.constant 2 : index
    %c0_70 = arith.constant 0 : index
    %c0_71 = arith.constant 0 : index
    %178 = vector.load %arg8[%c2_69, %c0_70, %c0_71] : memref<4x64x32xbf16, #tpu.memory_space<vmem>>, vector<1x64x32xbf16>
    %179 = vector.shape_cast %178 : vector<1x64x32xbf16> to vector<64x32xbf16>
    %cst_72 = arith.constant dense<0.000000e+00> : vector<64x256xf32>
    %180 = tpu.matmul %179, %177, %cst_72 {dimension_numbers = #tpu.dot_dimension_numbers<[1], [0], [0], [1], [0, 0, 1, 1], [], []>} : vector<64x32xbf16>, vector<32x256xbf16>, vector<64x256xf32> -> vector<64x256xf32>
    %c2_73 = arith.constant 2 : index
    %c0_74 = arith.constant 0 : index
    %c0_75 = arith.constant 0 : index
    %181 = vector.load %arg9[%c2_73, %c0_74, %c0_75] : memref<4x64x1xf32, #tpu.memory_space<vmem>>, vector<1x64x1xf32>
    %182 = vector.shape_cast %181 : vector<1x64x1xf32> to vector<64x1xf32>
    %183 = vector.broadcast %182 : vector<64x1xf32> to vector<64x256xf32>
    %184 = arith.addf %180, %183 : vector<64x256xf32>
    %185 = vector.extract_strided_slice %184 {offsets = [0, 0], sizes = [32, 256], strides = [1, 1]} : vector<64x256xf32> to vector<32x256xf32>
    %186 = vector.extract_strided_slice %184 {offsets = [32, 0], sizes = [32, 256], strides = [1, 1]} : vector<64x256xf32> to vector<32x256xf32>
    %187 = arith.addf %138, %186 : vector<32x256xf32>
    %c0_76 = arith.constant 0 : index
    %c3 = arith.constant 3 : index
    %c0_77 = arith.constant 0 : index
    %c0_78 = arith.constant 0 : index
    %188 = vector.load %arg2[%c0_76, %c3, %c0_77, %c0_78] : memref<1x4x32x128xbf16, #tpu.memory_space<vmem>>, vector<1x1x32x128xbf16>
    %189 = vector.shape_cast %188 : vector<1x1x32x128xbf16> to vector<32x128xbf16>
    %cst_79 = arith.constant dense<0.000000e+00> : vector<32x256xf32>
    %190 = tpu.matmul %189, %41, %cst_79 {dimension_numbers = #tpu.dot_dimension_numbers<[1], [0], [0], [1], [0, 0, 1, 1], [], []>} : vector<32x128xbf16>, vector<128x256xbf16>, vector<32x256xf32> -> vector<32x256xf32>
    %191 = arith.addf %185, %190 : vector<32x256xf32>
    %192 = arith.truncf %191 : vector<32x256xf32> to vector<32x256xbf16>
    %193 = vector.extract_strided_slice %192 {offsets = [0, 255], sizes = [32, 1], strides = [1, 1]} : vector<32x256xbf16> to vector<32x1xbf16>
    %194 = vector.extract_strided_slice %192 {offsets = [0, 0], sizes = [32, 255], strides = [1, 1]} : vector<32x256xbf16> to vector<32x255xbf16>
    %195 = tpu.concatenate %193, %194 in 1 : vector<32x1xbf16>, vector<32x255xbf16> -> vector<32x256xbf16>
    %c0_i32_80 = arith.constant 0 : i32
    %196 = arith.sitofp %c0_i32_80 : i32 to bf16
    %197 = vector.shape_cast %34 : vector<1x256xi1> to vector<1x256xi1>
    %198 = vector.broadcast %197 : vector<1x256xi1> to vector<32x256xi1>
    %199 = vector.broadcast %196 : bf16 to vector<32x256xbf16>
    %200 = arith.select %198, %195, %199 : vector<32x256xi1>, vector<32x256xbf16>
    %201 = vector.extract_strided_slice %192 {offsets = [0, 1], sizes = [32, 255], strides = [1, 1]} : vector<32x256xbf16> to vector<32x255xbf16>
    %202 = vector.extract_strided_slice %192 {offsets = [0, 0], sizes = [32, 1], strides = [1, 1]} : vector<32x256xbf16> to vector<32x1xbf16>
    %203 = tpu.concatenate %201, %202 in 1 : vector<32x255xbf16>, vector<32x1xbf16> -> vector<32x256xbf16>
    %c0_i32_81 = arith.constant 0 : i32
    %204 = arith.sitofp %c0_i32_81 : i32 to bf16
    %205 = vector.shape_cast %36 : vector<1x256xi1> to vector<1x256xi1>
    %206 = vector.broadcast %205 : vector<1x256xi1> to vector<32x256xi1>
    %207 = vector.broadcast %204 : bf16 to vector<32x256xbf16>
    %208 = arith.select %206, %203, %207 : vector<32x256xi1>, vector<32x256xbf16>
    %209 = tpu.concatenate %200, %192, %208 in 0 : vector<32x256xbf16>, vector<32x256xbf16>, vector<32x256xbf16> -> vector<96x256xbf16>
    %c3_82 = arith.constant 3 : index
    %c0_83 = arith.constant 0 : index
    %c0_84 = arith.constant 0 : index
    %210 = vector.load %arg6[%c3_82, %c0_83, %c0_84] : memref<4x64x96xbf16, #tpu.memory_space<vmem>>, vector<1x64x96xbf16>
    %211 = vector.shape_cast %210 : vector<1x64x96xbf16> to vector<64x96xbf16>
    %cst_85 = arith.constant dense<0.000000e+00> : vector<64x256xf32>
    %212 = tpu.matmul %211, %209, %cst_85 {dimension_numbers = #tpu.dot_dimension_numbers<[1], [0], [0], [1], [0, 0, 1, 1], [], []>} : vector<64x96xbf16>, vector<96x256xbf16>, vector<64x256xf32> -> vector<64x256xf32>
    %c3_86 = arith.constant 3 : index
    %c0_87 = arith.constant 0 : index
    %c0_88 = arith.constant 0 : index
    %213 = vector.load %arg7[%c3_86, %c0_87, %c0_88] : memref<4x64x1xf32, #tpu.memory_space<vmem>>, vector<1x64x1xf32>
    %214 = vector.shape_cast %213 : vector<1x64x1xf32> to vector<64x1xf32>
    %215 = vector.broadcast %214 : vector<64x1xf32> to vector<64x256xf32>
    %216 = arith.addf %212, %215 : vector<64x256xf32>
    %217 = vector.extract_strided_slice %216 {offsets = [0, 0], sizes = [32, 256], strides = [1, 1]} : vector<64x256xf32> to vector<32x256xf32>
    %218 = math.tanh %217 : vector<32x256xf32>
    %219 = vector.extract_strided_slice %216 {offsets = [32, 0], sizes = [32, 256], strides = [1, 1]} : vector<64x256xf32> to vector<32x256xf32>
    %220 = arith.negf %219 : vector<32x256xf32>
    %221 = math.exp %220 : vector<32x256xf32>
    %cst_89 = arith.constant 1.000000e+00 : f32
    %222 = vector.broadcast %cst_89 : f32 to vector<32x256xf32>
    %223 = arith.addf %222, %221 : vector<32x256xf32>
    %224 = arith.divf %222, %223 : vector<32x256xf32>
    %225 = arith.mulf %218, %224 : vector<32x256xf32>
    %226 = arith.truncf %225 : vector<32x256xf32> to vector<32x256xbf16>
    %c3_90 = arith.constant 3 : index
    %c0_91 = arith.constant 0 : index
    %c0_92 = arith.constant 0 : index
    %227 = vector.load %arg8[%c3_90, %c0_91, %c0_92] : memref<4x64x32xbf16, #tpu.memory_space<vmem>>, vector<1x64x32xbf16>
    %228 = vector.shape_cast %227 : vector<1x64x32xbf16> to vector<64x32xbf16>
    %cst_93 = arith.constant dense<0.000000e+00> : vector<64x256xf32>
    %229 = tpu.matmul %228, %226, %cst_93 {dimension_numbers = #tpu.dot_dimension_numbers<[1], [0], [0], [1], [0, 0, 1, 1], [], []>} : vector<64x32xbf16>, vector<32x256xbf16>, vector<64x256xf32> -> vector<64x256xf32>
    %c3_94 = arith.constant 3 : index
    %c0_95 = arith.constant 0 : index
    %c0_96 = arith.constant 0 : index
    %230 = vector.load %arg9[%c3_94, %c0_95, %c0_96] : memref<4x64x1xf32, #tpu.memory_space<vmem>>, vector<1x64x1xf32>
    %231 = vector.shape_cast %230 : vector<1x64x1xf32> to vector<64x1xf32>
    %232 = vector.broadcast %231 : vector<64x1xf32> to vector<64x256xf32>
    %233 = arith.addf %229, %232 : vector<64x256xf32>
    %234 = vector.extract_strided_slice %233 {offsets = [32, 0], sizes = [32, 256], strides = [1, 1]} : vector<64x256xf32> to vector<32x256xf32>
    %235 = arith.addf %187, %234 : vector<32x256xf32>
    %c0_97 = arith.constant 0 : index
    %c0_98 = arith.constant 0 : index
    %236 = vector.load %arg10[%c0_97, %c0_98] : memref<32x32xbf16, #tpu.memory_space<vmem>>, vector<32x32xbf16>
    %237 = arith.truncf %235 : vector<32x256xf32> to vector<32x256xbf16>
    %cst_99 = arith.constant dense<0.000000e+00> : vector<32x256xf32>
    %238 = tpu.matmul %236, %237, %cst_99 {dimension_numbers = #tpu.dot_dimension_numbers<[1], [0], [0], [1], [0, 0, 1, 1], [], []>} : vector<32x32xbf16>, vector<32x256xbf16>, vector<32x256xf32> -> vector<32x256xf32>
    %c0_100 = arith.constant 0 : index
    %c0_101 = arith.constant 0 : index
    %239 = vector.load %arg11[%c0_100, %c0_101] : memref<32x1xf32, #tpu.memory_space<vmem>>, vector<32x1xf32>
    %240 = vector.broadcast %239 : vector<32x1xf32> to vector<32x256xf32>
    %241 = arith.addf %238, %240 : vector<32x256xf32>
    %242 = arith.negf %241 : vector<32x256xf32>
    %243 = math.exp %242 : vector<32x256xf32>
    %cst_102 = arith.constant 1.000000e+00 : f32
    %244 = vector.broadcast %cst_102 : f32 to vector<32x256xf32>
    %245 = arith.addf %244, %243 : vector<32x256xf32>
    %246 = arith.divf %244, %245 : vector<32x256xf32>
    %247 = arith.mulf %241, %246 : vector<32x256xf32>
    %c0_103 = arith.constant 0 : index
    %c0_104 = arith.constant 0 : index
    %248 = vector.load %arg12[%c0_103, %c0_104] : memref<8x32xbf16, #tpu.memory_space<vmem>>, vector<8x32xbf16>
    %249 = arith.truncf %247 : vector<32x256xf32> to vector<32x256xbf16>
    %cst_105 = arith.constant dense<0.000000e+00> : vector<8x256xf32>
    %250 = tpu.matmul %248, %249, %cst_105 {dimension_numbers = #tpu.dot_dimension_numbers<[1], [0], [0], [1], [0, 0, 1, 1], [], []>} : vector<8x32xbf16>, vector<32x256xbf16>, vector<8x256xf32> -> vector<8x256xf32>
    %c0_106 = arith.constant 0 : index
    %c0_107 = arith.constant 0 : index
    %251 = vector.load %arg13[%c0_106, %c0_107] : memref<8x1xf32, #tpu.memory_space<vmem>>, vector<8x1xf32>
    %252 = vector.broadcast %251 : vector<8x1xf32> to vector<8x256xf32>
    %253 = arith.addf %250, %252 : vector<8x256xf32>
    %c0_108 = arith.constant 0 : index
    %c0_109 = arith.constant 0 : index
    %254 = vector.load %arg14[%c0_108, %c0_109] : memref<8x256xf32, #tpu.memory_space<vmem>>, vector<8x256xf32>
    tpu.vector_store %arg14[%c0_108, %c0_109], %253 {strides = array<i32>} : memref<8x256xf32, #tpu.memory_space<vmem>>, vector<8x256xf32>,
    return
  }
  func.func @transform_0(%arg0: i32) -> (i32, i32) {
    %c0_i32 = arith.constant 0 : i32
    %c0_i32_0 = arith.constant 0 : i32
    return %c0_i32, %arg0 : i32, i32
  }
  func.func @transform_1(%arg0: i32) -> (i32, i32, i32, i32) {
    %c0_i32 = arith.constant 0 : i32
    %c0_i32_0 = arith.constant 0 : i32
    %c0_i32_1 = arith.constant 0 : i32
    %c0_i32_2 = arith.constant 0 : i32
    return %arg0, %c0_i32, %c0_i32_0, %c0_i32_1 : i32, i32, i32, i32
  }
  func.func @transform_2(%arg0: i32) -> (i32, i32) {
    %c0_i32 = arith.constant 0 : i32
    %c0_i32_0 = arith.constant 0 : i32
    %c0_i32_1 = arith.constant 0 : i32
    return %c0_i32, %c0_i32_0 : i32, i32
  }
  func.func @transform_3(%arg0: i32) -> (i32, i32) {
    %c0_i32 = arith.constant 0 : i32
    %c0_i32_0 = arith.constant 0 : i32
    %c0_i32_1 = arith.constant 0 : i32
    return %c0_i32, %c0_i32_0 : i32, i32
  }
  func.func @transform_4(%arg0: i32) -> (i32, i32) {
    %c0_i32 = arith.constant 0 : i32
    %c0_i32_0 = arith.constant 0 : i32
    %c0_i32_1 = arith.constant 0 : i32
    return %c0_i32, %c0_i32_0 : i32, i32
  }
  func.func @transform_5(%arg0: i32) -> (i32, i32, i32) {
    %c0_i32 = arith.constant 0 : i32
    %c0_i32_0 = arith.constant 0 : i32
    %c0_i32_1 = arith.constant 0 : i32
    %c0_i32_2 = arith.constant 0 : i32
    return %c0_i32, %c0_i32_0, %c0_i32_1 : i32, i32, i32
  }
  func.func @transform_6(%arg0: i32) -> (i32, i32, i32) {
    %c0_i32 = arith.constant 0 : i32
    %c0_i32_0 = arith.constant 0 : i32
    %c0_i32_1 = arith.constant 0 : i32
    %c0_i32_2 = arith.constant 0 : i32
    return %c0_i32, %c0_i32_0, %c0_i32_1 : i32, i32, i32
  }
  func.func @transform_7(%arg0: i32) -> (i32, i32, i32) {
    %c0_i32 = arith.constant 0 : i32
    %c0_i32_0 = arith.constant 0 : i32
    %c0_i32_1 = arith.constant 0 : i32
    %c0_i32_2 = arith.constant 0 : i32
    return %c0_i32, %c0_i32_0, %c0_i32_1 : i32, i32, i32
  }
  func.func @transform_8(%arg0: i32) -> (i32, i32, i32) {
    %c0_i32 = arith.constant 0 : i32
    %c0_i32_0 = arith.constant 0 : i32
    %c0_i32_1 = arith.constant 0 : i32
    %c0_i32_2 = arith.constant 0 : i32
    return %c0_i32, %c0_i32_0, %c0_i32_1 : i32, i32, i32
  }
  func.func @transform_9(%arg0: i32) -> (i32, i32) {
    %c0_i32 = arith.constant 0 : i32
    %c0_i32_0 = arith.constant 0 : i32
    %c0_i32_1 = arith.constant 0 : i32
    return %c0_i32, %c0_i32_0 : i32, i32
  }
  func.func @transform_10(%arg0: i32) -> (i32, i32) {
    %c0_i32 = arith.constant 0 : i32
    %c0_i32_0 = arith.constant 0 : i32
    %c0_i32_1 = arith.constant 0 : i32
    return %c0_i32, %c0_i32_0 : i32, i32
  }
  func.func @transform_11(%arg0: i32) -> (i32, i32) {
    %c0_i32 = arith.constant 0 : i32
    %c0_i32_0 = arith.constant 0 : i32
    %c0_i32_1 = arith.constant 0 : i32
    return %c0_i32, %c0_i32_0 : i32, i32
  }
  func.func @transform_12(%arg0: i32) -> (i32, i32) {
    %c0_i32 = arith.constant 0 : i32
    %c0_i32_0 = arith.constant 0 : i32
    %c0_i32_1 = arith.constant 0 : i32
    return %c0_i32, %c0_i32_0 : i32, i32
  }
  func.func @transform_13(%arg0: i32) -> (i32, i32) {
    %c0_i32 = arith.constant 0 : i32
    %c0_i32_0 = arith.constant 0 : i32
    return %c0_i32, %arg0 : i32, i32
  }
}

</mosaic_0001>

<bundles_post_ra>
// kernel: tpu_custom_call.1
= control target key start
LH: loop header
LB: loop body
LE: loop exit
PB: predicated region body
PF: predicated region fallthrough
CT: control target
= control target key end

     0   :  { %vm99_vm0 = vcmask 1043456   ;;  %v4543_v4 = vmov 0   ;;  %vm92_vm1 = vcmask 64512   ;;  %s4529_s0 = inlined_call_operand.vmem [shape: bf16[8,256], index: 0, kind: input, shape index: {}]   ;;  %s4530_s1 = inlined_call_operand.vmem [shape: bf16[1,4,32,128], index: 1, kind: input, shape index: {}]   ;;  %s4531_s2 = inlined_call_operand.vmem [shape: bf16[128,256], index: 2, kind: input, shape index: {}]   ;;  %s4532_s3 = inlined_call_operand.vmem [shape: bf16[32,8], index: 3, kind: input, shape index: {}]   ;;  %s4533_s4 = inlined_call_operand.vmem [shape: f32[32,1], index: 4, kind: input, shape index: {}]   ;;  %s4534_s5 = inlined_call_operand.vmem [shape: bf16[4,64,96], index: 5, kind: input, shape index: {}]   ;;  %s4535_s6 = inlined_call_operand.vmem [shape: f32[4,64,1], index: 6, kind: input, shape index: {}]   ;;  %s4536_s7 = inlined_call_operand.vmem [shape: bf16[4,64,32], index: 7, kind: input, shape index: {}]   ;;  %s4537_s8 = inlined_call_operand.vmem [shape: f32[4,64,1], index: 8, kind: input, shape index: {}]   ;;  %s4538_s9 = inlined_call_operand.vmem [shape: bf16[32,32], index: 9, kind: input, shape index: {}]   ;;  %s4539_s10 = inlined_call_operand.vmem [shape: f32[32,1], index: 10, kind: input, shape index: {}]   ;;  %s4540_s11 = inlined_call_operand.vmem [shape: bf16[8,32], index: 11, kind: input, shape index: {}]   ;;  %s4541_s12 = inlined_call_operand.vmem [shape: f32[8,1], index: 12, kind: input, shape index: {}]   ;;  %s4542_s13 = inlined_call_operand.hbm [shape: f32[8,256], index: 13, kind: output, shape index: {}]  }
   0x1   :  { %v52_v0 = vld [vmem:[%s4529_s0] sm:$0xff]  ;;  %v3537_v3 = vld [vmem:[%s4531_s2 + $0x74] ss:$8 sps:$4 sm:$0xff]   ;;  %138 = vmatprep.mubr.bf16.mxu0 %v4543_v4  ;;  %v3543_v5 = vld [vmem:[%s4531_s2 + $0x70] ss:$8 sps:$4 sm:$0xff]   ;;  %398 = vmatprep.mubr.bf16.mxu1 %v4543_v4 }
   0x2   :  { %v2810_v1 = vcombine.high %v52_v0, %v52_v0  ;;  %v2809_v2 = vcombine.low %v52_v0, %v52_v0  ;;  %3088 = vset.pattern.permute.xlu1 %v4543_v4  ;;  %3087 = vset.pattern.permute.xlu0 %v4543_v4  ;;  %v3094_v7 = vld [vmem:[%s4532_s3] sm:$0xff]   ;;  %v3567_v10 = vld [vmem:[%s4531_s2 + $0x54] ss:$8 sps:$4 sm:$0xff]   ;;  %v3575_v11 = vld [vmem:[%s4531_s2 + $0x50] ss:$8 sps:$4 sm:$0xff]  }
   0x3   :  { %366 = vmatprep.subr.bf16.mxu1 %v3537_v3  ;;  %v3555_v8 = vld [vmem:[%s4531_s2 + $0x64] ss:$8 sps:$4 sm:$0xff]   ;;  %v3561_v9 = vld [vmem:[%s4531_s2 + $0x60] ss:$8 sps:$4 sm:$0xff]   ;;  %v3596_v15 = vld [vmem:[%s4531_s2 + $0x34] ss:$8 sps:$4 sm:$0xff]  }
   0x4   :  { %2811 = vmatprep.subr.msk.bf16.mxu0 %vm99_vm0, %v2810_v1  ;;  %v101_v6 = vsel %vm99_vm0, %v2809_v2, 0  ;;  %367 = vmatpush1.bf16.msra.mxu1 %v3543_v5  ;;  %v3581_v12 = vld [vmem:[%s4531_s2 + $0x44] ss:$8 sps:$4 sm:$0xff]   ;;  %v3590_v14 = vld [vmem:[%s4531_s2 + $0x40] ss:$8 sps:$4 sm:$0xff]   ;;  %v55_v20 = vld [vmem:[%s4533_s4 + $0x10] sm:$0xff] }
   0x5   :  { %121 = vmatpush1.bf16.msra.mxu0 %v101_v6  ;;  %368 = vmatprep.subr.bf16.mxu1 %v3555_v8  ;;  %v3101_v13 = vld [vmem:[%s4532_s3 + $0x8] sm:$0xff]   ;;  %v3601_v16 = vld [vmem:[%s4531_s2 + $0x30] ss:$8 sps:$4 sm:$0xff]   ;;  %v53_v18 = vld [vmem:[%s4533_s4] sm:$0xff] }
   0x6   :  { %v3607_v17 = vld [vmem:[%s4531_s2 + $0x24] ss:$8 sps:$4 sm:$0xff]   ;;  %59 = vperm.xlu1 %3088, %v53_v18   ;;  %v56_v21 = vld [vmem:[%s4533_s4 + $0x18] sm:$0xff]  ;;  %69 = vperm.xlu0 %3087, %v55_v20   ;;  %v3626_v22 = vld [vmem:[%s4531_s2 + $0x20] ss:$8 sps:$4 sm:$0xff]  }
   0x7   :  { %v54_v19 = vld [vmem:[%s4533_s4 + $0x8] sm:$0xff]  ;;  %v3632_v23 = vld [vmem:[%s4531_s2 + $0x14] ss:$8 sps:$4 sm:$0xff]   ;;  %v3639_v24 = vld [vmem:[%s4531_s2 + $0x10] ss:$8 sps:$4 sm:$0xff]  }
   0x8   :  { %2812 = vmatmul.mubr.msk.bf16.vlgmr.msra.gmra.mxu0 %vm92_vm1, %v3094_v7  ;;  %369 = vmatpush1.bf16.msra.mxu1 %v3561_v9  ;;  %v3644_v25 = vld [vmem:[%s4531_s2 + $0x4] ss:$8 sps:$4 sm:$0xff]   ;;  %v3651_v26 = vld [vmem:[%s4531_s2] ss:$8 sps:$4 sm:$0xff]  }
   0x9   :  { %148 = vmatprep.mubr.bf16.mxu0 %v4543_v4  ;;  %370 = vmatprep.subr.bf16.mxu1 %v3567_v10  ;;  %v3117_v27 = vld [vmem:[%s4530_s1] sm:$0xff]   ;;  %v3118_v28 = vld [vmem:[%s4530_s1 + $0x8] sm:$0xff]  }
   0xa   :  { %64 = vperm.xlu1 %3088, %v54_v19   ;;  %74 = vperm.xlu0 %3087, %v56_v21  }
   0xc   :  { %371 = vmatpush1.bf16.msra.mxu1 %v3575_v11 }
   0xd   :  { %372 = vmatprep.subr.bf16.mxu1 %v3581_v12 }
  0x10   :  { %2813 = vmatmul.mubr.msk.bf16.gmra.mxu0 %vm92_vm1, %v3101_v13  ;;  %373 = vmatpush1.bf16.msra.mxu1 %v3590_v14 }
  0x11   :  { %374 = vmatprep.subr.bf16.mxu1 %v3596_v15  ;;  %640 = vmatprep.mubr.bf16.mxu0 %v4543_v4 }
  0x14   :  { %375 = vmatpush1.bf16.msra.mxu1 %v3601_v16 }
  0x15   :  { %376 = vmatprep.subr.bf16.mxu1 %v3607_v17 }
  0x18   :  { %377 = vmatpush1.bf16.msra.mxu1 %v3626_v22 }
  0x19   :  { %378 = vmatprep.subr.bf16.mxu1 %v3632_v23 }
  0x1c   :  { %379 = vmatpush1.bf16.msra.mxu1 %v3639_v24 }
  0x1d   :  { %380 = vmatprep.subr.bf16.mxu1 %v3644_v25 }
  0x20   :  { %381 = vmatpush1.bf16.msra.mxu1 %v3651_v26 }
  0x23   :  { %399 = vmatmul.mubr.bf16.vlgmr.msra.gmra.mxu1 %v3117_v27 }
  0x24   :  { %408 = vmatprep.mubr.bf16.mxu1 %v4543_v4 }
  0x2b   :  { %409 = vmatmul.mubr.bf16.gmra.mxu1 %v3118_v28 }
  0x2c   :  { %18 = vsyncpa [#allocation3], 0  ;;  %870 = vmatprep.mubr.bf16.mxu1 %v4543_v4  ;;  %s3454_s18 = smov 127   ;;  %s3455_s19 = smov 1   ;;  %vm485_vm5 = vcmask 1039360   ;;  %vm443_vm11 = vcmask 7168  }
  0x2d   :  { %vm595_vm14 = vcmask 785408   ;;  %vm825_vm15 = vcmask 261120   ;;  %s3456_s4 = smov 126   ;;  %s3457_s28 = smov 2  }
  0x2e   :  { %s3459_s3 = smov 4   ;;  %s3460_s26 = smov [#allocation2]  }
  0x2f   :  { %s2799_s27 = sshll.u32 %s3460_s26, 4  ;;  %s2800_s27 = int_to_ptr.vmem [resolvable:$true] %s2799_s27 }
  0x30   :  { %p3436_p1 = scmp.lt.s32.totalorder %s2800_s27, %s2800_s27 }
  0x81   :  { %v60_v29 = vpop.permute.xlu1 %59  ;;  %v70_v38 = vpop.permute.xlu0 %69 }
  0x85   :  { %v65_v33 = vpop.permute.xlu1 %64  ;;  %v75_v49 = vpop.permute.xlu0 %74 }
  0xc8   :  { %v140_v30 = vpop.f32.mrf.mxu0 }
  0xc9   :  { %v3664_v31 = vadd.f32 %v140_v30, %v60_v29 }
  0xca   :  { %v142_v32 = vpop.f32.mrf.mxu0 }
  0xcb   :  { %v2814_v34 = vmul.f32 -1.442695, %v3664_v31  ;;  %v3669_v37 = vadd.f32 %v142_v32, %v60_v29 }
  0xcc   :  { %v144_v35 = vpop.f32.mrf.mxu0 }
  0xcd   :  { %v3667_v36 = vadd.f32 %v144_v35, %v65_v33  ;;  %3159 = vpow2.f32 %v2814_v34  ;;  %v2815_v45 = vmul.f32 -1.442695, %v3669_v37 }
  0xce   :  { %v146_v39 = vpop.f32.mrf.mxu0 }
  0xcf   :  { %v2816_v40 = vmul.f32 -1.442695, %v3667_v36  ;;  %v3672_v41 = vadd.f32 %v146_v39, %v65_v33 }
  0xd0   :  { %v150_v42 = vpop.f32.mrf.mxu0 }
  0xd1   :  { %v2817_v43 = vmul.f32 -1.442695, %v3672_v41  ;;  %v151_v44 = vadd.f32 %v150_v42, %v70_v38  ;;  %3161 = vpow2.f32 %v2816_v40 }
  0xd2   :  { %v152_v46 = vpop.f32.mrf.mxu0 }
  0xd3   :  { %v2818_v47 = vmul.f32 -1.442695, %v151_v44  ;;  %v153_v48 = vadd.f32 %v152_v46, %v70_v38  ;;  %3163 = vpow2.f32 %v2817_v43 }
  0xd4   :  { %v154_v50 = vpop.f32.mrf.mxu0 }
  0xd5   :  { %3165 = vpow2.f32 %v2818_v47  ;;  %v2819_v51 = vmul.f32 -1.442695, %v153_v48  ;;  %v155_v52 = vadd.f32 %v154_v50, %v75_v49 }
  0xd6   :  { %3167 = vpow2.f32 %v2815_v45  ;;  %v156_v53 = vpop.f32.mrf.mxu0 }
  0xd7   :  { %3169 = vpow2.f32 %v2819_v51  ;;  %v2820_v54 = vmul.f32 -1.442695, %v155_v52  ;;  %v157_v55 = vadd.f32 %v156_v53, %v75_v49 }
  0xd9   :  { %3171 = vpow2.f32 %v2820_v54  ;;  %v2821_v56 = vmul.f32 -1.442695, %v157_v55 }
  0xda   :  { %v3160_v57 = vpop.eup %3159 }
  0xdb   :  { %3173 = vpow2.f32 %v2821_v56  ;;  %v183_v59 = vadd.f32 1.0, %v3160_v57 }
  0xdd   :  { %3175 = vrcp.f32 %v183_v59 }
  0xde   :  { %v3162_v58 = vpop.eup %3161 }
  0xdf   :  { %v185_v62 = vadd.f32 1.0, %v3162_v58 }
  0xe0   :  { %v3164_v60 = vpop.eup %3163 }
  0xe1   :  { %v186_v2 = vadd.f32 1.0, %v3164_v60 }
  0xe2   :  { %v3166_v61 = vpop.eup %3165 }
  0xe3   :  { %v3168_v63 = vpop.eup %3167  ;;  %v187_v0 = vadd.f32 1.0, %v3166_v61  ;;  %v400_v6 = vpop.f32.mrf.mxu1 }
  0xe4   :  { %v3170_v1 = vpop.eup %3169  ;;  %v184_v18 = vadd.f32 1.0, %v3168_v63 }
  0xe5   :  { %3177 = vrcp.f32 %v187_v0  ;;  %v188_v7 = vadd.f32 1.0, %v3170_v1  ;;  %v402_v19 = vpop.f32.mrf.mxu1  ;;  %v531_v0 = vld [vmem:[%s4535_s6 + $0x20] sm:$0xff]  ;;  %v532_v1 = vld [vmem:[%s4535_s6 + $0x28] sm:$0xff] }
  0xe6   :  { %v3172_v13 = vpop.eup %3171  ;;  %3179 = vrcp.f32 %v185_v62 }
  0xe7   :  { %3181 = vrcp.f32 %v188_v7  ;;  %v189_v20 = vadd.f32 1.0, %v3172_v13  ;;  %v404_v27 = vpop.f32.mrf.mxu1  ;;  %v527_v7 = vld [vmem:[%s4535_s6] sm:$0xff]  ;;  %v528_v13 = vld [vmem:[%s4535_s6 + $0x8] sm:$0xff] }
  0xe8   :  { %v3174_v21 = vpop.eup %3173  ;;  %3183 = vrcp.f32 %v186_v2  ;;  %v529_v2 = vld [vmem:[%s4535_s6 + $0x10] sm:$0xff] }
  0xe9   :  { %3185 = vrcp.f32 %v189_v20  ;;  %v190_v28 = vadd.f32 1.0, %v3174_v21  ;;  %v406_v29 = vpop.f32.mrf.mxu1  ;;  %v757_v20 = vld [vmem:[%s4537_s8] sm:$0xff]  ;;  %v758_v21 = vld [vmem:[%s4537_s8 + $0x8] sm:$0xff] }
  0xea   :  { %3187 = vrcp.f32 %v184_v18  ;;  %v3176_v32 = vpop.eup %3175  ;;  %v759_v18 = vld [vmem:[%s4537_s8 + $0x10] sm:$0xff] }
  0xeb   :  { %3189 = vrcp.f32 %v190_v28  ;;  %v410_v30 = vpop.f32.mrf.mxu1  ;;  %v207_v51 = vmul.f32 %v3176_v32, %v3664_v31 }
  0xed   :  { %v412_v34 = vpop.f32.mrf.mxu1  ;;  %v419_v63 = vadd.f32 %v400_v6, %v207_v51  ;;  %v530_v6 = vld [vmem:[%s4535_s6 + $0x18] sm:$0xff] }
  0xef   :  { %v414_v43 = vpop.f32.mrf.mxu1 }
  0xf1   :  { %v416_v59 = vpop.f32.mrf.mxu1 }
  0xf2   :  { %v3178_v33 = vpop.eup %3177 }
  0xf3   :  { %v3180_v35 = vpop.eup %3179  ;;  %v211_v40 = vmul.f32 %v3178_v33, %v151_v44 }
  0xf4   :  { %v3182_v38 = vpop.eup %3181  ;;  %v209_v46 = vmul.f32 %v3180_v35, %v3667_v36 }
  0xf5   :  { %v3184_v39 = vpop.eup %3183  ;;  %v212_v47 = vmul.f32 %v3182_v38, %v153_v48  ;;  %v423_v54 = vadd.f32 %v410_v30, %v211_v40 }
  0xf6   :  { %v3186_v42 = vpop.eup %3185  ;;  %v210_v53 = vmul.f32 %v3184_v39, %v3672_v41  ;;  %v421_v60 = vadd.f32 %v404_v27, %v209_v46  ;;  %v215_v27 = vlaneseq }
  0xf7   :  { %v3188_v45 = vpop.eup %3187  ;;  %v213_v49 = vmul.f32 %v3186_v42, %v155_v52  ;;  %v424_v44 = vadd.f32 %v412_v34, %v212_v47  ;;  %v533_v52 = vld [vmem:[%s4535_s6 + $0x30] sm:$0xff] }
  0xf8   :  { %v3190_v50 = vpop.eup %3189  ;;  %v208_v58 = vmul.f32 %v3188_v45, %v3669_v37  ;;  %v422_v36 = vadd.f32 %v406_v29, %v210_v53  ;;  %v3686_v41 = vpack.c.bf16 %v421_v60, %v419_v63  ;;  %v3740_v28 = vand.u32 127, %v215_v27  ;;  %v3152_v63 = vld [vmem:[%s4534_s5 + $0x78] sm:$0xff]  }
  0xf9   :  { %v425_v56 = vadd.f32 %v414_v43, %v213_v49  ;;  %v214_v57 = vmul.f32 %v3190_v50, %v157_v55  ;;  %v534_v55 = vld [vmem:[%s4535_s6 + $0x38] sm:$0xff]  ;;  %v464_v32 = vshrl.u32 %v215_v27, 7 }
  0xfa   :  { %v420_v31 = vadd.f32 %v402_v19, %v208_v58  ;;  %v760_v19 = vld [vmem:[%s4537_s8 + $0x18] sm:$0xff]  ;;  %v217_v29 = vadd.s32 128, %v3740_v28  ;;  %vm248_vm2 = vcmp.lt.s32.totalorder %v3740_v28, 127  ;;  %vm246_vm8 = vcmp.ge.s32.totalorder %v3740_v28, 1 }
  0xfb   :  { %v3680_v61 = vpack.c.bf16 %v425_v56, %v423_v54  ;;  %v426_v62 = vadd.f32 %v416_v59, %v214_v57  ;;  %v3747_v33 = vsub.s32 0, %v464_v32  ;;  %v3749_v34 = vsub.s32 4, %v464_v32 }
  0xfc   :  { %v3690_v37 = vpack.c.bf16 %v422_v36, %v420_v31  ;;  %v3743_v30 = vand.u32 127, %v217_v29  ;;  %vm250_vm0 = vcmp.lt.s32.totalorder %v3740_v28, 126 }
  0xfd   :  { %v3682_v48 = vpack.c.bf16 %v426_v62, %v424_v44  ;;  %481 = vrot.lane.b32.xlu0 %v3680_v61, %s3454_s18  ;;  %v3151_v62 = vld [vmem:[%s4534_s5 + $0x70] sm:$0xff]  }
  0xfe   :  { %vm249_vm3 = vcmp.lt.s32.totalorder %v3743_v30, 127  ;;  %vm247_vm9 = vcmp.ge.s32.totalorder %v3743_v30, 1  ;;  %vm251_vm1 = vcmp.lt.s32.totalorder %v3743_v30, 126 }
  0xff   :  { %483 = vrot.lane.b32.xlu1 %v3682_v48, %s3454_s18  ;;  %vm503_vm4 = vmpackc.low %vm249_vm3, %vm248_vm2  ;;  %vm1047_vm3 = vcmask 1031168  }
 0x100   :  { %v504_v35 = vsel %vm503_vm4, 65537, %v4543_v4  ;;  %vm461_vm10 = vmpackc.low %vm247_vm9, %vm246_vm8  ;;  %vm244_vm9 = vcmp.ge.s32.totalorder %v3740_v28, 2 }
 0x101   :  { %477 = vrot.lane.b32.xlu0 %v3686_v41, %s3454_s18  ;;  %v508_v38 = vrot.slane %v504_v35, %v3747_v33  ;;  %v512_v39 = vrot.slane %v504_v35, %v3749_v34  ;;  %v462_v57 = vsel %vm461_vm10, 65537, %v4543_v4  ;;  %vm1065_vm2 = vmpackc.low %vm251_vm1, %vm250_vm0  ;;  %vm245_vm10 = vcmp.ge.s32.totalorder %v3743_v30, 2 }
 0x102   :  { %v470_v58 = vrot.slane %v462_v57, %v3749_v34  ;;  %v466_v60 = vrot.slane %v462_v57, %v3747_v33  ;;  %vm1023_vm0 = vmpackc.low %vm245_vm10, %vm244_vm9  ;;  %vm1005_vm1 = vcmask 15360   ;;  %vm1619_vm10 = vcmask 1014784  }
 0x103   :  { %479 = vrot.lane.b32.xlu1 %v3690_v37, %s3454_s18  ;;  %vm3754_vm6 = vcmp.ne.s16.totalorder %v508_v38, 0  ;;  %vm3758_vm7 = vcmp.ne.s16.totalorder %v512_v39, 0 }
 0x104   :  { %vm3782_vm12 = vcmp.ne.s16.totalorder %v470_v58, 0  ;;  %vm3786_vm13 = vcmp.ne.s16.totalorder %v466_v60, 0 }
 0x105   :  { %435 = vrot.lane.b32.xlu0 %v3682_v48, %s3455_s19 }
 0x107   :  { %441 = vrot.lane.b32.xlu1 %v3680_v61, %s3455_s19 }
 0x109   :  { %433 = vrot.lane.b32.xlu0 %v3690_v37, %s3455_s19 }
 0x10b   :  { %439 = vrot.lane.b32.xlu1 %v3686_v41, %s3455_s19 }
 0x10d   :  { %567 = vperm.xlu0 %3087, %v533_v52  }
 0x10f   :  { %572 = vperm.xlu1 %3088, %v534_v55  }
 0x111   :  { %557 = vperm.xlu0 %3087, %v531_v0  }
 0x113   :  { %562 = vperm.xlu1 %3088, %v532_v1   ;;  %v3120_v1 = vld [vmem:[%s4534_s5 + $0x8] sm:$0xff]  }
 0x115   :  { %547 = vperm.xlu0 %3087, %v529_v2  }
 0x117   :  { %552 = vperm.xlu1 %3088, %v530_v6  }
 0x119   :  { %537 = vperm.xlu0 %3087, %v527_v7  }
 0x11b   :  { %542 = vperm.xlu1 %3088, %v528_v13  }
 0x11d   :  { %777 = vperm.xlu0 %3087, %v759_v18  }
 0x11f   :  { %782 = vperm.xlu1 %3088, %v760_v19  }
 0x121   :  { %767 = vperm.xlu0 %3087, %v757_v20  }
 0x123   :  { %772 = vperm.xlu1 %3088, %v758_v21  }
 0x16f   :  { %v482_v40 = vpop.permute.xlu0 %481 }
 0x171   :  { %v484_v45 = vpop.permute.xlu1 %483 }
 0x172   :  { %v487_v46 = vsel %vm485_vm5, %v482_v40, %v484_v45  ;;  %v497_v47 = vsel %vm485_vm5, %v484_v45, %v482_v40 }
 0x173   :  { %v517_v49 = vsel %vm3754_vm6, %v487_v46, 0  ;;  %2844 = vmatprep.subr.msk.bf16.mxu0 %vm3758_vm7, %v497_v47  ;;  %v478_v50 = vpop.permute.xlu0 %477 }
 0x174   :  { %613 = vmatpush1.bf16.msra.mxu0 %v517_v49 }
 0x175   :  { %v480_v51 = vpop.permute.xlu1 %479 }
 0x176   :  { %v486_v53 = vsel %vm485_vm5, %v478_v50, %v480_v51  ;;  %v493_v54 = vsel %vm485_vm5, %v480_v51, %v478_v50 }
 0x177   :  { %v515_v56 = vsel %vm3754_vm6, %v486_v53, 0  ;;  %2845 = vmatprep.subr.msk.bf16.mxu0 %vm3758_vm7, %v493_v54  ;;  %v436_v44 = vpop.permute.xlu0 %435 }
 0x178   :  { %615 = vmatpush1.bf16.msra.mxu0 %v515_v56 }
 0x179   :  { %616 = vmatprep.subr.bf16.mxu0 %v3682_v48  ;;  %v442_v59 = vpop.permute.xlu1 %441 }
 0x17a   :  { %v445_v36 = vsel %vm443_vm11, %v442_v59, %v436_v44  ;;  %v455_v48 = vsel %vm443_vm11, %v436_v44, %v442_v59 }
 0x17c   :  { %617 = vmatpush1.bf16.msra.mxu0 %v3680_v61  ;;  %v475_v61 = vsel %vm3786_vm13, %v455_v48, 0 }
 0x17d   :  { %618 = vmatprep.subr.bf16.mxu0 %v3690_v37  ;;  %v440_v31 = vpop.permute.xlu1 %439  ;;  %v434_v37 = vpop.permute.xlu0 %433 }
 0x17e   :  { %v444_v52 = vsel %vm443_vm11, %v440_v31, %v434_v37  ;;  %v451_v55 = vsel %vm443_vm11, %v434_v37, %v440_v31 }
 0x17f   :  { %v473_v0 = vsel %vm3786_vm13, %v451_v55, 0 }
 0x180   :  { %619 = vmatpush1.bf16.msra.mxu0 %v3686_v41  ;;  %v3119_v41 = vld [vmem:[%s4534_s5] sm:$0xff]  }
 0x181   :  { %2846 = vmatprep.subr.msk.bf16.mxu0 %vm3782_vm12, %v445_v36 }
 0x184   :  { %621 = vmatpush1.bf16.msra.mxu0 %v475_v61 }
 0x185   :  { %2847 = vmatprep.subr.msk.bf16.mxu0 %vm3782_vm12, %v444_v52 }
 0x188   :  { %623 = vmatpush1.bf16.msra.mxu0 %v473_v0 }
 0x189   :  { %928 = vmatprep.subr.bf16.mxu0 %v3537_v3  ;;  %v3121_v3 = vld [vmem:[%s4534_s5 + $0x10] sm:$0xff]  }
 0x18b   :  { %2848 = vmatmul.mubr.msk.bf16.vlgmr.msra.gmra.mxu0 %vm595_vm14, %v3119_v41 }
 0x18c   :  { %650 = vmatprep.mubr.bf16.mxu0 %v4543_v4  ;;  %929 = vmatpush1.bf16.msra.mxu0 %v3543_v5  ;;  %v3122_v5 = vld [vmem:[%s4534_s5 + $0x18] sm:$0xff]  }
 0x18d   :  { %930 = vmatprep.subr.bf16.mxu0 %v3555_v8  ;;  %v3123_v8 = vld [vmem:[%s4530_s1 + $0x10] sm:$0xff]  }
 0x190   :  { %931 = vmatpush1.bf16.msra.mxu0 %v3561_v9  ;;  %v3125_v9 = vld [vmem:[%s4530_s1 + $0x18] sm:$0xff]  }
 0x191   :  { %932 = vmatprep.subr.bf16.mxu0 %v3567_v10 }
 0x193   :  { %2849 = vmatmul.mubr.msk.bf16.gmra.mxu0 %vm595_vm14, %v3120_v1 }
 0x194   :  { %660 = vmatprep.mubr.bf16.mxu0 %v4543_v4  ;;  %933 = vmatpush1.bf16.msra.mxu0 %v3575_v11 }
 0x195   :  { %934 = vmatprep.subr.bf16.mxu0 %v3581_v12 }
 0x198   :  { %935 = vmatpush1.bf16.msra.mxu0 %v3590_v14 }
 0x199   :  { %936 = vmatprep.subr.bf16.mxu0 %v3596_v15 }
 0x19b   :  { %2850 = vmatmul.mubr.msk.bf16.gmra.mxu0 %vm595_vm14, %v3121_v3 }
 0x19c   :  { %670 = vmatprep.mubr.bf16.mxu0 %v4543_v4  ;;  %937 = vmatpush1.bf16.msra.mxu0 %v3601_v16 }
 0x19d   :  { %938 = vmatprep.subr.bf16.mxu0 %v3607_v17  ;;  %v568_v17 = vpop.permute.xlu0 %567 }
 0x1a0   :  { %939 = vmatpush1.bf16.msra.mxu0 %v3626_v22 }
 0x1a1   :  { %940 = vmatprep.subr.bf16.mxu0 %v3632_v23 }
 0x1a3   :  { %2851 = vmatmul.mubr.msk.bf16.gmra.mxu0 %vm595_vm14, %v3122_v5 }
 0x1a4   :  { %941 = vmatpush1.bf16.msra.mxu0 %v3639_v24  ;;  %960 = vmatprep.mubr.bf16.mxu0 %v4543_v4  ;;  %v573_v24 = vpop.permute.xlu1 %572 }
 0x1a5   :  { %942 = vmatprep.subr.bf16.mxu0 %v3644_v25 }
 0x1a8   :  { %943 = vmatpush1.bf16.msra.mxu0 %v3651_v26  ;;  %v558_v26 = vpop.permute.xlu0 %557  ;;  %v563_v13 = vpop.permute.xlu1 %562 }
 0x1ab   :  { %961 = vmatmul.mubr.bf16.vlgmr.msra.gmra.mxu0 %v3123_v8 }
 0x1ac   :  { %970 = vmatprep.mubr.bf16.mxu0 %v4543_v4  ;;  %v548_v47 = vpop.permute.xlu0 %547  ;;  %v553_v51 = vpop.permute.xlu1 %552 }
 0x1b0   :  { %v538_v59 = vpop.permute.xlu0 %537  ;;  %v543_v60 = vpop.permute.xlu1 %542 }
 0x1b3   :  { %971 = vmatmul.mubr.bf16.gmra.mxu0 %v3125_v9 }
 0x1b4   :  { %1434 = vmatprep.mubr.bf16.mxu0 %v4543_v4 }
 0x24b   :  { %v3847_v10 = vpop.f32.mrf.mxu0 }
 0x24d   :  { %v644_v11 = vpop.f32.mrf.mxu0 }
 0x24e   :  { %v645_v44 = vadd.f32 %v644_v11, %v538_v59 }
 0x24f   :  { %v3849_v12 = vpop.f32.mrf.mxu0 }
 0x251   :  { %v648_v14 = vpop.f32.mrf.mxu0 }
 0x252   :  { %v649_v36 = vadd.f32 %v648_v14, %v543_v60 }
 0x253   :  { %v652_v15 = vpop.f32.mrf.mxu0 }
 0x254   :  { %v653_v48 = vadd.f32 %v652_v15, %v548_v47 }
 0x255   :  { %v654_v16 = vpop.f32.mrf.mxu0 }
 0x256   :  { %v655_v61 = vadd.f32 %v654_v16, %v548_v47 }
 0x257   :  { %v656_v22 = vpop.f32.mrf.mxu0 }
 0x258   :  { %v657_v52 = vadd.f32 %v656_v22, %v553_v51  ;;  %v647_v22 = vadd.f32 %v3849_v12, %v543_v60 }
 0x259   :  { %v658_v23 = vpop.f32.mrf.mxu0 }
 0x25a   :  { %v659_v55 = vadd.f32 %v658_v23, %v553_v51 }
 0x25b   :  { %v662_v25 = vpop.f32.mrf.mxu0 }
 0x25c   :  { %v663_v35 = vadd.f32 %v662_v25, %v558_v26  ;;  %v643_v25 = vadd.f32 %v3847_v10, %v538_v59  ;;  %v3126_v59 = vld [vmem:[%s4536_s7 + $0x8] sm:$0xff]  }
 0x25d   :  { %v664_v2 = vpop.f32.mrf.mxu0 }
 0x25e   :  { %v665_v6 = vadd.f32 %v664_v2, %v558_v26  ;;  %v2852_v53 = vmul.f32 -1.442695, %v663_v35 }
 0x25f   :  { %v666_v7 = vpop.f32.mrf.mxu0 }
 0x260   :  { %v2853_v18 = vmul.f32 -1.442695, %v665_v6  ;;  %v667_v21 = vadd.f32 %v666_v7, %v563_v13 }
 0x261   :  { %v668_v19 = vpop.f32.mrf.mxu0 }
 0x262   :  { %v669_v20 = vadd.f32 %v668_v19, %v563_v13  ;;  %3191 = vpow2.f32 %v2853_v18  ;;  %v2854_v45 = vmul.f32 -1.442695, %v667_v21 }
 0x263   :  { %v672_v27 = vpop.f32.mrf.mxu0 }
 0x264   :  { %v2855_v29 = vmul.f32 -1.442695, %v669_v20  ;;  %v673_v32 = vadd.f32 %v672_v27, %v568_v17 }
 0x265   :  { %v674_v38 = vpop.f32.mrf.mxu0 }
 0x266   :  { %3193 = vpow2.f32 %v2855_v29  ;;  %v2856_v39 = vmul.f32 -1.442695, %v673_v32  ;;  %v675_v40 = vadd.f32 %v674_v38, %v568_v17 }
 0x267   :  { %v676_v46 = vpop.f32.mrf.mxu0 }
 0x268   :  { %v2857_v49 = vmul.f32 -1.442695, %v675_v40  ;;  %v677_v50 = vadd.f32 %v676_v46, %v573_v24  ;;  %3195 = vpow2.f32 %v2856_v39 }
 0x269   :  { %v678_v54 = vpop.f32.mrf.mxu0 }
 0x26a   :  { %3197 = vpow2.f32 %v2857_v49  ;;  %v2858_v56 = vmul.f32 -1.442695, %v677_v50  ;;  %v679_v57 = vadd.f32 %v678_v54, %v573_v24 }
 0x26b   :  { %3199 = vpow2.f32 %v2854_v45  ;;  %v962_v60 = vpop.f32.mrf.mxu0 }
 0x26c   :  { %3201 = vpow2.f32 %v2858_v56  ;;  %v2859_v58 = vmul.f32 -1.442695, %v679_v57 }
 0x26d   :  { %3203 = vpow2.f32 %v2852_v53 }
 0x26e   :  { %3205 = vpow2.f32 %v2859_v58  ;;  %v3124_v58 = vld [vmem:[%s4536_s7] sm:$0xff]  }
 0x26f   :  { %v3192_v31 = vpop.eup %3191  ;;  %3207 = vtanh.f32 %v645_v44  ;;  %v964_v44 = vpop.f32.mrf.mxu0 }
 0x270   :  { %3209 = vtanh.f32 %v649_v36  ;;  %v714_v0 = vadd.f32 1.0, %v3192_v31 }
 0x271   :  { %3211 = vtanh.f32 %v653_v48  ;;  %v966_v36 = vpop.f32.mrf.mxu0 }
 0x272   :  { %3213 = vtanh.f32 %v655_v61 }
 0x273   :  { %v3194_v37 = vpop.eup %3193  ;;  %3215 = vtanh.f32 %v657_v52  ;;  %v968_v31 = vpop.f32.mrf.mxu0 }
 0x274   :  { %v716_v1 = vadd.f32 1.0, %v3194_v37  ;;  %3217 = vtanh.f32 %v659_v55  ;;  %v783_v55 = vpop.permute.xlu1 %782 }
 0x275   :  { %v3196_v41 = vpop.eup %3195  ;;  %3219 = vrcp.f32 %v714_v0  ;;  %v972_v52 = vpop.f32.mrf.mxu0 }
 0x276   :  { %v717_v11 = vadd.f32 1.0, %v3196_v41  ;;  %3221 = vrcp.f32 %v716_v1  ;;  %v778_v41 = vpop.permute.xlu0 %777 }
 0x277   :  { %v3198_v3 = vpop.eup %3197  ;;  %v974_v1 = vpop.f32.mrf.mxu0 }
 0x278   :  { %v3200_v5 = vpop.eup %3199  ;;  %v718_v8 = vadd.f32 1.0, %v3198_v3 }
 0x279   :  { %v3202_v9 = vpop.eup %3201  ;;  %v715_v17 = vadd.f32 1.0, %v3200_v5  ;;  %v3127_v5 = vld [vmem:[%s4536_s7 + $0x10] sm:$0xff]  }
 0x27a   :  { %v3204_v14 = vpop.eup %3203  ;;  %v719_v15 = vadd.f32 1.0, %v3202_v9  ;;  %3223 = vrcp.f32 %v718_v8  ;;  %v773_v9 = vpop.permute.xlu1 %772 }
 0x27b   :  { %v3206_v16 = vpop.eup %3205  ;;  %v713_v24 = vadd.f32 1.0, %v3204_v14  ;;  %v976_v14 = vpop.f32.mrf.mxu0 }
 0x27c   :  { %3225 = vrcp.f32 %v719_v15  ;;  %v720_v23 = vadd.f32 1.0, %v3206_v16  ;;  %v3208_v26 = vpop.eup %3207  ;;  %v768_v16 = vpop.permute.xlu0 %767 }
 0x27d   :  { %3227 = vrcp.f32 %v717_v11  ;;  %v3210_v2 = vpop.eup %3209 }
 0x27e   :  { %3229 = vrcp.f32 %v720_v23  ;;  %v3212_v6 = vpop.eup %3211 }
 0x27f   :  { %3231 = vrcp.f32 %v715_v17  ;;  %v3214_v7 = vpop.eup %3213 }
 0x280   :  { %3233 = vtanh.f32 %v647_v22  ;;  %v3216_v13 = vpop.eup %3215 }
 0x281   :  { %3235 = vrcp.f32 %v713_v24  ;;  %v3218_v18 = vpop.eup %3217 }
 0x282   :  { %3237 = vtanh.f32 %v643_v25  ;;  %v3220_v19 = vpop.eup %3219 }
 0x283   :  { %v3222_v20 = vpop.eup %3221  ;;  %v738_v49 = vmul.f32 %v3220_v19, %v3208_v26 }
 0x284   :  { %v740_v39 = vmul.f32 %v3222_v20, %v3210_v2 }
 0x286   :  { %v746_v54 = vpack.c.bf16 %v740_v39, %v738_v49  ;;  %v2884_v49 = vld [vmem:[%s4535_s6 + $0x50] sm:$0xff] }
 0x287   :  { %v3224_v12 = vpop.eup %3223 }
 0x288   :  { %v742_v38 = vmul.f32 %v3224_v12, %v3214_v7 }
 0x289   :  { %v3226_v21 = vpop.eup %3225 }
 0x28a   :  { %v3228_v27 = vpop.eup %3227  ;;  %v743_v32 = vmul.f32 %v3226_v21, %v3216_v13 }
 0x28b   :  { %v3230_v29 = vpop.eup %3229  ;;  %v741_v45 = vmul.f32 %v3228_v27, %v3212_v6  ;;  %v3128_v27 = vld [vmem:[%s4536_s7 + $0x18] sm:$0xff]  }
 0x28c   :  { %v3232_v35 = vpop.eup %3231  ;;  %v744_v10 = vmul.f32 %v3230_v29, %v3218_v18  ;;  %v978_v18 = vpop.f32.mrf.mxu0 }
 0x28d   :  { %v3234_v40 = vpop.eup %3233  ;;  %v747_v50 = vpack.c.bf16 %v743_v32, %v741_v45  ;;  %v2889_v45 = vld [vmem:[%s4535_s6 + $0x78] sm:$0xff] }
 0x28e   :  { %v3236_v46 = vpop.eup %3235  ;;  %v748_v47 = vpack.c.bf16 %v744_v10, %v742_v38  ;;  %v739_v51 = vmul.f32 %v3234_v40, %v3232_v35  ;;  %v2888_v40 = vld [vmem:[%s4535_s6 + $0x70] sm:$0xff] }
 0x28f   :  { %v3238_v53 = vpop.eup %3237 }
 0x290   :  { %850 = vmatprep.subr.bf16.mxu1 %v748_v47  ;;  %v737_v56 = vmul.f32 %v3238_v53, %v3236_v46  ;;  %v2886_v46 = vld [vmem:[%s4535_s6 + $0x60] sm:$0xff]  ;;  %v2887_v47 = vld [vmem:[%s4535_s6 + $0x68] sm:$0xff] }
 0x291   :  { %851 = vmatpush1.bf16.msra.mxu1 %v747_v50  ;;  %v2885_v50 = vld [vmem:[%s4535_s6 + $0x58] sm:$0xff]  ;;  %v2883_v53 = vld [vmem:[%s4535_s6 + $0x48] sm:$0xff] }
 0x292   :  { %852 = vmatprep.subr.bf16.mxu1 %v746_v54  ;;  %v745_v57 = vpack.c.bf16 %v739_v51, %v737_v56  ;;  %v2882_v51 = vld [vmem:[%s4535_s6 + $0x40] sm:$0xff]  ;;  %v2920_v54 = vld [vmem:[%s4537_s8 + $0x50] sm:$0xff]  ;;  %v2921_v56 = vld [vmem:[%s4537_s8 + $0x58] sm:$0xff] }
 0x295   :  { %853 = vmatpush1.bf16.msra.mxu1 %v745_v57  ;;  %v2918_v57 = vld [vmem:[%s4537_s8 + $0x40] sm:$0xff] }
 0x298   :  { %2864 = vmatmul.mubr.msk.bf16.vlgmr.msra.gmra.mxu1 %vm825_vm15, %v3124_v58  ;;  %v2919_v58 = vld [vmem:[%s4537_s8 + $0x48] sm:$0xff] }
 0x299   :  { %880 = vmatprep.mubr.bf16.mxu1 %v4543_v4 }
 0x2a0   :  { %2865 = vmatmul.mubr.msk.bf16.gmra.mxu1 %vm825_vm15, %v3126_v59  ;;  %v1066_v59 = vsel %vm1065_vm2, 65537, %v4543_v4 }
 0x2a1   :  { %890 = vmatprep.mubr.bf16.mxu1 %v4543_v4 }
 0x2a8   :  { %2866 = vmatmul.mubr.msk.bf16.gmra.mxu1 %vm825_vm15, %v3127_v5  ;;  %v1024_v5 = vsel %vm1023_vm0, 65537, %v4543_v4 }
 0x2a9   :  { %900 = vmatprep.mubr.bf16.mxu1 %v4543_v4 }
 0x2b0   :  { %2867 = vmatmul.mubr.msk.bf16.gmra.mxu1 %vm825_vm15, %v3128_v27 }
 0x2b1   :  { %1203 = vmatprep.mubr.bf16.mxu1 %v4543_v4 }
 0x358   :  { %v872_v48 = vpop.f32.mrf.mxu1 }
 0x359   :  { %v873_v24 = vadd.f32 %v872_v48, %v768_v16 }
 0x35a   :  { %v874_v61 = vpop.f32.mrf.mxu1 }
 0x35b   :  { %v875_v13 = vadd.f32 %v874_v61, %v768_v16  ;;  %v981_v29 = vadd.f32 %v962_v60, %v873_v24  ;;  %v1070_v60 = vrot.slane %v1066_v59, %v3747_v33 }
 0x35c   :  { %v876_v37 = vpop.f32.mrf.mxu1 }
 0x35d   :  { %v877_v17 = vadd.f32 %v876_v37, %v773_v9  ;;  %v982_v38 = vadd.f32 %v964_v44, %v875_v13  ;;  %v1074_v44 = vrot.slane %v1066_v59, %v3749_v34  ;;  %vm3930_vm4 = vcmp.ne.s16.totalorder %v1070_v60, 0  ;;  %v3132_v13 = vld [vmem:[%s4534_s5 + $0x38] sm:$0xff]  }
 0x35e   :  { %v878_v0 = vpop.f32.mrf.mxu1 }
 0x35f   :  { %v879_v26 = vadd.f32 %v878_v0, %v773_v9  ;;  %v983_v19 = vadd.f32 %v966_v36, %v877_v17  ;;  %vm1076_vm8 = vcmp.ne.s16.totalorder %v1074_v44, 0 }
 0x360   :  { %v882_v3 = vpop.f32.mrf.mxu1 }
 0x361   :  { %v883_v11 = vadd.f32 %v882_v3, %v778_v41  ;;  %v984_v32 = vadd.f32 %v968_v31, %v879_v26  ;;  %v3879_v10 = vpack.c.bf16 %v983_v19, %v981_v29 }
 0x362   :  { %v884_v8 = vpop.f32.mrf.mxu1 }
 0x363   :  { %v885_v22 = vadd.f32 %v884_v8, %v778_v41  ;;  %v985_v2 = vadd.f32 %v972_v52, %v883_v11  ;;  %v3882_v39 = vpack.c.bf16 %v984_v32, %v982_v38  ;;  %v1032_v8 = vrot.slane %v1024_v5, %v3749_v34 }
 0x364   :  { %v886_v15 = vpop.f32.mrf.mxu1  ;;  %v1028_v11 = vrot.slane %v1024_v5, %v3747_v33 }
 0x365   :  { %v887_v23 = vadd.f32 %v886_v15, %v783_v55  ;;  %v986_v20 = vadd.f32 %v974_v1, %v885_v22  ;;  %vm1034_vm2 = vcmp.ne.s16.totalorder %v1032_v8, 0 }
 0x366   :  { %v888_v25 = vpop.f32.mrf.mxu1 }
 0x367   :  { %v987_v6 = vadd.f32 %v976_v14, %v887_v23  ;;  %v889_v7 = vadd.f32 %v888_v25, %v783_v55 }
 0x369   :  { %v988_v12 = vadd.f32 %v978_v18, %v889_v7  ;;  %v3868_v21 = vpack.c.bf16 %v987_v6, %v985_v2  ;;  %v3129_v2 = vld [vmem:[%s4534_s5 + $0x20] sm:$0xff]   ;;  %v3130_v6 = vld [vmem:[%s4534_s5 + $0x28] sm:$0xff]   ;;  %v3131_v7 = vld [vmem:[%s4534_s5 + $0x30] sm:$0xff]   ;;  %v3967_v18 = vpop.f32.mrf.mxu1 }
 0x36a   :  { %4555 = vst [vmem:[#allocation5_spill] sm:$0xff] %v3967_v18 }
 0x36b   :  { %1043 = vrot.lane.b32.xlu0 %v3868_v21, %s3456_s4  ;;  %v3874_v35 = vpack.c.bf16 %v988_v12, %v986_v20  ;;  %v3969_v19 = vpop.f32.mrf.mxu1 }
 0x36c   :  { %4556 = vst [vmem:[#allocation6_spill] sm:$0xff] %v3969_v19 }
 0x36d   :  { %1045 = vrot.lane.b32.xlu1 %v3874_v35, %s3456_s4  ;;  %v3971_v20 = vpop.f32.mrf.mxu1 }
 0x36e   :  { %4557 = vst [vmem:[#allocation7_spill] sm:$0xff] %v3971_v20 }
 0x36f   :  { %1039 = vrot.lane.b32.xlu0 %v3879_v10, %s3456_s4  ;;  %v3973_v12 = vpop.f32.mrf.mxu1 }
 0x370   :  { %4558 = vst [vmem:[#allocation8_spill] sm:$0xff] %v3973_v12 }
 0x371   :  { %1041 = vrot.lane.b32.xlu1 %v3882_v39, %s3456_s4  ;;  %s3431_s4 = scalar_lea.vmem %s2800_s27, 256 }
 0x372   :  { %p3432_p0 = scmp.ne.s32.totalorder %s2800_s27, %s3431_s4  ;;  %p3437_p2 = scmp.lt.s32.totalorder %s3431_s4, %s3431_s4 }
 0x373   :  { %997 = vrot.lane.b32.xlu0 %v3874_v35, %s3457_s28 }
 0x374   :  { %p3438_p3 = por %p3437_p2, %p3436_p1 }
 0x375   :  { %1003 = vrot.lane.b32.xlu1 %v3868_v21, %s3457_s28 }
 0x376   :  { %p3439_p4 = pnand %p3438_p3, %p3432_p0 }
 0x377   :  { %995 = vrot.lane.b32.xlu0 %v3882_v39, %s3457_s28 }
 0x379   :  { %1001 = vrot.lane.b32.xlu1 %v3879_v10, %s3457_s28 }
 0x37b   :  { %1131 = vperm.xlu0 %3087, %v2888_v40  }
 0x37d   :  { %1136 = vperm.xlu1 %3088, %v2889_v45  }
 0x37f   :  { %1121 = vperm.xlu0 %3087, %v2886_v46  }
 0x381   :  { %1126 = vperm.xlu1 %3088, %v2887_v47  }
 0x383   :  { %1111 = vperm.xlu0 %3087, %v2884_v49  }
 0x385   :  { %1116 = vperm.xlu1 %3088, %v2885_v50  }
 0x387   :  { %1101 = vperm.xlu0 %3087, %v2882_v51  }
 0x389   :  { %1106 = vperm.xlu1 %3088, %v2883_v53  }
 0x38b   :  { %1342 = vperm.xlu0 %3087, %v2920_v54  }
 0x38d   :  { %1347 = vperm.xlu1 %3088, %v2921_v56  }
 0x38f   :  { %1332 = vperm.xlu0 %3087, %v2918_v57  }
 0x391   :  { %1337 = vperm.xlu1 %3088, %v2919_v58  }
 0x3dd   :  { %v1044_v36 = vpop.permute.xlu0 %1043 }
 0x3df   :  { %v1046_v31 = vpop.permute.xlu1 %1045 }
 0x3e0   :  { %v1049_v61 = vsel %vm1047_vm3, %v1044_v36, %v1046_v31  ;;  %v1059_v37 = vsel %vm1047_vm3, %v1046_v31, %v1044_v36 }
 0x3e1   :  { %v1079_v52 = vsel %vm3930_vm4, %v1049_v61, 0  ;;  %2894 = vmatprep.subr.msk.bf16.mxu1 %vm1076_vm8, %v1059_v37  ;;  %v1040_v55 = vpop.permute.xlu0 %1039 }
 0x3e2   :  { %1176 = vmatpush1.bf16.msra.mxu1 %v1079_v52 }
 0x3e3   :  { %v1042_v0 = vpop.permute.xlu1 %1041 }
 0x3e4   :  { %v1048_v41 = vsel %vm1047_vm3, %v1040_v55, %v1042_v0  ;;  %v1055_v1 = vsel %vm1047_vm3, %v1042_v0, %v1040_v55  ;;  %vm1033_vm3 = vcmp.ne.s16.totalorder %v1028_v11, 0 }
 0x3e5   :  { %v1077_v3 = vsel %vm3930_vm4, %v1048_v41, 0  ;;  %2895 = vmatprep.subr.msk.bf16.mxu1 %vm1076_vm8, %v1055_v1  ;;  %v998_v14 = vpop.permute.xlu0 %997  ;;  %vm252_vm4 = vcmp.lt.s32.totalorder %v3740_v28, 124  ;;  %vm253_vm8 = vcmp.lt.s32.totalorder %v3743_v30, 124 }
 0x3e6   :  { %1178 = vmatpush1.bf16.msra.mxu1 %v1077_v3  ;;  %vm1637_vm9 = vmpackc.low %vm253_vm8, %vm252_vm4  ;;  %vm1577_vm8 = vcmask 31744  }
 0x3e7   :  { %1179 = vmatprep.subr.bf16.mxu1 %v3874_v35  ;;  %v1004_v9 = vpop.permute.xlu1 %1003 }
 0x3e8   :  { %v1007_v15 = vsel %vm1005_vm1, %v1004_v9, %v998_v14  ;;  %v1017_v16 = vsel %vm1005_vm1, %v998_v14, %v1004_v9 }
 0x3e9   :  { %v1037_v22 = vsel %vm1033_vm3, %v1017_v16, 0  ;;  %v996_v23 = vpop.permute.xlu0 %995 }
 0x3ea   :  { %1180 = vmatpush1.bf16.msra.mxu1 %v3868_v21  ;;  %v3975_v21 = vpop.f32.mrf.mxu1 }
 0x3eb   :  { %1181 = vmatprep.subr.bf16.mxu1 %v3882_v39  ;;  %v1002_v17 = vpop.permute.xlu1 %1001  ;;  %4559 = vst [vmem:[#allocation9_spill] sm:$0xff] %v3975_v21 }
 0x3ec   :  { %v1006_v24 = vsel %vm1005_vm1, %v1002_v17, %v996_v23  ;;  %v1013_v25 = vsel %vm1005_vm1, %v996_v23, %v1002_v17  ;;  %v3977_v27 = vpop.f32.mrf.mxu1 }
 0x3ed   :  { %v1035_v26 = vsel %vm1033_vm3, %v1013_v25, 0  ;;  %4560 = vst [vmem:[#allocation10_spill] sm:$0xff] %v3977_v27  ;;  %vm243_vm3 = vcmp.ge.s32.totalorder %v3743_v30, 4 }
 0x3ee   :  { %1182 = vmatpush1.bf16.msra.mxu1 %v3879_v10  ;;  %v3979_v29 = vpop.f32.mrf.mxu1 }
 0x3ef   :  { %2896 = vmatprep.subr.msk.bf16.mxu1 %vm1034_vm2, %v1007_v15  ;;  %4561 = vst [vmem:[#allocation11_spill] sm:$0xff] %v3979_v29 }
 0x3f0   :  { %v3981_v32 = vpop.f32.mrf.mxu1 }
 0x3f1   :  { %4562 = vst [vmem:[#allocation12_spill] sm:$0xff] %v3981_v32 }
 0x3f2   :  { %1184 = vmatpush1.bf16.msra.mxu1 %v1037_v22 }
 0x3f3   :  { %2897 = vmatprep.subr.msk.bf16.mxu1 %vm1034_vm2, %v1006_v24  ;;  %vm242_vm2 = vcmp.ge.s32.totalorder %v3740_v28, 4 }
 0x3f4   :  { %vm1595_vm4 = vmpackc.low %vm243_vm3, %vm242_vm2 }
 0x3f6   :  { %1186 = vmatpush1.bf16.msra.mxu1 %v1035_v26  ;;  %v1132_v46 = vpop.permute.xlu0 %1131 }
 0x3f8   :  { %v1137_v50 = vpop.permute.xlu1 %1136 }
 0x3f9   :  { %2898 = vmatmul.mubr.msk.bf16.vlgmr.msra.gmra.mxu1 %vm595_vm14, %v3129_v2 }
 0x3fa   :  { %1213 = vmatprep.mubr.bf16.mxu1 %v4543_v4  ;;  %v1122_v53 = vpop.permute.xlu0 %1121 }
 0x3fc   :  { %v1127_v58 = vpop.permute.xlu1 %1126 }
 0x3fe   :  { %v1112_v3 = vpop.permute.xlu0 %1111 }
 0x400   :  { %v1117_v9 = vpop.permute.xlu1 %1116 }
 0x401   :  { %2899 = vmatmul.mubr.msk.bf16.gmra.mxu1 %vm595_vm14, %v3130_v6 }
 0x402   :  { %1223 = vmatprep.mubr.bf16.mxu1 %v4543_v4  ;;  %v1102_v22 = vpop.permute.xlu0 %1101 }
 0x404   :  { %v1107_v23 = vpop.permute.xlu1 %1106 }
 0x409   :  { %2900 = vmatmul.mubr.msk.bf16.gmra.mxu1 %vm595_vm14, %v3131_v7 }
 0x40a   :  { %1233 = vmatprep.mubr.bf16.mxu1 %v4543_v4 }
 0x411   :  { %2901 = vmatmul.mubr.msk.bf16.gmra.mxu1 %vm595_vm14, %v3132_v13 }
 0x412   :  { %1775 = vmatprep.mubr.bf16.mxu1 %v4543_v4 }
 0x4b9   :  { %v3983_v35 = vpop.f32.mrf.mxu1 }
 0x4bb   :  { %v1207_v38 = vpop.f32.mrf.mxu1 }
 0x4bc   :  { %v1208_v24 = vadd.f32 %v1207_v38, %v1102_v22 }
 0x4bd   :  { %v3985_v10 = vpop.f32.mrf.mxu1 }
 0x4bf   :  { %v1211_v39 = vpop.f32.mrf.mxu1 }
 0x4c0   :  { %v1212_v25 = vadd.f32 %v1211_v39, %v1107_v23 }
 0x4c1   :  { %v1215_v40 = vpop.f32.mrf.mxu1 }
 0x4c2   :  { %v1216_v26 = vadd.f32 %v1215_v40, %v1112_v3 }
 0x4c3   :  { %v1217_v45 = vpop.f32.mrf.mxu1 }
 0x4c4   :  { %v1218_v6 = vadd.f32 %v1217_v45, %v1112_v3 }
 0x4c5   :  { %v1219_v47 = vpop.f32.mrf.mxu1 }
 0x4c6   :  { %v1220_v13 = vadd.f32 %v1219_v47, %v1117_v9 }
 0x4c7   :  { %v1221_v49 = vpop.f32.mrf.mxu1 }
 0x4c9   :  { %v1225_v51 = vpop.f32.mrf.mxu1 }
 0x4ca   :  { %v1226_v37 = vadd.f32 %v1225_v51, %v1122_v53 }
 0x4cb   :  { %v1227_v54 = vpop.f32.mrf.mxu1 }
 0x4cc   :  { %v1228_v56 = vadd.f32 %v1227_v54, %v1122_v53  ;;  %v2902_v11 = vmul.f32 -1.442695, %v1226_v37 }
 0x4cd   :  { %v1229_v57 = vpop.f32.mrf.mxu1 }
 0x4ce   :  { %v2903_v59 = vmul.f32 -1.442695, %v1228_v56  ;;  %v1230_v36 = vadd.f32 %v1229_v57, %v1127_v58 }
 0x4cf   :  { %v1231_v60 = vpop.f32.mrf.mxu1 }
 0x4d0   :  { %v1232_v44 = vadd.f32 %v1231_v60, %v1127_v58  ;;  %3239 = vpow2.f32 %v2903_v59  ;;  %v2904_v41 = vmul.f32 -1.442695, %v1230_v36 }
 0x4d1   :  { %v1235_v48 = vpop.f32.mrf.mxu1 }
 0x4d2   :  { %v2905_v31 = vmul.f32 -1.442695, %v1232_v44  ;;  %v1236_v61 = vadd.f32 %v1235_v48, %v1132_v46  ;;  %v1206_v44 = vadd.f32 %v3983_v35, %v1102_v22 }
 0x4d3   :  { %v1237_v52 = vpop.f32.mrf.mxu1 }
 0x4d4   :  { %3241 = vpow2.f32 %v2905_v31  ;;  %v2906_v55 = vmul.f32 -1.442695, %v1236_v61  ;;  %v1238_v0 = vadd.f32 %v1237_v52, %v1132_v46  ;;  %v1222_v46 = vadd.f32 %v1221_v49, %v1117_v9 }
 0x4d5   :  { %v1239_v1 = vpop.f32.mrf.mxu1  ;;  %v1210_v49 = vadd.f32 %v3985_v10, %v1107_v23 }
 0x4d6   :  { %v2907_v5 = vmul.f32 -1.442695, %v1238_v0  ;;  %v1240_v8 = vadd.f32 %v1239_v1, %v1137_v50  ;;  %3243 = vpow2.f32 %v2906_v55 }
 0x4d7   :  { %v1241_v14 = vpop.f32.mrf.mxu1 }
 0x4d8   :  { %3245 = vpow2.f32 %v2907_v5  ;;  %v2908_v15 = vmul.f32 -1.442695, %v1240_v8  ;;  %v1242_v16 = vadd.f32 %v1241_v14, %v1137_v50 }
 0x4d9   :  { %3247 = vpow2.f32 %v2904_v41 }
 0x4da   :  { %3249 = vpow2.f32 %v2908_v15  ;;  %v2909_v17 = vmul.f32 -1.442695, %v1242_v16 }
 0x4db   :  { %3251 = vpow2.f32 %v2902_v11 }
 0x4dc   :  { %3253 = vpow2.f32 %v2909_v17 }
 0x4dd   :  { %v3240_v2 = vpop.eup %3239  ;;  %3255 = vtanh.f32 %v1208_v24 }
 0x4de   :  { %3257 = vtanh.f32 %v1212_v25  ;;  %v1277_v51 = vadd.f32 1.0, %v3240_v2 }
 0x4df   :  { %3259 = vtanh.f32 %v1216_v26 }
 0x4e0   :  { %3261 = vtanh.f32 %v1218_v6 }
 0x4e1   :  { %v3242_v7 = vpop.eup %3241  ;;  %3263 = vtanh.f32 %v1220_v13  ;;  %v3995_v13 = vld [vmem:[%s4531_s2 + $0x74] ss:$8 sps:$4 sm:$0xff]  }
 0x4e2   :  { %v1279_v53 = vadd.f32 1.0, %v3242_v7  ;;  %3265 = vtanh.f32 %v1222_v46  ;;  %v3133_v7 = vld [vmem:[%s4536_s7 + $0x20] sm:$0xff]   ;;  %v4002_v46 = vld [vmem:[%s4531_s2 + $0x70] ss:$8 sps:$4 sm:$0xff]  }
 0x4e3   :  { %v3244_v50 = vpop.eup %3243  ;;  %3267 = vrcp.f32 %v1277_v51  ;;  %v4009_v51 = vld [vmem:[%s4531_s2 + $0x64] ss:$8 sps:$4 sm:$0xff]  }
 0x4e4   :  { %v1280_v39 = vadd.f32 1.0, %v3244_v50  ;;  %3269 = vrcp.f32 %v1279_v53  ;;  %v3134_v50 = vld [vmem:[%s4536_s7 + $0x28] sm:$0xff]  }
 0x4e5   :  { %v3246_v54 = vpop.eup %3245  ;;  %v4018_v53 = vld [vmem:[%s4531_s2 + $0x60] ss:$8 sps:$4 sm:$0xff]  }
 0x4e6   :  { %v3248_v56 = vpop.eup %3247  ;;  %v1281_v57 = vadd.f32 1.0, %v3246_v54  ;;  %v4024_v54 = vld [vmem:[%s4531_s2 + $0x54] ss:$8 sps:$4 sm:$0xff]  }
 0x4e7   :  { %v3250_v38 = vpop.eup %3249  ;;  %v1278_v47 = vadd.f32 1.0, %v3248_v56  ;;  %v4031_v56 = vld [vmem:[%s4531_s2 + $0x50] ss:$8 sps:$4 sm:$0xff]  }
 0x4e8   :  { %v3252_v40 = vpop.eup %3251  ;;  %v1282_v45 = vadd.f32 1.0, %v3250_v38  ;;  %3271 = vrcp.f32 %v1281_v57  ;;  %v4038_v57 = vld [vmem:[%s4531_s2 + $0x44] ss:$8 sps:$4 sm:$0xff]   ;;  %v3135_v38 = vld [vmem:[%s4536_s7 + $0x30] sm:$0xff]  }
 0x4e9   :  { %v3254_v58 = vpop.eup %3253  ;;  %v1276_v60 = vadd.f32 1.0, %v3252_v40  ;;  %v4053_v40 = vld [vmem:[%s4531_s2 + $0x34] ss:$8 sps:$4 sm:$0xff]  }
 0x4ea   :  { %3273 = vrcp.f32 %v1282_v45  ;;  %v1283_v59 = vadd.f32 1.0, %v3254_v58  ;;  %v3256_v36 = vpop.eup %3255  ;;  %v4060_v45 = vld [vmem:[%s4531_s2 + $0x30] ss:$8 sps:$4 sm:$0xff]   ;;  %v4067_v58 = vld [vmem:[%s4531_s2 + $0x24] ss:$8 sps:$4 sm:$0xff]  }
 0x4eb   :  { %3275 = vrcp.f32 %v1280_v39  ;;  %v3258_v48 = vpop.eup %3257  ;;  %v4047_v39 = vld [vmem:[%s4531_s2 + $0x40] ss:$8 sps:$4 sm:$0xff]  }
 0x4ec   :  { %3277 = vrcp.f32 %v1283_v59  ;;  %v3260_v31 = vpop.eup %3259  ;;  %v4082_v59 = vld [vmem:[%s4531_s2 + $0x14] ss:$8 sps:$4 sm:$0xff]  }
 0x4ed   :  { %3279 = vrcp.f32 %v1278_v47  ;;  %v3262_v61 = vpop.eup %3261  ;;  %v3136_v47 = vld [vmem:[%s4536_s7 + $0x38] sm:$0xff]  }
 0x4ee   :  { %3281 = vtanh.f32 %v1210_v49  ;;  %v3264_v37 = vpop.eup %3263  ;;  %v4076_v49 = vld [vmem:[%s4531_s2 + $0x20] ss:$8 sps:$4 sm:$0xff]  }
 0x4ef   :  { %3283 = vrcp.f32 %v1276_v60  ;;  %v3266_v52 = vpop.eup %3265  ;;  %v4089_v60 = vld [vmem:[%s4531_s2 + $0x10] ss:$8 sps:$4 sm:$0xff]  }
 0x4f0   :  { %3285 = vtanh.f32 %v1206_v44  ;;  %v3268_v55 = vpop.eup %3267  ;;  %v4096_v44 = vld [vmem:[%s4531_s2 + $0x4] ss:$8 sps:$4 sm:$0xff]  }
 0x4f1   :  { %v3270_v0 = vpop.eup %3269  ;;  %v1301_v22 = vmul.f32 %v3268_v55, %v3256_v36  ;;  %v3137_v36 = vld [vmem:[%s4530_s1 + $0x20] sm:$0xff]  }
 0x4f2   :  { %v1303_v11 = vmul.f32 %v3270_v0, %v3258_v48  ;;  %v4105_v48 = vld [vmem:[%s4531_s2] ss:$8 sps:$4 sm:$0xff]   ;;  %s3458_s2 = smov 124  }
 0x4f4   :  { %v1309_v26 = vpack.c.bf16 %v1303_v11, %v1301_v22 }
 0x4f5   :  { %v3272_v10 = vpop.eup %3271 }
 0x4f6   :  { %v1305_v9 = vmul.f32 %v3272_v10, %v3262_v61 }
 0x4f7   :  { %v3274_v41 = vpop.eup %3273 }
 0x4f8   :  { %v3276_v1 = vpop.eup %3275  ;;  %v1306_v5 = vmul.f32 %v3274_v41, %v3264_v37 }
 0x4f9   :  { %v3278_v3 = vpop.eup %3277  ;;  %v1304_v15 = vmul.f32 %v3276_v1, %v3260_v31  ;;  %v3138_v31 = vld [vmem:[%s4530_s1 + $0x28] sm:$0xff]  }
 0x4fa   :  { %v3280_v8 = vpop.eup %3279  ;;  %v1307_v35 = vmul.f32 %v3278_v3, %v3266_v52 }
 0x4fb   :  { %v3282_v14 = vpop.eup %3281  ;;  %v1310_v23 = vpack.c.bf16 %v1306_v5, %v1304_v15 }
 0x4fc   :  { %v3284_v16 = vpop.eup %3283  ;;  %v1311_v17 = vpack.c.bf16 %v1307_v35, %v1305_v9  ;;  %v1302_v24 = vmul.f32 %v3282_v14, %v3280_v8 }
 0x4fd   :  { %v3286_v25 = vpop.eup %3285 }
 0x4fe   :  { %1414 = vmatprep.subr.bf16.mxu0 %v1311_v17  ;;  %v1300_v2 = vmul.f32 %v3286_v25, %v3284_v16  ;;  %v1343_v25 = vpop.permute.xlu0 %1342 }
 0x4ff   :  { %1415 = vmatpush1.bf16.msra.mxu0 %v1310_v23  ;;  %v1348_v23 = vpop.permute.xlu1 %1347 }
 0x500   :  { %1416 = vmatprep.subr.bf16.mxu0 %v1309_v26  ;;  %v1308_v6 = vpack.c.bf16 %v1302_v24, %v1300_v2 }
 0x503   :  { %1417 = vmatpush1.bf16.msra.mxu0 %v1308_v6  ;;  %v1338_v6 = vpop.permute.xlu1 %1337 }
 0x504   :  { %1500 = vmatprep.subr.bf16.mxu0 %v3995_v13 }
 0x506   :  { %2930 = vmatmul.mubr.msk.bf16.vlgmr.msra.gmra.mxu0 %vm825_vm15, %v3133_v7 }
 0x507   :  { %1501 = vmatpush1.bf16.msra.mxu0 %v4002_v46  ;;  %1444 = vmatprep.mubr.bf16.mxu0 %v4543_v4 }
 0x508   :  { %1502 = vmatprep.subr.bf16.mxu0 %v4009_v51 }
 0x50b   :  { %1503 = vmatpush1.bf16.msra.mxu0 %v4018_v53 }
 0x50c   :  { %1504 = vmatprep.subr.bf16.mxu0 %v4024_v54 }
 0x50e   :  { %2931 = vmatmul.mubr.msk.bf16.gmra.mxu0 %vm825_vm15, %v3134_v50 }
 0x50f   :  { %1505 = vmatpush1.bf16.msra.mxu0 %v4031_v56  ;;  %1454 = vmatprep.mubr.bf16.mxu0 %v4543_v4 }
 0x510   :  { %1506 = vmatprep.subr.bf16.mxu0 %v4038_v57 }
 0x513   :  { %1507 = vmatpush1.bf16.msra.mxu0 %v4047_v39 }
 0x514   :  { %1508 = vmatprep.subr.bf16.mxu0 %v4053_v40 }
 0x516   :  { %2932 = vmatmul.mubr.msk.bf16.gmra.mxu0 %vm825_vm15, %v3135_v38 }
 0x517   :  { %1509 = vmatpush1.bf16.msra.mxu0 %v4060_v45  ;;  %1464 = vmatprep.mubr.bf16.mxu0 %v4543_v4 }
 0x518   :  { %1510 = vmatprep.subr.bf16.mxu0 %v4067_v58 }
 0x51b   :  { %1511 = vmatpush1.bf16.msra.mxu0 %v4076_v49 }
 0x51c   :  { %1512 = vmatprep.subr.bf16.mxu0 %v4082_v59 }
 0x51e   :  { %2933 = vmatmul.mubr.msk.bf16.gmra.mxu0 %vm825_vm15, %v3136_v47 }
 0x51f   :  { %1513 = vmatpush1.bf16.msra.mxu0 %v4089_v60  ;;  %1532 = vmatprep.mubr.bf16.mxu0 %v4543_v4 }
 0x520   :  { %1514 = vmatprep.subr.bf16.mxu0 %v4096_v44 }
 0x523   :  { %1515 = vmatpush1.bf16.msra.mxu0 %v4105_v48 }
 0x526   :  { %1533 = vmatmul.mubr.bf16.vlgmr.msra.gmra.mxu0 %v3137_v36  ;;  %v1333_v36 = vpop.permute.xlu0 %1332 }
 0x527   :  { %1542 = vmatprep.mubr.bf16.mxu0 %v4543_v4 }
 0x52e   :  { %1543 = vmatmul.mubr.bf16.gmra.mxu0 %v3138_v31 }
 0x52f   :  { %2006 = vmatprep.mubr.bf16.mxu0 %v4543_v4 }
 0x5c6   :  { %v1436_v61 = vpop.f32.mrf.mxu0 }
 0x5c8   :  { %v1438_v37 = vpop.f32.mrf.mxu0 }
 0x5c9   :  { %v1439_v29 = vadd.f32 %v1438_v37, %v1333_v36  ;;  %v2987_v37 = vld [vmem:[%s4537_s8 + $0x98] sm:$0xff] }
 0x5ca   :  { %v1440_v52 = vpop.f32.mrf.mxu0 }
 0x5cb   :  { %v1441_v38 = vadd.f32 %v1440_v52, %v1338_v6 }
 0x5cc   :  { %v1442_v55 = vpop.f32.mrf.mxu0 }
 0x5cd   :  { %v1443_v19 = vadd.f32 %v1442_v55, %v1338_v6  ;;  %v2984_v55 = vld [vmem:[%s4537_s8 + $0x80] sm:$0xff] }
 0x5ce   :  { %v1446_v0 = vpop.f32.mrf.mxu0 }
 0x5cf   :  { %v1447_v7 = vadd.f32 %v1446_v0, %v1343_v25 }
 0x5d0   :  { %v1448_v10 = vpop.f32.mrf.mxu0 }
 0x5d1   :  { %v1449_v31 = vadd.f32 %v1448_v10, %v1343_v25 }
 0x5d2   :  { %v1450_v41 = vpop.f32.mrf.mxu0 }
 0x5d3   :  { %v1451_v50 = vadd.f32 %v1450_v41, %v1348_v23  ;;  %v2985_v41 = vld [vmem:[%s4537_s8 + $0x88] sm:$0xff] }
 0x5d4   :  { %v1452_v1 = vpop.f32.mrf.mxu0 }
 0x5d5   :  { %v1453_v4 = vadd.f32 %v1452_v1, %v1348_v23  ;;  %v4567_v1 = vmov 0  }
 0x5d6   :  { %v4113_v3 = vpop.f32.mrf.mxu0 }
 0x5d7   :  { %4563 = vst [vmem:[#allocation13_spill] sm:$0xff] %v4113_v3 }
 0x5d8   :  { %v4115_v5 = vpop.f32.mrf.mxu0 }
 0x5d9   :  { %4564 = vst [vmem:[#allocation14_spill] sm:$0xff] %v4115_v5 }
 0x5da   :  { %v4117_v8 = vpop.f32.mrf.mxu0 }
 0x5db   :  { %4565 = vst [vmem:[#allocation15_spill] sm:$0xff] %v4117_v8  ;;  %v1437_v8 = vadd.f32 %v1436_v61, %v1333_v36 }
 0x5dc   :  { %v4119_v9 = vpop.f32.mrf.mxu0 }
 0x5dd   :  { %4566 = vst [vmem:[#allocation16_spill] sm:$0xff] %v4119_v9 }
 0x5de   :  { %v4121_v35 = vpop.f32.mrf.mxu0 }
 0x5e0   :  { %v4123_v11 = vpop.f32.mrf.mxu0 }
 0x5e2   :  { %v4125_v14 = vpop.f32.mrf.mxu0 }
 0x5e4   :  { %v4127_v15 = vpop.f32.mrf.mxu0 }
 0x5e6   :  { %v1534_v16 = vpop.f32.mrf.mxu0 }
 0x5e7   :  { %v1553_v27 = vadd.f32 %v1534_v16, %v1437_v8 }
 0x5e8   :  { %v1536_v17 = vpop.f32.mrf.mxu0 }
 0x5e9   :  { %v1554_v52 = vadd.f32 %v1536_v17, %v1439_v29  ;;  %v2949_v29 = vld [vmem:[%s4535_s6 + $0x88] sm:$0xff] }
 0x5ea   :  { %v1538_v22 = vpop.f32.mrf.mxu0 }
 0x5eb   :  { %v1555_v5 = vadd.f32 %v1538_v22, %v1441_v38  ;;  %v1596_v38 = vsel %vm1595_vm4, 65537, %v4567_v1 }
 0x5ec   :  { %v1540_v24 = vpop.f32.mrf.mxu0  ;;  %v1600_v30 = vrot.slane %v1596_v38, %v3747_v33 }
 0x5ed   :  { %v1556_v21 = vadd.f32 %v1540_v24, %v1443_v19  ;;  %v4134_v10 = vpack.c.bf16 %v1555_v5, %v1553_v27  ;;  %v2952_v19 = vld [vmem:[%s4535_s6 + $0xa0] sm:$0xff] }
 0x5ee   :  { %v1544_v26 = vpop.f32.mrf.mxu0  ;;  %v2948_v27 = vld [vmem:[%s4535_s6 + $0x80] sm:$0xff] }
 0x5ef   :  { %v1557_v3 = vadd.f32 %v1544_v26, %v1447_v7  ;;  %v4137_v61 = vpack.c.bf16 %v1556_v21, %v1554_v52  ;;  %v2951_v21 = vld [vmem:[%s4535_s6 + $0x98] sm:$0xff] }
 0x5f0   :  { %v1546_v2 = vpop.f32.mrf.mxu0 }
 0x5f1   :  { %v1558_v12 = vadd.f32 %v1546_v2, %v1449_v31 }
 0x5f2   :  { %v1548_v47 = vpop.f32.mrf.mxu0 }
 0x5f3   :  { %v1559_v20 = vadd.f32 %v1548_v47, %v1451_v50  ;;  %v1604_v47 = vrot.slane %v1596_v38, %v3749_v34 }
 0x5f4   :  { %v1550_v18 = vpop.f32.mrf.mxu0 }
 0x5f5   :  { %v4129_v9 = vpack.c.bf16 %v1559_v20, %v1557_v3  ;;  %v1560_v32 = vadd.f32 %v1550_v18, %v1453_v4  ;;  %v2954_v4 = vld [vmem:[%s4535_s6 + $0xb0] sm:$0xff]  ;;  %v2955_v18 = vld [vmem:[%s4535_s6 + $0xb8] sm:$0xff]  ;;  %v2953_v20 = vld [vmem:[%s4535_s6 + $0xa8] sm:$0xff]  ;;  %v1638_v3 = vsel %vm1637_vm9, 65537, %v4567_v1  ;;  %vm1606_vm9 = vcmp.ne.s16.totalorder %v1604_v47, 0 }
 0x5f6   :  { %v1642_v5 = vrot.slane %v1638_v3, %v3747_v33  ;;  %v1646_v8 = vrot.slane %v1638_v3, %v3749_v34 }
 0x5f7   :  { %v4131_v0 = vpack.c.bf16 %v1560_v32, %v1558_v12  ;;  %1615 = vrot.lane.b32.xlu0 %v4129_v9, %s3458_s2  ;;  %v2950_v12 = vld [vmem:[%s4535_s6 + $0x90] sm:$0xff] }
 0x5f8   :  { %v2986_v32 = vld [vmem:[%s4537_s8 + $0x90] sm:$0xff]  ;;  %vm4186_vm0 = vcmp.ne.s16.totalorder %v1642_v5, 0  ;;  %vm1648_vm1 = vcmp.ne.s16.totalorder %v1646_v8, 0 }
 0x5f9   :  { %1617 = vrot.lane.b32.xlu1 %v4131_v0, %s3458_s2 }
 0x5fb   :  { %1611 = vrot.lane.b32.xlu0 %v4134_v10, %s3458_s2 }
 0x5fd   :  { %1613 = vrot.lane.b32.xlu1 %v4137_v61, %s3458_s2 }
 0x5ff   :  { %1569 = vrot.lane.b32.xlu0 %v4131_v0, %s3459_s3 }
 0x601   :  { %1575 = vrot.lane.b32.xlu1 %v4129_v9, %s3459_s3 }
 0x603   :  { %1567 = vrot.lane.b32.xlu0 %v4137_v61, %s3459_s3 }
 0x605   :  { %1573 = vrot.lane.b32.xlu1 %v4134_v10, %s3459_s3 }
 0x607   :  { %1703 = vperm.xlu0 %3087, %v2954_v4  }
 0x609   :  { %1708 = vperm.xlu1 %3088, %v2955_v18  }
 0x60b   :  { %1693 = vperm.xlu0 %3087, %v2952_v19  }
 0x60d   :  { %1698 = vperm.xlu1 %3088, %v2953_v20  }
 0x60f   :  { %1683 = vperm.xlu0 %3087, %v2950_v12  }
 0x611   :  { %1688 = vperm.xlu1 %3088, %v2951_v21  }
 0x613   :  { %1673 = vperm.xlu0 %3087, %v2948_v27  }
 0x615   :  { %1678 = vperm.xlu1 %3088, %v2949_v29  }
 0x617   :  { %1914 = vperm.xlu0 %3087, %v2986_v32  }
 0x619   :  { %1919 = vperm.xlu1 %3088, %v2987_v37  }
 0x61b   :  { %1904 = vperm.xlu0 %3087, %v2984_v55  }
 0x61d   :  { %1909 = vperm.xlu1 %3088, %v2985_v41  }
 0x669   :  { %v1616_v16 = vpop.permute.xlu0 %1615 }
 0x66b   :  { %v1618_v22 = vpop.permute.xlu1 %1617 }
 0x66c   :  { %v1621_v23 = vsel %vm1619_vm10, %v1616_v16, %v1618_v22  ;;  %v1631_v24 = vsel %vm1619_vm10, %v1618_v22, %v1616_v16 }
 0x66d   :  { %v1651_v25 = vsel %vm4186_vm0, %v1621_v23, 0  ;;  %2960 = vmatprep.subr.msk.bf16.mxu1 %vm1648_vm1, %v1631_v24  ;;  %v1612_v26 = vpop.permute.xlu0 %1611 }
 0x66e   :  { %1748 = vmatpush1.bf16.msra.mxu1 %v1651_v25 }
 0x66f   :  { %v1614_v2 = vpop.permute.xlu1 %1613 }
 0x670   :  { %v1620_v6 = vsel %vm1619_vm10, %v1612_v26, %v1614_v2  ;;  %v1627_v7 = vsel %vm1619_vm10, %v1614_v2, %v1612_v26  ;;  %vm1605_vm10 = vcmp.ne.s16.totalorder %v1600_v30, 0 }
 0x671   :  { %v1649_v50 = vsel %vm4186_vm0, %v1620_v6, 0  ;;  %2961 = vmatprep.subr.msk.bf16.mxu1 %vm1648_vm1, %v1627_v7  ;;  %v1570_v36 = vpop.permute.xlu0 %1569 }
 0x672   :  { %1750 = vmatpush1.bf16.msra.mxu1 %v1649_v50 }
 0x673   :  { %1751 = vmatprep.subr.bf16.mxu1 %v4131_v0  ;;  %v1576_v28 = vpop.permute.xlu1 %1575 }
 0x674   :  { %v1579_v31 = vsel %vm1577_vm8, %v1576_v28, %v1570_v36  ;;  %v1589_v52 = vsel %vm1577_vm8, %v1570_v36, %v1576_v28 }
 0x675   :  { %v1609_v0 = vsel %vm1605_vm10, %v1589_v52, 0  ;;  %v1568_v18 = vpop.permute.xlu0 %1567 }
 0x676   :  { %1752 = vmatpush1.bf16.msra.mxu1 %v4129_v9  ;;  %v3139_v9 = vld [vmem:[%s4534_s5 + $0x40] sm:$0xff]  }
 0x677   :  { %1753 = vmatprep.subr.bf16.mxu1 %v4137_v61  ;;  %v1574_v4 = vpop.permute.xlu1 %1573 }
 0x678   :  { %v1578_v34 = vsel %vm1577_vm8, %v1574_v4, %v1568_v18  ;;  %v1585_v19 = vsel %vm1577_vm8, %v1568_v18, %v1574_v4 }
 0x679   :  { %v1607_v33 = vsel %vm1605_vm10, %v1585_v19, 0 }
 0x67a   :  { %1754 = vmatpush1.bf16.msra.mxu1 %v4134_v10  ;;  %v3140_v10 = vld [vmem:[%s4534_s5 + $0x48] sm:$0xff]  }
 0x67b   :  { %2962 = vmatprep.subr.msk.bf16.mxu1 %vm1606_vm9, %v1579_v31 }
 0x67e   :  { %1756 = vmatpush1.bf16.msra.mxu1 %v1609_v0 }
 0x67f   :  { %2963 = vmatprep.subr.msk.bf16.mxu1 %vm1606_vm9, %v1578_v34 }
 0x682   :  { %1758 = vmatpush1.bf16.msra.mxu1 %v1607_v33 }
 0x683   :  { %2072 = vmatprep.subr.bf16.mxu1 %v3995_v13  ;;  %v3141_v13 = vld [vmem:[%s4534_s5 + $0x50] sm:$0xff]  }
 0x685   :  { %2964 = vmatmul.mubr.msk.bf16.vlgmr.msra.gmra.mxu1 %vm595_vm14, %v3139_v9 }
 0x686   :  { %1785 = vmatprep.mubr.bf16.mxu1 %v4567_v1  ;;  %2073 = vmatpush1.bf16.msra.mxu1 %v4002_v46  ;;  %v3142_v46 = vld [vmem:[%s4534_s5 + $0x58] sm:$0xff]  }
 0x687   :  { %2074 = vmatprep.subr.bf16.mxu1 %v4009_v51  ;;  %v3143_v51 = vld [vmem:[%s4530_s1 + $0x30] sm:$0xff]  }
 0x68a   :  { %2075 = vmatpush1.bf16.msra.mxu1 %v4018_v53  ;;  %v3145_v53 = vld [vmem:[%s4530_s1 + $0x38] sm:$0xff]  }
 0x68b   :  { %2076 = vmatprep.subr.bf16.mxu1 %v4024_v54 }
 0x68d   :  { %2965 = vmatmul.mubr.msk.bf16.gmra.mxu1 %vm595_vm14, %v3140_v10 }
 0x68e   :  { %1795 = vmatprep.mubr.bf16.mxu1 %v4567_v1  ;;  %2077 = vmatpush1.bf16.msra.mxu1 %v4031_v56 }
 0x68f   :  { %2078 = vmatprep.subr.bf16.mxu1 %v4038_v57 }
 0x692   :  { %2079 = vmatpush1.bf16.msra.mxu1 %v4047_v39 }
 0x693   :  { %2080 = vmatprep.subr.bf16.mxu1 %v4053_v40 }
 0x695   :  { %2966 = vmatmul.mubr.msk.bf16.gmra.mxu1 %vm595_vm14, %v3141_v13 }
 0x696   :  { %1805 = vmatprep.mubr.bf16.mxu1 %v4567_v1  ;;  %2081 = vmatpush1.bf16.msra.mxu1 %v4060_v45 }
 0x697   :  { %2082 = vmatprep.subr.bf16.mxu1 %v4067_v58  ;;  %v1704_v58 = vpop.permute.xlu0 %1703 }
 0x69a   :  { %2083 = vmatpush1.bf16.msra.mxu1 %v4076_v49 }
 0x69b   :  { %2084 = vmatprep.subr.bf16.mxu1 %v4082_v59 }
 0x69d   :  { %2967 = vmatmul.mubr.msk.bf16.gmra.mxu1 %vm595_vm14, %v3142_v46 }
 0x69e   :  { %2085 = vmatpush1.bf16.msra.mxu1 %v4089_v60  ;;  %2104 = vmatprep.mubr.bf16.mxu1 %v4567_v1  ;;  %v1709_v60 = vpop.permute.xlu1 %1708 }
 0x69f   :  { %2086 = vmatprep.subr.bf16.mxu1 %v4096_v44 }
 0x6a2   :  { %2087 = vmatpush1.bf16.msra.mxu1 %v4105_v48  ;;  %v1694_v48 = vpop.permute.xlu0 %1693  ;;  %v1699_v21 = vpop.permute.xlu1 %1698 }
 0x6a5   :  { %2105 = vmatmul.mubr.bf16.vlgmr.msra.gmra.mxu1 %v3143_v51 }
 0x6a6   :  { %2114 = vmatprep.mubr.bf16.mxu1 %v4567_v1  ;;  %v1684_v24 = vpop.permute.xlu0 %1683  ;;  %v1689_v2 = vpop.permute.xlu1 %1688 }
 0x6aa   :  { %v1674_v28 = vpop.permute.xlu0 %1673  ;;  %v1679_v30 = vpop.permute.xlu1 %1678 }
 0x6ad   :  { %2115 = vmatmul.mubr.bf16.gmra.mxu1 %v3145_v53 }
 0x6ae   :  { %2538 = vmatprep.mubr.bf16.mxu1 %v4567_v1 }
 0x745   :  { %v4247_v54 = vpop.f32.mrf.mxu1 }
 0x747   :  { %v1779_v56 = vpop.f32.mrf.mxu1 }
 0x748   :  { %v1780_v36 = vadd.f32 %v1779_v56, %v1674_v28 }
 0x749   :  { %v4249_v57 = vpop.f32.mrf.mxu1 }
 0x74b   :  { %v1783_v39 = vpop.f32.mrf.mxu1 }
 0x74c   :  { %v1784_v31 = vadd.f32 %v1783_v39, %v1679_v30 }
 0x74d   :  { %v1787_v40 = vpop.f32.mrf.mxu1 }
 0x74e   :  { %v1788_v52 = vadd.f32 %v1787_v40, %v1684_v24 }
 0x74f   :  { %v1789_v45 = vpop.f32.mrf.mxu1 }
 0x750   :  { %v1790_v0 = vadd.f32 %v1789_v45, %v1684_v24 }
 0x751   :  { %v1791_v49 = vpop.f32.mrf.mxu1 }
 0x752   :  { %v1792_v34 = vadd.f32 %v1791_v49, %v1689_v2  ;;  %v1782_v49 = vadd.f32 %v4249_v57, %v1679_v30  ;;  %v3147_v30 = vld [vmem:[%s4536_s7 + $0x50] sm:$0xff]  }
 0x753   :  { %v1793_v59 = vpop.f32.mrf.mxu1 }
 0x754   :  { %v1794_v19 = vadd.f32 %v1793_v59, %v1689_v2 }
 0x755   :  { %v1797_v44 = vpop.f32.mrf.mxu1 }
 0x756   :  { %v1798_v5 = vadd.f32 %v1797_v44, %v1694_v48  ;;  %v1778_v44 = vadd.f32 %v4247_v54, %v1674_v28  ;;  %v3146_v28 = vld [vmem:[%s4536_s7 + $0x48] sm:$0xff]  }
 0x757   :  { %v1799_v61 = vpop.f32.mrf.mxu1 }
 0x758   :  { %v1800_v20 = vadd.f32 %v1799_v61, %v1694_v48  ;;  %v2968_v6 = vmul.f32 -1.442695, %v1798_v5 }
 0x759   :  { %v1801_v12 = vpop.f32.mrf.mxu1 }
 0x75a   :  { %v2969_v27 = vmul.f32 -1.442695, %v1800_v20  ;;  %v1802_v37 = vadd.f32 %v1801_v12, %v1699_v21 }
 0x75b   :  { %v1803_v29 = vpop.f32.mrf.mxu1 }
 0x75c   :  { %v1804_v32 = vadd.f32 %v1803_v29, %v1699_v21  ;;  %3287 = vpow2.f32 %v2969_v27  ;;  %v2970_v22 = vmul.f32 -1.442695, %v1802_v37 }
 0x75d   :  { %v1807_v55 = vpop.f32.mrf.mxu1 }
 0x75e   :  { %v2971_v41 = vmul.f32 -1.442695, %v1804_v32  ;;  %v1808_v3 = vadd.f32 %v1807_v55, %v1704_v58 }
 0x75f   :  { %v1809_v8 = vpop.f32.mrf.mxu1 }
 0x760   :  { %3289 = vpow2.f32 %v2971_v41  ;;  %v2972_v16 = vmul.f32 -1.442695, %v1808_v3  ;;  %v1810_v17 = vadd.f32 %v1809_v8, %v1704_v58 }
 0x761   :  { %v1811_v23 = vpop.f32.mrf.mxu1 }
 0x762   :  { %v2973_v25 = vmul.f32 -1.442695, %v1810_v17  ;;  %v1812_v26 = vadd.f32 %v1811_v23, %v1709_v60  ;;  %3291 = vpow2.f32 %v2972_v16 }
 0x763   :  { %v1813_v7 = vpop.f32.mrf.mxu1 }
 0x764   :  { %3293 = vpow2.f32 %v2973_v25  ;;  %v2974_v50 = vmul.f32 -1.442695, %v1812_v26  ;;  %v1814_v38 = vadd.f32 %v1813_v7, %v1709_v60 }
 0x765   :  { %3295 = vpow2.f32 %v2970_v22 }
 0x766   :  { %3297 = vpow2.f32 %v2974_v50  ;;  %v2975_v47 = vmul.f32 -1.442695, %v1814_v38 }
 0x767   :  { %3299 = vpow2.f32 %v2968_v6 }
 0x768   :  { %3301 = vpow2.f32 %v2975_v47  ;;  %v3144_v47 = vld [vmem:[%s4536_s7 + $0x40] sm:$0xff]  }
 0x769   :  { %v3288_v4 = vpop.eup %3287  ;;  %3303 = vtanh.f32 %v1780_v36  ;;  %v3148_v36 = vld [vmem:[%s4536_s7 + $0x58] sm:$0xff]  }
 0x76a   :  { %3305 = vtanh.f32 %v1784_v31  ;;  %v1849_v33 = vadd.f32 1.0, %v3288_v4  ;;  %v2106_v31 = vpop.f32.mrf.mxu1 }
 0x76b   :  { %3307 = vtanh.f32 %v1788_v52 }
 0x76c   :  { %3309 = vtanh.f32 %v1790_v0  ;;  %v2108_v52 = vpop.f32.mrf.mxu1 }
 0x76d   :  { %v3290_v18 = vpop.eup %3289  ;;  %3311 = vtanh.f32 %v1792_v34 }
 0x76e   :  { %v1851_v10 = vadd.f32 1.0, %v3290_v18  ;;  %3313 = vtanh.f32 %v1794_v19  ;;  %v2110_v4 = vpop.f32.mrf.mxu1 }
 0x76f   :  { %v3292_v9 = vpop.eup %3291  ;;  %3315 = vrcp.f32 %v1849_v33 }
 0x770   :  { %v1852_v56 = vadd.f32 1.0, %v3292_v9  ;;  %3317 = vrcp.f32 %v1851_v10  ;;  %v2112_v18 = vpop.f32.mrf.mxu1  ;;  %v1920_v9 = vpop.permute.xlu1 %1919 }
 0x771   :  { %v3294_v13 = vpop.eup %3293 }
 0x772   :  { %v3296_v46 = vpop.eup %3295  ;;  %v1853_v51 = vadd.f32 1.0, %v3294_v13  ;;  %v2116_v33 = vpop.f32.mrf.mxu1 }
 0x773   :  { %v3298_v53 = vpop.eup %3297  ;;  %v1850_v58 = vadd.f32 1.0, %v3296_v46  ;;  %v1915_v13 = vpop.permute.xlu0 %1914 }
 0x774   :  { %v3300_v39 = vpop.eup %3299  ;;  %v1854_v40 = vadd.f32 1.0, %v3298_v53  ;;  %3319 = vrcp.f32 %v1853_v51  ;;  %v2118_v46 = vpop.f32.mrf.mxu1 }
 0x775   :  { %v3302_v45 = vpop.eup %3301  ;;  %v1848_v60 = vadd.f32 1.0, %v3300_v39 }
 0x776   :  { %3321 = vrcp.f32 %v1854_v40  ;;  %v1855_v59 = vadd.f32 1.0, %v3302_v45  ;;  %v3304_v48 = vpop.eup %3303  ;;  %v2120_v40 = vpop.f32.mrf.mxu1 }
 0x777   :  { %3323 = vrcp.f32 %v1852_v56  ;;  %v3306_v61 = vpop.eup %3305  ;;  %v1910_v56 = vpop.permute.xlu1 %1909 }
 0x778   :  { %3325 = vrcp.f32 %v1855_v59  ;;  %v3308_v20 = vpop.eup %3307 }
 0x779   :  { %3327 = vrcp.f32 %v1850_v58  ;;  %v3310_v12 = vpop.eup %3309  ;;  %v1905_v58 = vpop.permute.xlu0 %1904 }
 0x77a   :  { %3329 = vtanh.f32 %v1782_v49  ;;  %v3312_v21 = vpop.eup %3311 }
 0x77b   :  { %3331 = vrcp.f32 %v1848_v60  ;;  %v3314_v27 = vpop.eup %3313 }
 0x77c   :  { %3333 = vtanh.f32 %v1778_v44  ;;  %v3316_v29 = vpop.eup %3315 }
 0x77d   :  { %v3318_v32 = vpop.eup %3317  ;;  %v1873_v25 = vmul.f32 %v3316_v29, %v3304_v48  ;;  %v2122_v29 = vpop.f32.mrf.mxu1 }
 0x77e   :  { %v1875_v16 = vmul.f32 %v3318_v32, %v3306_v61 }
 0x780   :  { %v1881_v7 = vpack.c.bf16 %v1875_v16, %v1873_v25  ;;  %v3016_v25 = vld [vmem:[%s4535_s6 + $0xd0] sm:$0xff] }
 0x781   :  { %v3320_v57 = vpop.eup %3319 }
 0x782   :  { %v1877_v8 = vmul.f32 %v3320_v57, %v3310_v12 }
 0x783   :  { %v3322_v37 = vpop.eup %3321 }
 0x784   :  { %v3324_v55 = vpop.eup %3323  ;;  %v1878_v3 = vmul.f32 %v3322_v37, %v3312_v21 }
 0x785   :  { %v3326_v41 = vpop.eup %3325  ;;  %v1876_v22 = vmul.f32 %v3324_v55, %v3308_v20 }
 0x786   :  { %v3328_v5 = vpop.eup %3327  ;;  %v1879_v54 = vmul.f32 %v3326_v41, %v3314_v27 }
 0x787   :  { %v3330_v17 = vpop.eup %3329  ;;  %v1882_v26 = vpack.c.bf16 %v1878_v3, %v1876_v22  ;;  %v3021_v22 = vld [vmem:[%s4535_s6 + $0xf8] sm:$0xff] }
 0x788   :  { %v3332_v23 = vpop.eup %3331  ;;  %v1883_v24 = vpack.c.bf16 %v1879_v54, %v1877_v8  ;;  %v1874_v2 = vmul.f32 %v3330_v17, %v3328_v5  ;;  %v3020_v17 = vld [vmem:[%s4535_s6 + $0xf0] sm:$0xff] }
 0x789   :  { %v3334_v6 = vpop.eup %3333 }
 0x78a   :  { %1986 = vmatprep.subr.bf16.mxu0 %v1883_v24  ;;  %v1872_v50 = vmul.f32 %v3334_v6, %v3332_v23  ;;  %v3018_v23 = vld [vmem:[%s4535_s6 + $0xe0] sm:$0xff]  ;;  %v3019_v24 = vld [vmem:[%s4535_s6 + $0xe8] sm:$0xff] }
 0x78b   :  { %1987 = vmatpush1.bf16.msra.mxu0 %v1882_v26  ;;  %v3017_v26 = vld [vmem:[%s4535_s6 + $0xd8] sm:$0xff]  ;;  %v3015_v6 = vld [vmem:[%s4535_s6 + $0xc8] sm:$0xff] }
 0x78c   :  { %1988 = vmatprep.subr.bf16.mxu0 %v1881_v7  ;;  %v1880_v38 = vpack.c.bf16 %v1874_v2, %v1872_v50  ;;  %v3014_v2 = vld [vmem:[%s4535_s6 + $0xc0] sm:$0xff]  ;;  %v763_v7 = vld [vmem:[%s4537_s8 + $0x30] sm:$0xff]  ;;  %v764_v50 = vld [vmem:[%s4537_s8 + $0x38] sm:$0xff] }
 0x78f   :  { %1989 = vmatpush1.bf16.msra.mxu0 %v1880_v38  ;;  %v2924_v38 = vld [vmem:[%s4537_s8 + $0x70] sm:$0xff] }
 0x792   :  { %2996 = vmatmul.mubr.msk.bf16.vlgmr.msra.gmra.mxu0 %vm825_vm15, %v3144_v47  ;;  %v2925_v47 = vld [vmem:[%s4537_s8 + $0x78] sm:$0xff] }
 0x793   :  { %2016 = vmatprep.mubr.bf16.mxu0 %v4567_v1 }
 0x79a   :  { %2997 = vmatmul.mubr.msk.bf16.gmra.mxu0 %vm825_vm15, %v3146_v28  ;;  %v2990_v28 = vld [vmem:[%s4537_s8 + $0xb0] sm:$0xff] }
 0x79b   :  { %2026 = vmatprep.mubr.bf16.mxu0 %v4567_v1 }
 0x7a2   :  { %2998 = vmatmul.mubr.msk.bf16.gmra.mxu0 %vm825_vm15, %v3147_v30  ;;  %v2991_v30 = vld [vmem:[%s4537_s8 + $0xb8] sm:$0xff] }
 0x7a3   :  { %2036 = vmatprep.mubr.bf16.mxu0 %v4567_v1 }
 0x7aa   :  { %2999 = vmatmul.mubr.msk.bf16.gmra.mxu0 %vm825_vm15, %v3148_v36  ;;  %v761_v36 = vld [vmem:[%s4537_s8 + $0x20] sm:$0xff] }
 0x7ab   :  { %2311 = vmatprep.mubr.bf16.mxu0 %v4567_v1 }
 0x852   :  { %v2008_v0 = vpop.f32.mrf.mxu0 }
 0x853   :  { %v2009_v44 = vadd.f32 %v2008_v0, %v1905_v58  ;;  %v3056_v0 = vld [vmem:[%s4537_s8 + $0xf0] sm:$0xff] }
 0x854   :  { %v2010_v34 = vpop.f32.mrf.mxu0 }
 0x855   :  { %v2011_v27 = vadd.f32 %v2010_v34, %v1905_v58  ;;  %v2125_v41 = vadd.f32 %v2106_v31, %v2009_v44  ;;  %v762_v31 = vld [vmem:[%s4537_s8 + $0x28] sm:$0xff]  ;;  %v2988_v34 = vld [vmem:[%s4537_s8 + $0xa0] sm:$0xff] }
 0x856   :  { %v2012_v19 = vpop.f32.mrf.mxu0 }
 0x857   :  { %v2013_v49 = vadd.f32 %v2012_v19, %v1910_v56  ;;  %v2126_v8 = vadd.f32 %v2108_v52, %v2011_v27  ;;  %v2922_v52 = vld [vmem:[%s4537_s8 + $0x60] sm:$0xff]  ;;  %v2989_v19 = vld [vmem:[%s4537_s8 + $0xa8] sm:$0xff] }
 0x858   :  { %v2014_v10 = vpop.f32.mrf.mxu0 }
 0x859   :  { %v2015_v61 = vadd.f32 %v2014_v10, %v1910_v56  ;;  %v2127_v32 = vadd.f32 %v2110_v4, %v2013_v49  ;;  %v2923_v4 = vld [vmem:[%s4537_s8 + $0x68] sm:$0xff]  ;;  %v2589_v10 = vld [vmem:[%s4539_s10 + $0x10] sm:$0xff] }
 0x85a   :  { %v2018_v51 = vpop.f32.mrf.mxu0 }
 0x85b   :  { %v2019_v39 = vadd.f32 %v2018_v51, %v1915_v13  ;;  %v2128_v3 = vadd.f32 %v2112_v18, %v2015_v61  ;;  %v4281_v54 = vpack.c.bf16 %v2127_v32, %v2125_v41  ;;  %v3057_v18 = vld [vmem:[%s4537_s8 + $0xf8] sm:$0xff]  ;;  %v2588_v51 = vld [vmem:[%s4539_s10 + $0x8] sm:$0xff] }
 0x85c   :  { %v2020_v53 = vpop.f32.mrf.mxu0 }
 0x85d   :  { %v2021_v59 = vadd.f32 %v2020_v53, %v1915_v13  ;;  %v2129_v20 = vadd.f32 %v2116_v33, %v2019_v39  ;;  %v4285_v16 = vpack.c.bf16 %v2128_v3, %v2126_v8  ;;  %v3054_v33 = vld [vmem:[%s4537_s8 + $0xe0] sm:$0xff]  ;;  %v2590_v13 = vld [vmem:[%s4539_s10 + $0x18] sm:$0xff] }
 0x85e   :  { %v2022_v45 = vpop.f32.mrf.mxu0  ;;  %v2741_v53 = vld [vmem:[%s4541_s12] sm:$0xff] }
 0x85f   :  { %v2023_v60 = vadd.f32 %v2022_v45, %v1920_v9  ;;  %v2130_v57 = vadd.f32 %v2118_v46, %v2021_v59  ;;  %v2587_v46 = vld [vmem:[%s4539_s10] sm:$0xff] }
 0x860   :  { %v2024_v48 = vpop.f32.mrf.mxu0 }
 0x861   :  { %v2131_v12 = vadd.f32 %v2120_v40, %v2023_v60  ;;  %v2025_v21 = vadd.f32 %v2024_v48, %v1920_v9  ;;  %v3055_v9 = vld [vmem:[%s4537_s8 + $0xe8] sm:$0xff] }
 0x862   :  { %v4432_v41 = vpop.f32.mrf.mxu0 }
 0x863   :  { %v2132_v37 = vadd.f32 %v2122_v29, %v2025_v21  ;;  %v4273_v55 = vpack.c.bf16 %v2131_v12, %v2129_v20 }
 0x864   :  { %v4434_v3 = vpop.f32.mrf.mxu0 }
 0x865   :  { %2169 = vrot.lane.b32.xlu0 %v4273_v55, %s3454_s18  ;;  %v4277_v5 = vpack.c.bf16 %v2132_v37, %v2130_v57  ;;  %v3149_v37 = vld [vmem:[%s4534_s5 + $0x60] sm:$0xff]  }
 0x867   :  { %2171 = vrot.lane.b32.xlu1 %v4277_v5, %s3454_s18 }
 0x869   :  { %2165 = vrot.lane.b32.xlu0 %v4281_v54, %s3454_s18 }
 0x86b   :  { %2167 = vrot.lane.b32.xlu1 %v4285_v16, %s3454_s18 }
 0x86d   :  { %2141 = vrot.lane.b32.xlu0 %v4277_v5, %s3455_s19 }
 0x86f   :  { %2147 = vrot.lane.b32.xlu1 %v4273_v55, %s3455_s19 }
 0x871   :  { %2139 = vrot.lane.b32.xlu0 %v4285_v16, %s3455_s19 }
 0x873   :  { %2145 = vrot.lane.b32.xlu1 %v4281_v54, %s3455_s19 }
 0x875   :  { %2239 = vperm.xlu0 %3087, %v3020_v17  }
 0x877   :  { %2244 = vperm.xlu1 %3088, %v3021_v22  }
 0x879   :  { %2229 = vperm.xlu0 %3087, %v3018_v23  }
 0x87b   :  { %2234 = vperm.xlu1 %3088, %v3019_v24  }
 0x87d   :  { %2219 = vperm.xlu0 %3087, %v3016_v25  }
 0x87f   :  { %2224 = vperm.xlu1 %3088, %v3017_v26  }
 0x881   :  { %2209 = vperm.xlu0 %3087, %v3014_v2  }
 0x883   :  { %2214 = vperm.xlu1 %3088, %v3015_v6  }
 0x885   :  { %797 = vperm.xlu0 %3087, %v763_v7  }
 0x887   :  { %802 = vperm.xlu1 %3088, %v764_v50  }
 0x889   :  { %1362 = vperm.xlu0 %3087, %v2924_v38  }
 0x88b   :  { %1367 = vperm.xlu1 %3088, %v2925_v47  }
 0x88d   :  { %1934 = vperm.xlu0 %3087, %v2990_v28  }
 0x88f   :  { %1939 = vperm.xlu1 %3088, %v2991_v30  }
 0x891   :  { %787 = vperm.xlu0 %3087, %v761_v36  }
 0x893   :  { %792 = vperm.xlu1 %3088, %v762_v31  }
 0x895   :  { %1352 = vperm.xlu0 %3087, %v2922_v52  }
 0x897   :  { %1357 = vperm.xlu1 %3088, %v2923_v4  }
 0x899   :  { %2466 = vperm.xlu0 %3087, %v3056_v0  }
 0x89b   :  { %2471 = vperm.xlu1 %3088, %v3057_v18  }
 0x89d   :  { %1924 = vperm.xlu0 %3087, %v2988_v34  }
 0x89f   :  { %1929 = vperm.xlu1 %3088, %v2989_v19  }
 0x8a1   :  { %2456 = vperm.xlu0 %3087, %v3054_v33  }
 0x8a3   :  { %2461 = vperm.xlu1 %3088, %v3055_v9  }
 0x8a5   :  { %2603 = vperm.xlu0 %3087, %v2589_v10  }
 0x8a7   :  { %2608 = vperm.xlu1 %3088, %v2590_v13  }
 0x8a9   :  { %2593 = vperm.xlu0 %3087, %v2587_v46  }
 0x8ab   :  { %2598 = vperm.xlu1 %3088, %v2588_v51  }
 0x8ad   :  { %2744 = vperm.xlu0 %3087, %v2741_v53  }
 0x8d7   :  { %v2170_v56 = vpop.permute.xlu0 %2169 }
 0x8d9   :  { %v2172_v39 = vpop.permute.xlu1 %2171 }
 0x8da   :  { %v2174_v40 = vsel %vm485_vm5, %v2170_v56, %v2172_v39  ;;  %v2183_v45 = vsel %vm485_vm5, %v2172_v39, %v2170_v56 }
 0x8db   :  { %v2187_v58 = vsel %vm3754_vm6, %v2174_v40, 0  ;;  %3026 = vmatprep.subr.msk.bf16.mxu0 %vm3758_vm7, %v2183_v45  ;;  %v2166_v49 = vpop.permute.xlu0 %2165 }
 0x8dc   :  { %2284 = vmatpush1.bf16.msra.mxu0 %v2187_v58 }
 0x8dd   :  { %v2168_v59 = vpop.permute.xlu1 %2167 }
 0x8de   :  { %v2173_v60 = vsel %vm485_vm5, %v2166_v49, %v2168_v59  ;;  %v2179_v44 = vsel %vm485_vm5, %v2168_v59, %v2166_v49 }
 0x8df   :  { %v2185_v48 = vsel %vm3754_vm6, %v2173_v60, 0  ;;  %3027 = vmatprep.subr.msk.bf16.mxu0 %vm3758_vm7, %v2179_v44  ;;  %v2142_v20 = vpop.permute.xlu0 %2141 }
 0x8e0   :  { %2286 = vmatpush1.bf16.msra.mxu0 %v2185_v48 }
 0x8e1   :  { %2287 = vmatprep.subr.bf16.mxu0 %v4277_v5  ;;  %v2148_v61 = vpop.permute.xlu1 %2147  ;;  %v4436_v5 = vpop.f32.mrf.mxu0 }
 0x8e2   :  { %v2150_v12 = vsel %vm443_vm11, %v2148_v61, %v2142_v20  ;;  %v2159_v21 = vsel %vm443_vm11, %v2142_v20, %v2148_v61 }
 0x8e3   :  { %v2163_v43 = vsel %vm3786_vm13, %v2159_v21, 0  ;;  %v2140_v27 = vpop.permute.xlu0 %2139  ;;  %v4438_v8 = vpop.f32.mrf.mxu0 }
 0x8e4   :  { %2288 = vmatpush1.bf16.msra.mxu0 %v4273_v55  ;;  %v3150_v55 = vld [vmem:[%s4534_s5 + $0x68] sm:$0xff]  }
 0x8e5   :  { %2289 = vmatprep.subr.bf16.mxu0 %v4285_v16  ;;  %v2146_v42 = vpop.permute.xlu1 %2145 }
 0x8e6   :  { %v2149_v29 = vsel %vm443_vm11, %v2146_v42, %v2140_v27  ;;  %v2155_v32 = vsel %vm443_vm11, %v2140_v27, %v2146_v42 }
 0x8e7   :  { %v2161_v57 = vsel %vm3786_vm13, %v2155_v32, 0 }
 0x8e8   :  { %2290 = vmatpush1.bf16.msra.mxu0 %v4281_v54  ;;  %v4440_v54 = vpop.f32.mrf.mxu0 }
 0x8e9   :  { %3028 = vmatprep.subr.msk.bf16.mxu0 %vm3782_vm12, %v2150_v12 }
 0x8ea   :  { %v4442_v16 = vpop.f32.mrf.mxu0 }
 0x8ec   :  { %2292 = vmatpush1.bf16.msra.mxu0 %v2163_v43  ;;  %v4444_v17 = vpop.f32.mrf.mxu0 }
 0x8ed   :  { %3029 = vmatprep.subr.msk.bf16.mxu0 %vm3782_vm12, %v2149_v29 }
 0x8ee   :  { %v4446_v22 = vpop.f32.mrf.mxu0 }
 0x8f0   :  { %2294 = vmatpush1.bf16.msra.mxu0 %v2161_v57  ;;  %v2240_v7 = vpop.permute.xlu0 %2239 }
 0x8f2   :  { %v2245_v47 = vpop.permute.xlu1 %2244 }
 0x8f3   :  { %3030 = vmatmul.mubr.msk.bf16.vlgmr.msra.gmra.mxu0 %vm595_vm14, %v3149_v37 }
 0x8f4   :  { %2321 = vmatprep.mubr.bf16.mxu0 %v4567_v1  ;;  %v2230_v30 = vpop.permute.xlu0 %2229 }
 0x8f6   :  { %v2235_v4 = vpop.permute.xlu1 %2234 }
 0x8f8   :  { %v2220_v40 = vpop.permute.xlu0 %2219 }
 0x8fa   :  { %v2225_v49 = vpop.permute.xlu1 %2224 }
 0x8fb   :  { %3031 = vmatmul.mubr.msk.bf16.gmra.mxu0 %vm595_vm14, %v3150_v55 }
 0x8fc   :  { %2331 = vmatprep.mubr.bf16.mxu0 %v4567_v1  ;;  %v2210_v20 = vpop.permute.xlu0 %2209 }
 0x8fe   :  { %v2215_v12 = vpop.permute.xlu1 %2214 }
 0x903   :  { %3032 = vmatmul.mubr.msk.bf16.gmra.mxu0 %vm595_vm14, %v3151_v62 }
 0x904   :  { %2341 = vmatprep.mubr.bf16.mxu0 %v4567_v1 }
 0x90b   :  { %3033 = vmatmul.mubr.msk.bf16.gmra.mxu0 %vm595_vm14, %v3152_v63 }
 0x90c   :  { %2659 = vmatprep.mubr.bf16.mxu0 %v4567_v1 }
 0x9b3   :  { %v4448_v23 = vpop.f32.mrf.mxu0 }
 0x9b5   :  { %v2315_v24 = vpop.f32.mrf.mxu0 }
 0x9b6   :  { %v2316_v21 = vadd.f32 %v2315_v24, %v2210_v20 }
 0x9b7   :  { %v4450_v25 = vpop.f32.mrf.mxu0 }
 0x9b9   :  { %v2319_v26 = vpop.f32.mrf.mxu0 }
 0x9ba   :  { %v2320_v42 = vadd.f32 %v2319_v26, %v2215_v12 }
 0x9bb   :  { %v2323_v2 = vpop.f32.mrf.mxu0 }
 0x9bc   :  { %v2324_v43 = vadd.f32 %v2323_v2, %v2220_v40 }
 0x9bd   :  { %v2325_v6 = vpop.f32.mrf.mxu0 }
 0x9be   :  { %v2326_v29 = vadd.f32 %v2325_v6, %v2220_v40 }
 0x9bf   :  { %v2327_v50 = vpop.f32.mrf.mxu0 }
 0x9c0   :  { %v2328_v57 = vadd.f32 %v2327_v50, %v2225_v49 }
 0x9c1   :  { %v2329_v38 = vpop.f32.mrf.mxu0 }
 0x9c2   :  { %v2330_v37 = vadd.f32 %v2329_v38, %v2225_v49  ;;  %v2318_v38 = vadd.f32 %v4450_v25, %v2215_v12 }
 0x9c3   :  { %v2333_v28 = vpop.f32.mrf.mxu0 }
 0x9c4   :  { %v2334_v13 = vadd.f32 %v2333_v28, %v2230_v30 }
 0x9c5   :  { %v2335_v36 = vpop.f32.mrf.mxu0 }
 0x9c6   :  { %v2336_v31 = vadd.f32 %v2335_v36, %v2230_v30  ;;  %v3034_v59 = vmul.f32 -1.442695, %v2334_v13 }
 0x9c7   :  { %v2337_v52 = vpop.f32.mrf.mxu0 }
 0x9c8   :  { %v3035_v0 = vmul.f32 -1.442695, %v2336_v31  ;;  %v2338_v19 = vadd.f32 %v2337_v52, %v2235_v4  ;;  %v2314_v52 = vadd.f32 %v4448_v23, %v2210_v20 }
 0x9c9   :  { %v2339_v18 = vpop.f32.mrf.mxu0 }
 0x9ca   :  { %v2340_v34 = vadd.f32 %v2339_v18, %v2235_v4  ;;  %3335 = vpow2.f32 %v3035_v0  ;;  %v3036_v56 = vmul.f32 -1.442695, %v2338_v19 }
 0x9cb   :  { %v2343_v33 = vpop.f32.mrf.mxu0 }
 0x9cc   :  { %v3037_v9 = vmul.f32 -1.442695, %v2340_v34  ;;  %v2344_v10 = vadd.f32 %v2343_v33, %v2240_v7 }
 0x9cd   :  { %v2345_v46 = vpop.f32.mrf.mxu0 }
 0x9ce   :  { %3337 = vpow2.f32 %v3037_v9  ;;  %v3038_v51 = vmul.f32 -1.442695, %v2344_v10  ;;  %v2346_v53 = vadd.f32 %v2345_v46, %v2240_v7 }
 0x9cf   :  { %v2347_v39 = vpop.f32.mrf.mxu0 }
 0x9d0   :  { %v3039_v45 = vmul.f32 -1.442695, %v2346_v53  ;;  %v2348_v58 = vadd.f32 %v2347_v39, %v2245_v47  ;;  %3339 = vpow2.f32 %v3038_v51 }
 0x9d1   :  { %v2349_v60 = vpop.f32.mrf.mxu0 }
 0x9d2   :  { %3341 = vpow2.f32 %v3039_v45  ;;  %v3040_v44 = vmul.f32 -1.442695, %v2348_v58  ;;  %v2350_v48 = vadd.f32 %v2349_v60, %v2245_v47 }
 0x9d3   :  { %3343 = vpow2.f32 %v3036_v56 }
 0x9d4   :  { %3345 = vpow2.f32 %v3040_v44  ;;  %v3041_v61 = vmul.f32 -1.442695, %v2350_v48 }
 0x9d5   :  { %3347 = vpow2.f32 %v3034_v59 }
 0x9d6   :  { %3349 = vpow2.f32 %v3041_v61 }
 0x9d7   :  { %v3336_v27 = vpop.eup %3335  ;;  %3351 = vtanh.f32 %v2316_v21 }
 0x9d8   :  { %3353 = vtanh.f32 %v2320_v42  ;;  %v2385_v55 = vadd.f32 1.0, %v3336_v27  ;;  %v3153_v42 = vld [vmem:[%s4536_s7 + $0x60] sm:$0xff]   ;;  %v3155_v27 = vld [vmem:[%s4536_s7 + $0x70] sm:$0xff]  }
 0x9d9   :  { %3355 = vtanh.f32 %v2324_v43  ;;  %v3154_v43 = vld [vmem:[%s4536_s7 + $0x68] sm:$0xff]  }
 0x9da   :  { %3357 = vtanh.f32 %v2326_v29  ;;  %v3156_v29 = vld [vmem:[%s4536_s7 + $0x78] sm:$0xff]  }
 0x9db   :  { %v3338_v32 = vpop.eup %3337  ;;  %3359 = vtanh.f32 %v2328_v57  ;;  %v798_v57 = vpop.permute.xlu0 %797 }
 0x9dc   :  { %v2387_v63 = vadd.f32 1.0, %v3338_v32  ;;  %3361 = vtanh.f32 %v2330_v37  ;;  %v803_v32 = vpop.permute.xlu1 %802 }
 0x9dd   :  { %v3340_v62 = vpop.eup %3339  ;;  %3363 = vrcp.f32 %v2385_v55 }
 0x9de   :  { %v2388_v26 = vadd.f32 1.0, %v3340_v62  ;;  %3365 = vrcp.f32 %v2387_v63 }
 0x9df   :  { %v3342_v7 = vpop.eup %3341  ;;  %v1363_v55 = vpop.permute.xlu0 %1362 }
 0x9e0   :  { %v3344_v47 = vpop.eup %3343  ;;  %v2389_v28 = vadd.f32 1.0, %v3342_v7  ;;  %v1368_v37 = vpop.permute.xlu1 %1367 }
 0x9e1   :  { %v3346_v24 = vpop.eup %3345  ;;  %v2386_v50 = vadd.f32 1.0, %v3344_v47 }
 0x9e2   :  { %v3348_v2 = vpop.eup %3347  ;;  %v2390_v6 = vadd.f32 1.0, %v3346_v24  ;;  %3367 = vrcp.f32 %v2389_v28 }
 0x9e3   :  { %v3350_v30 = vpop.eup %3349  ;;  %v2384_v31 = vadd.f32 1.0, %v3348_v2  ;;  %v1935_v63 = vpop.permute.xlu0 %1934 }
 0x9e4   :  { %3369 = vrcp.f32 %v2390_v6  ;;  %v2391_v36 = vadd.f32 1.0, %v3350_v30  ;;  %v3352_v4 = vpop.eup %3351  ;;  %v1940_v62 = vpop.permute.xlu1 %1939 }
 0x9e5   :  { %3371 = vrcp.f32 %v2388_v26  ;;  %v3354_v0 = vpop.eup %3353 }
 0x9e6   :  { %3373 = vrcp.f32 %v2391_v36  ;;  %v3356_v18 = vpop.eup %3355 }
 0x9e7   :  { %3375 = vrcp.f32 %v2386_v50  ;;  %v3358_v34 = vpop.eup %3357  ;;  %v788_v26 = vpop.permute.xlu0 %787 }
 0x9e8   :  { %3377 = vtanh.f32 %v2318_v38  ;;  %v3360_v19 = vpop.eup %3359  ;;  %v793_v28 = vpop.permute.xlu1 %792 }
 0x9e9   :  { %3379 = vrcp.f32 %v2384_v31  ;;  %v3362_v33 = vpop.eup %3361 }
 0x9ea   :  { %3381 = vtanh.f32 %v2314_v52  ;;  %v3364_v9 = vpop.eup %3363 }
 0x9eb   :  { %v3366_v10 = vpop.eup %3365  ;;  %v2409_v60 = vmul.f32 %v3364_v9, %v3352_v4  ;;  %v1353_v38 = vpop.permute.xlu0 %1352  ;;  %v1471_v9 = vadd.f32 %v4125_v14, %v1368_v37  ;;  %v2045_v14 = vadd.f32 %v4446_v22, %v1940_v62  ;;  %v4577_v22 = vld [vmem:[#allocation5_spill] sm:$0xff] }
 0x9ec   :  { %v2411_v40 = vmul.f32 %v3366_v10, %v3354_v0  ;;  %v1358_v30 = vpop.permute.xlu1 %1357  ;;  %v1473_v10 = vadd.f32 %v4127_v15, %v1368_v37  ;;  %v4578_v37 = vld [vmem:[#allocation6_spill] sm:$0xff] }
 0x9ee   :  { %v2417_v20 = vpack.c.bf16 %v2411_v40, %v2409_v60  ;;  %v4572_v40 = vld [vmem:[#allocation11_spill] sm:$0xff] }
 0x9ef   :  { %v3368_v25 = vpop.eup %3367  ;;  %v2467_v0 = vpop.permute.xlu0 %2466 }
 0x9f0   :  { %v2413_v39 = vmul.f32 %v3368_v25, %v3358_v34  ;;  %v2472_v52 = vpop.permute.xlu1 %2471  ;;  %v1467_v34 = vadd.f32 %v4121_v35, %v1363_v55  ;;  %v4570_v25 = vld [vmem:[#allocation9_spill] sm:$0xff]  ;;  %v4573_v35 = vld [vmem:[#allocation12_spill] sm:$0xff] }
 0x9f1   :  { %v3370_v13 = vpop.eup %3369 }
 0x9f2   :  { %v3372_v46 = vpop.eup %3371  ;;  %v2414_v53 = vmul.f32 %v3370_v13, %v3360_v19  ;;  %v1469_v19 = vadd.f32 %v4123_v11, %v1363_v55  ;;  %v903_v13 = vadd.f32 %v4570_v25, %v798_v57  ;;  %v2043_v11 = vadd.f32 %v4444_v17, %v1940_v62  ;;  %v4579_v62 = vld [vmem:[#allocation15_spill] sm:$0xff] }
 0x9f3   :  { %v3374_v51 = vpop.eup %3373  ;;  %v2412_v58 = vmul.f32 %v3372_v46, %v3356_v18  ;;  %v4571_v46 = vld [vmem:[#allocation10_spill] sm:$0xff]  ;;  %v895_v55 = vadd.f32 %v4578_v37, %v788_v26 }
 0x9f4   :  { %v3376_v56 = vpop.eup %3375  ;;  %v2415_v23 = vmul.f32 %v3374_v51, %v3362_v33  ;;  %v905_v51 = vadd.f32 %v4571_v46, %v798_v57  ;;  %v893_v57 = vadd.f32 %v4577_v22, %v788_v26 }
 0x9f5   :  { %v3378_v45 = vpop.eup %3377  ;;  %v2418_v44 = vpack.c.bf16 %v2414_v53, %v2412_v58  ;;  %v2039_v53 = vadd.f32 %v4440_v54, %v1935_v63  ;;  %v909_v58 = vadd.f32 %v4573_v35, %v803_v32 }
 0x9f6   :  { %v3380_v49 = vpop.eup %3379  ;;  %v2419_v59 = vpack.c.bf16 %v2415_v23, %v2413_v39  ;;  %v2410_v48 = vmul.f32 %v3378_v45, %v3376_v56  ;;  %v2041_v56 = vadd.f32 %v4442_v16, %v1935_v63  ;;  %v1930_v39 = vpop.permute.xlu1 %1929  ;;  %v907_v45 = vadd.f32 %v4572_v40, %v803_v32 }
 0x9f7   :  { %v3382_v61 = vpop.eup %3381  ;;  %v1480_v15 = vadd.f32 %v1469_v19, %v905_v51  ;;  %v1482_v54 = vadd.f32 %v1473_v10, %v909_v58  ;;  %v2035_v17 = vadd.f32 %v4438_v8, %v1930_v39  ;;  %v1461_v63 = vadd.f32 %v4579_v62, %v1358_v30  ;;  %v4581_v19 = vld [vmem:[#allocation13_spill] sm:$0xff] }
 0x9f8   :  { %2518 = vmatprep.subr.bf16.mxu1 %v2419_v59  ;;  %v2408_v12 = vmul.f32 %v3382_v61, %v3380_v49  ;;  %v1479_v49 = vadd.f32 %v1467_v34, %v903_v13  ;;  %v4574_v59 = vld [vmem:[#allocation16_spill] sm:$0xff]  ;;  %v1481_v61 = vadd.f32 %v1471_v9, %v907_v45  ;;  %v1457_v9 = vadd.f32 %v4581_v19, %v1353_v38 }
 0x9f9   :  { %2519 = vmatpush1.bf16.msra.mxu1 %v2418_v44  ;;  %v1463_v60 = vadd.f32 %v4574_v59, %v1358_v30  ;;  %v1925_v44 = vpop.permute.xlu0 %1924  ;;  %v2052_v16 = vadd.f32 %v2041_v56, %v1480_v15  ;;  %v2033_v8 = vadd.f32 %v4436_v5, %v1930_v39 }
 0x9fa   :  { %2520 = vmatprep.subr.bf16.mxu1 %v2417_v20  ;;  %v2416_v21 = vpack.c.bf16 %v2410_v48, %v2408_v12  ;;  %v2051_v20 = vadd.f32 %v2039_v53, %v1479_v49  ;;  %v4575_v12 = vld [vmem:[#allocation8_spill] sm:$0xff]  ;;  %v2029_v56 = vadd.f32 %v4432_v41, %v1925_v44  ;;  %v1475_v58 = vadd.f32 %v1457_v9, %v893_v57 }
 0x9fd   :  { %2521 = vmatpush1.bf16.msra.mxu1 %v2416_v21  ;;  %v899_v21 = vadd.f32 %v4575_v12, %v793_v28  ;;  %v2457_v10 = vpop.permute.xlu0 %2456 }
 0xa00   :  { %3062 = vmatmul.mubr.msk.bf16.vlgmr.msra.gmra.mxu1 %vm825_vm15, %v3153_v42 }
 0xa01   :  { %2544 = vmatprep.mubr.bf16.mxu1 %v4567_v1  ;;  %v2604_v59 = vpop.permute.xlu0 %2603 }
 0xa08   :  { %3063 = vmatmul.mubr.msk.bf16.gmra.mxu1 %vm825_vm15, %v3154_v43  ;;  %v2053_v43 = vadd.f32 %v2043_v11, %v1481_v61 }
 0xa09   :  { %2550 = vmatprep.mubr.bf16.mxu1 %v4567_v1 }
 0xa10   :  { %3064 = vmatmul.mubr.msk.bf16.gmra.mxu1 %vm825_vm15, %v3155_v27  ;;  %v2054_v27 = vadd.f32 %v2045_v14, %v1482_v54  ;;  %v2047_v14 = vadd.f32 %v2029_v56, %v1475_v58 }
 0xa11   :  { %2560 = vmatprep.mubr.bf16.mxu1 %v4567_v1 }
 0xa18   :  { %3065 = vmatmul.mubr.msk.bf16.gmra.mxu1 %vm825_vm15, %v3156_v29  ;;  %v4576_v29 = vld [vmem:[#allocation14_spill] sm:$0xff] }
 0xa19   :  { %2782 = vmatprep.mubr.bf16.mxu1 %v4567_v1  ;;  %v1459_v32 = vadd.f32 %v4576_v29, %v1353_v38 }
 0xa1b   :  { %v1476_v26 = vadd.f32 %v1459_v32, %v895_v55 }
 0xac0   :  { %v2540_v7 = vpop.f32.mrf.mxu1 }
 0xac1   :  { %v1478_v7 = vadd.f32 %v1463_v60, %v899_v21 }
 0xac2   :  { %v2541_v47 = vpop.f32.mrf.mxu1 }
 0xac3   :  { %v2462_v47 = vpop.permute.xlu1 %2461  ;;  %v2050_v46 = vadd.f32 %v2035_v17, %v1478_v7 }
 0xac4   :  { %v2542_v24 = vpop.f32.mrf.mxu1 }
 0xac6   :  { %v2543_v2 = vpop.f32.mrf.mxu1 }
 0xac7   :  { %v2031_v2 = vadd.f32 %v4434_v3, %v1925_v44  ;;  %v2609_v60 = vpop.permute.xlu1 %2608 }
 0xac8   :  { %v2546_v6 = vpop.f32.mrf.mxu1 }
 0xac9   :  { %v2048_v40 = vadd.f32 %v2031_v2, %v1476_v26 }
 0xaca   :  { %v2547_v50 = vpop.f32.mrf.mxu1 }
 0xacc   :  { %v2548_v36 = vpop.f32.mrf.mxu1 }
 0xace   :  { %v2549_v31 = vpop.f32.mrf.mxu1 }
 0xacf   :  { %v4580_v31 = vld [vmem:[#allocation7_spill] sm:$0xff] }
 0xad0   :  { %v4474_v4 = vpop.f32.mrf.mxu1  ;;  %v897_v34 = vadd.f32 %v4580_v31, %v793_v28 }
 0xad1   :  { %v2553_v5 = vadd.f32 %v4474_v4, %v2457_v10  ;;  %v3158_v4 = vld [vmem:[%s4538_s9 + $0x8] sm:$0xff]  }
 0xad2   :  { %v2554_v18 = vpop.f32.mrf.mxu1  ;;  %v1477_v53 = vadd.f32 %v1461_v63, %v897_v34 }
 0xad3   :  { %v2555_v30 = vadd.f32 %v2554_v18, %v2457_v10  ;;  %v2571_v15 = vadd.f32 %v2553_v5, %v2047_v14 }
 0xad4   :  { %v2556_v33 = vpop.f32.mrf.mxu1  ;;  %v2049_v38 = vadd.f32 %v2033_v8, %v1477_v53 }
 0xad5   :  { %v2557_v3 = vadd.f32 %v2556_v33, %v2462_v47  ;;  %v3157_v33 = vld [vmem:[%s4538_s9] sm:$0xff]  }
 0xad6   :  { %v2558_v23 = vpop.f32.mrf.mxu1 }
 0xad7   :  { %v2559_v6 = vadd.f32 %v2558_v23, %v2462_v47  ;;  %v2573_v49 = vadd.f32 %v2557_v3, %v2049_v38 }
 0xad8   :  { %v2562_v48 = vpop.f32.mrf.mxu1 }
 0xad9   :  { %v2563_v25 = vadd.f32 %v2562_v48, %v2467_v0  ;;  %v2574_v45 = vadd.f32 %v2559_v6, %v2050_v46  ;;  %v2583_v41 = vpack.c.bf16 %v2573_v49, %v2571_v15  ;;  %v2594_v48 = vpop.permute.xlu0 %2593 }
 0xada   :  { %v2564_v42 = vpop.f32.mrf.mxu1 }
 0xadb   :  { %v2565_v50 = vadd.f32 %v2564_v42, %v2467_v0  ;;  %v2575_v39 = vadd.f32 %v2563_v25, %v2051_v20  ;;  %v2572_v0 = vadd.f32 %v2555_v30, %v2048_v40 }
 0xadc   :  { %v2566_v24 = vpop.f32.mrf.mxu1 }
 0xadd   :  { %v2567_v36 = vadd.f32 %v2566_v24, %v2472_v52  ;;  %v2576_v35 = vadd.f32 %v2565_v50, %v2052_v16  ;;  %v2599_v16 = vpop.permute.xlu1 %2598 }
 0xade   :  { %v2568_v13 = vpop.f32.mrf.mxu1 }
 0xadf   :  { %v2569_v51 = vadd.f32 %v2568_v13, %v2472_v52  ;;  %v2577_v23 = vadd.f32 %v2567_v36, %v2053_v43  ;;  %v2584_v52 = vpack.c.bf16 %v2574_v45, %v2572_v0 }
 0xae1   :  { %v2578_v28 = vadd.f32 %v2569_v51, %v2054_v27  ;;  %v2585_v18 = vpack.c.bf16 %v2577_v23, %v2575_v39 }
 0xae3   :  { %v2586_v11 = vpack.c.bf16 %v2578_v28, %v2576_v35 }
 0xae5   :  { %2639 = vmatprep.subr.bf16.mxu0 %v2586_v11 }
 0xae6   :  { %2640 = vmatpush1.bf16.msra.mxu0 %v2585_v18 }
 0xae7   :  { %2641 = vmatprep.subr.bf16.mxu0 %v2584_v52 }
 0xaea   :  { %2642 = vmatpush1.bf16.msra.mxu0 %v2583_v41 }
 0xaed   :  { %3068 = vmatmul.mubr.msk.bf16.vlgmr.msra.gmra.mxu0 %vm825_vm15, %v3157_v33 }
 0xaee   :  { %2669 = vmatprep.mubr.bf16.mxu0 %v4567_v1 }
 0xaf5   :  { %3069 = vmatmul.mubr.msk.bf16.gmra.mxu0 %vm825_vm15, %v3158_v4 }
 0xbad   :  { %v2661_v44 = vpop.f32.mrf.mxu0 }
 0xbae   :  { %v4515_v32 = vadd.f32 %v2661_v44, %v2594_v48 }
 0xbaf   :  { %v2663_v61 = vpop.f32.mrf.mxu0 }
 0xbb0   :  { %v4510_v54 = vadd.f32 %v2663_v61, %v2594_v48  ;;  %v3070_v7 = vmul.f32 -1.442695, %v4515_v32 }
 0xbb1   :  { %v2665_v20 = vpop.f32.mrf.mxu0 }
 0xbb2   :  { %v3071_v12 = vmul.f32 -1.442695, %v4510_v54  ;;  %v4513_v1 = vadd.f32 %v2665_v20, %v2599_v16 }
 0xbb3   :  { %v2667_v21 = vpop.f32.mrf.mxu0 }
 0xbb4   :  { %v2668_v42 = vadd.f32 %v2667_v21, %v2599_v16  ;;  %3383 = vpow2.f32 %v3071_v12  ;;  %v3072_v37 = vmul.f32 -1.442695, %v4513_v1 }
 0xbb5   :  { %v2671_v43 = vpop.f32.mrf.mxu0 }
 0xbb6   :  { %v3073_v27 = vmul.f32 -1.442695, %v2668_v42  ;;  %v2672_v29 = vadd.f32 %v2671_v43, %v2604_v59 }
 0xbb7   :  { %v2673_v17 = vpop.f32.mrf.mxu0 }
 0xbb8   :  { %3385 = vpow2.f32 %v3073_v27  ;;  %v3074_v22 = vmul.f32 -1.442695, %v2672_v29  ;;  %v2674_v57 = vadd.f32 %v2673_v17, %v2604_v59  ;;  %v2736_v59 = vld [vmem:[%s4540_s11] sm:$0xf] }
 0xbb9   :  { %v2675_v55 = vpop.f32.mrf.mxu0 }
 0xbba   :  { %v3075_v62 = vmul.f32 -1.442695, %v2674_v57  ;;  %v2676_v63 = vadd.f32 %v2675_v55, %v2609_v60  ;;  %3387 = vpow2.f32 %v3074_v22 }
 0xbbb   :  { %v2677_v47 = vpop.f32.mrf.mxu0 }
 0xbbc   :  { %3389 = vpow2.f32 %v3075_v62  ;;  %v3076_v24 = vmul.f32 -1.442695, %v2676_v63  ;;  %v2678_v2 = vadd.f32 %v2677_v47, %v2609_v60  ;;  %v2745_v60 = vpop.permute.xlu0 %2744 }
 0xbbd   :  { %3391 = vpow2.f32 %v3072_v37 }
 0xbbe   :  { %3393 = vpow2.f32 %v3076_v24  ;;  %v3077_v6 = vmul.f32 -1.442695, %v2678_v2 }
 0xbbf   :  { %3395 = vpow2.f32 %v3070_v7 }
 0xbc0   :  { %3397 = vpow2.f32 %v3077_v6 }
 0xbc1   :  { %v3384_v50 = vpop.eup %3383 }
 0xbc2   :  { %v2705_v31 = vadd.f32 1.0, %v3384_v50 }
 0xbc4   :  { %3399 = vrcp.f32 %v2705_v31 }
 0xbc5   :  { %v3386_v36 = vpop.eup %3385 }
 0xbc6   :  { %v2707_v19 = vadd.f32 1.0, %v3386_v36 }
 0xbc7   :  { %v3388_v34 = vpop.eup %3387 }
 0xbc8   :  { %v2708_v13 = vadd.f32 1.0, %v3388_v34  ;;  %3401 = vrcp.f32 %v2707_v19 }
 0xbc9   :  { %v3390_v9 = vpop.eup %3389 }
 0xbca   :  { %v3392_v8 = vpop.eup %3391  ;;  %v2709_v10 = vadd.f32 1.0, %v3390_v9 }
 0xbcb   :  { %v3394_v25 = vpop.eup %3393  ;;  %v2706_v51 = vadd.f32 1.0, %v3392_v8 }
 0xbcc   :  { %v3396_v26 = vpop.eup %3395  ;;  %v2710_v46 = vadd.f32 1.0, %v3394_v25  ;;  %3403 = vrcp.f32 %v2709_v10 }
 0xbcd   :  { %v3398_v30 = vpop.eup %3397  ;;  %v2704_v56 = vadd.f32 1.0, %v3396_v26 }
 0xbce   :  { %3405 = vrcp.f32 %v2710_v46  ;;  %v2711_v53 = vadd.f32 1.0, %v3398_v30 }
 0xbcf   :  { %3407 = vrcp.f32 %v2708_v13 }
 0xbd0   :  { %3409 = vrcp.f32 %v2711_v53 }
 0xbd1   :  { %3411 = vrcp.f32 %v2706_v51  ;;  %v3400_v3 = vpop.eup %3399 }
 0xbd2   :  { %3413 = vrcp.f32 %v2704_v56  ;;  %v2729_v49 = vmul.f32 %v3400_v3, %v4510_v54 }
 0xbd5   :  { %v3402_v23 = vpop.eup %3401 }
 0xbd6   :  { %v2731_v5 = vmul.f32 %v3402_v23, %v2668_v42 }
 0xbd8   :  { %v2738_v41 = vpack.c.bf16 %v2731_v5, %v2729_v49 }
 0xbd9   :  { %v3404_v40 = vpop.eup %3403 }
 0xbda   :  { %v2733_v39 = vmul.f32 %v3404_v40, %v2674_v57 }
 0xbdb   :  { %v3406_v45 = vpop.eup %3405 }
 0xbdc   :  { %v3408_v35 = vpop.eup %3407  ;;  %v2734_v58 = vmul.f32 %v3406_v45, %v2676_v63 }
 0xbdd   :  { %v3410_v28 = vpop.eup %3409  ;;  %v2732_v11 = vmul.f32 %v3408_v35, %v2672_v29 }
 0xbde   :  { %v3412_v38 = vpop.eup %3411  ;;  %v2735_v0 = vmul.f32 %v3410_v28, %v2678_v2 }
 0xbdf   :  { %v3414_v14 = vpop.eup %3413  ;;  %v2730_v52 = vmul.f32 %v3412_v38, %v4513_v1  ;;  %v2739_v15 = vpack.c.bf16 %v2734_v58, %v2732_v11 }
 0xbe0   :  { %v2740_v18 = vpack.c.bf16 %v2735_v0, %v2733_v39  ;;  %v2728_v33 = vmul.f32 %v3414_v14, %v4515_v32 }
 0xbe2   :  { %2762 = vmatprep.subr.bf16.mxu1 %v2740_v18  ;;  %v2737_v4 = vpack.c.bf16 %v2730_v52, %v2728_v33 }
 0xbe3   :  { %2763 = vmatpush1.bf16.msra.mxu1 %v2739_v15 }
 0xbe4   :  { %2764 = vmatprep.subr.bf16.mxu1 %v2738_v41 }
 0xbe7   :  { %2765 = vmatpush1.bf16.msra.mxu1 %v2737_v4 }
 0xbea   :  { %3078 = vmatmul.mubr.msk.bf16.vlgmr.msra.gmra.mxu1 %vm825_vm15, %v2736_v59 }
 0xcaa   :  { %v2784_v44 = vpop.f32.mrf.mxu1 }
 0xcab   :  { %v2785_v48 = vadd.f32 %v2784_v44, %v2745_v60 }
 0xcac   :  { %v2786_v61 = vpop.f32.mrf.mxu1 }
 0xcad   :  { %2791 = vst [vmem:[#allocation2] sm:$0xff] %v2785_v48  ;;  %v2787_v54 = vadd.f32 %v2786_v61, %v2745_v60 }
 0xcae   :  { %v2788_v20 = vpop.f32.mrf.mxu1 }
 0xcaf   :  { %2792 = vst [vmem:[#allocation2 + $0x8] sm:$0xff] %v2787_v54 }
 0xcb0   :  { %v2789_v16 = vpop.f32.mrf.mxu1 }
 0xcb1   :  { %3442 = shalt.err (!%p3439_p4)
}
 0xcb2   :  { %2802 = dma.vmem_to_hbm [thread:$0]  %s2800_s27, 256, %s4542_s13, [#allocation3]  }
 0xcb3   :  { %3451 = dma.done.wait [#allocation3], 256  }
 0xcb4   :  { %3452 = vsyncadd [#allocation3], 4294967040 }
 0xcb5   :  { %2806 = vsyncpa [#allocation3], 1 }

</bundles_post_ra>
